<compile_context>
chip_gen: v7x
topology: tpu7x:2x2x1
jax: 0.10.0
libtpu: 0.0.40
codegen_flags: <defaults>
</compile_context>

<pallas_src>
import functools
import math

import jax
import jax.numpy as jnp
from jax.experimental import pallas as pl
from jax.experimental.pallas import tpu as pltpu


def _round_up(n, m):
    return ((n + m - 1) // m) * m


def _pick_t_chunk(seq_len, cap=16):
    """Time-chunk size: minimize grid steps first, then padded (masked) steps.

    cap=16 is conservative for v7x's 64 MiB VMEM; v6e (128 MiB) could go 32-64.
    """
    best_c, best_key = 1, None
    for c in range(1, min(cap, seq_len) + 1):
        n_chunks = -(-seq_len // c)
        key = (n_chunks, n_chunks * c - seq_len, -c)
        if best_key is None or key < best_key:
            best_key, best_c = key, c
    return best_c


def _default_batch_tiles(b_pad):
    # v7x has 2 TensorCores per chip: split the batch across them when each
    # tile still has >= 8 (sublane-aligned) rows.  Single tile elsewhere, since
    # on 1-TC chips splitting only halves the recurrent matmul M and doubles
    # the sequential grid length.
    try:
        kind = jax.devices()[0].device_kind.lower()
    except Exception:
        kind = ""
    if "v7" in kind and b_pad >= 16 and b_pad % 16 == 0:
        return 2
    return 1


def _vmem_limit_bytes(t_chunk, b_tile, i_pad, h_pad, num_layers,
                      compute_dtype, seq_dtype):
    """Scoped-VMEM budget from the actual block footprint (2x for buffering),
    clamped to [16 MiB, 64 MiB] so it is valid on every TPU generation."""
    cd = jnp.dtype(compute_dtype).itemsize
    sd = jnp.dtype(seq_dtype).itemsize
    g = 4 * h_pad
    stream = t_chunk * b_tile * (i_pad * cd + h_pad * sd)        # x in + seq out
    weights = (i_pad + h_pad) * g * cd + (num_layers - 1) * 2 * h_pad * g * cd
    biases = num_layers * g * 4
    state = 2 * num_layers * b_tile * h_pad * 4                  # h/c out blocks
    chunk_tmp = t_chunk * b_tile * g * 4                         # f32 xg_all temp
    est = 2 * (stream + weights + biases + state) + chunk_tmp
    return int(min(max(est + (4 << 20), 16 << 20), 64 << 20))


def lstm_kernel(*refs, num_layers, h_pad, t_chunk, tail_rem, compute_dtype):
    # refs = (x, Wx0, b0, Wh0, [Wx_l, Wh_l, b_l for l in 1..L-1],
    #         seq_out, h_out, c_out)
    n_in = 4 + 3 * (num_layers - 1)
    x_ref, wx0_ref, b0_ref, wh0_ref = refs[0:4]
    layer_refs = refs[4:n_in]
    seq_ref, h_ref, c_ref = refs[n_in:n_in + 3]

    H = h_pad
    b_tile = x_ref.shape[1]
    i_pad = x_ref.shape[2]
    t_idx = pl.program_id(1)

    # (Re)initialize the carried state at the start of each batch tile's time
    # sweep.  The h/c output blocks have a constant time index, so they stay
    # VMEM-resident across the whole recurrence (no separate scratch needed).
    @pl.when(t_idx == 0)
    def _():
        h_ref[...] = jnp.zeros_like(h_ref)
        c_ref[...] = jnp.zeros_like(c_ref)

    # Keep per-layer state in values across the chunk; touch refs only at
    # chunk boundaries.
    hs = [h_ref[l] for l in range(num_layers)]
    cs = [c_ref[l] for l in range(num_layers)]

    # Layer-0 input projection for the WHOLE chunk as a single MXU matmul
    # (M = t_chunk*b_tile instead of per-step M = b_tile), one bias broadcast.
    x_chunk = x_ref[...].reshape(t_chunk * b_tile, i_pad)
    xg_all = jnp.dot(x_chunk, wx0_ref[...],
                     preferred_element_type=jnp.float32) + b0_ref[...]

    # Hoist all grid-invariant operand reads out of the unrolled time loop.
    wh0 = wh0_ref[...]
    upper = []
    for l in range(1, num_layers):
        wx_r, wh_r, b_r = layer_refs[3 * (l - 1):3 * l]
        upper.append((wx_r[...], wh_r[...],
                      jnp.broadcast_to(b_r[...], (b_tile, 4 * H))))

    def cell(gates, c_prev):
        # gates: (b_tile, 4*H) f32; slices are lane-aligned (H % 128 == 0).
        i_t = jax.nn.sigmoid(gates[:, 0 * H:1 * H])
        f_t = jax.nn.sigmoid(gates[:, 1 * H:2 * H])
        g_t = jnp.tanh(gates[:, 2 * H:3 * H])
        o_t = jax.nn.sigmoid(gates[:, 3 * H:4 * H])
        c_new = f_t * c_prev + i_t * g_t
        h_new = o_t * jnp.tanh(c_new)
        return h_new, c_new

    # Padded timesteps exist only in the LAST time chunk (tail_rem > 0); there
    # the state update is masked so the final (h, c) match an exact-S run.
    not_last_chunk = t_idx < pl.num_programs(1) - 1

    # Fully unrolled time loop: static indices -> aligned, unmasked loads and
    # stores, straight-line code for the scheduler.
    # TODO(synk): for large b_tile*H the straight-line unroll can spill vregs;
    # switch to lax.fori_loop with partial unroll (and/or an in-kernel batch
    # slab loop) in that regime.
    for tt in range(t_chunk):
        new_hs, new_cs = [], []

        # Layer 0: chunk-precomputed x-projection + recurrent h @ Wh0.
        gates0 = xg_all[tt * b_tile:(tt + 1) * b_tile, :] + jnp.dot(
            hs[0].astype(compute_dtype), wh0, preferred_element_type=jnp.float32)
        h_l, c_l = cell(gates0, cs[0])
        new_hs.append(h_l)
        new_cs.append(c_l)

        # Layers >= 1: two matmuls on separate resident weights (no concat).
        for l in range(1, num_layers):
            wx_v, wh_v, b_v = upper[l - 1]
            gates = (jnp.dot(h_l.astype(compute_dtype), wx_v,
                             preferred_element_type=jnp.float32) +
                     jnp.dot(hs[l].astype(compute_dtype), wh_v,
                             preferred_element_type=jnp.float32) + b_v)
            h_l, c_l = cell(gates, cs[l])
            new_hs.append(h_l)
            new_cs.append(c_l)

        if tail_rem and tt >= tail_rem:
            hs = [jnp.where(not_last_chunk, nh, oh) for nh, oh in zip(new_hs, hs)]
            cs = [jnp.where(not_last_chunk, nc, oc) for nc, oc in zip(new_cs, cs)]
        else:
            hs, cs = new_hs, new_cs

        # Top-layer hidden state -> lane-dense (H_pad = 128k) output store.
        seq_ref[tt] = h_l.astype(seq_ref.dtype)

    # Commit the carried state once per chunk.
    for l in range(num_layers):
        h_ref[l] = hs[l]
        c_ref[l] = cs[l]


def pack_params(params, input_size, hidden_size, num_layers, i_pad, h_pad,
                compute_dtype):
    """Pack per-gate PyTorch-style weights into padded kernel operands.

    Gate order along the 4*h_pad axis is [i | f | g | o] (transposed math:
    gates = x @ Wx.T + h @ Wh.T + b_i + b_h)."""
    H = hidden_size

    def pack_w(ws, rows, rows_pad):
        cols = [jnp.pad(w.T, ((0, rows_pad - rows), (0, h_pad - H))) for w in ws]
        return jnp.concatenate(cols, axis=1).astype(compute_dtype)

    def pack_b(b_i, b_h):
        row = jnp.concatenate(
            [jnp.pad(bi + bh, (0, h_pad - H)) for bi, bh in zip(b_i, b_h)])
        return row.reshape(1, 4 * h_pad).astype(jnp.float32)

    # TODO(synk): for H not a multiple of 128, pack the 4*H gate axis densely
    # (pad 4H as a whole) and split gates with pltpu.roll / masked selects to
    # cut matmul N, HBM bytes and VMEM by up to 4x at small H.
    p0 = params[0]
    wx0 = pack_w(p0['w_i'], input_size, i_pad)      # (i_pad, 4*h_pad)
    wh0 = pack_w(p0['w_h'], H, h_pad)               # (h_pad, 4*h_pad)
    b0 = pack_b(p0['b_i'], p0['b_h'])               # (1, 4*h_pad) f32

    upper = []
    for l in range(1, num_layers):
        p = params[l]
        upper += [pack_w(p['w_i'], H, h_pad),        # Wx_l
                  pack_w(p['w_h'], H, h_pad),        # Wh_l
                  pack_b(p['b_i'], p['b_h'])]        # (1, 4*h_pad) f32
    return wx0, b0, wh0, upper


def my_lstm_forward(x, params, hidden_size, num_layers, compute_dtype=None,
                    batch_tiles=None, t_chunk_cap=16):
    """x: (batch, seq, input_size). Returns (hidden_seq (B,S,H), (h_t, c_t))."""
    B, S, I = x.shape
    H = hidden_size

    # bf16 MXU operands (f32 accumulation) on TPU; f32 everywhere else so no
    # unsupported bf16 x bf16 -> f32 dot is ever emitted on CPU / interpret.
    if compute_dtype is None:
        compute_dtype = (jnp.bfloat16 if jax.default_backend() == "tpu"
                         else jnp.float32)

    H_pad = _round_up(H, 128)       # lane-align hidden / gate blocks
    I_pad = _round_up(I, 128)       # lane-align the input features (matmul K)
    B_pad = _round_up(B, 8)         # sublane-align batch

    if batch_tiles is None:
        batch_tiles = _default_batch_tiles(B_pad)
    if batch_tiles < 1 or B_pad % (8 * batch_tiles) != 0:
        batch_tiles = 1
    b_tile = B_pad // batch_tiles

    t_chunk = _pick_t_chunk(S, t_chunk_cap)
    n_chunks = -(-S // t_chunk)
    S_pad = n_chunks * t_chunk
    tail_rem = S % t_chunk          # 0 -> no masked tail steps

    wx0, b0, wh0, upper = pack_params(
        params, I, H, num_layers, I_pad, H_pad, compute_dtype)

    # (S_pad, B_pad, I_pad) time-major input in the matmul compute dtype.
    x_p = jnp.pad(jnp.transpose(x, (1, 0, 2)),
                  ((0, S_pad - S), (0, B_pad - B), (0, I_pad - I)))
    x_p = x_p.astype(compute_dtype)

    seq_dtype = compute_dtype       # bf16 writeback on TPU, f32 elsewhere

    in_specs = [
        pl.BlockSpec((t_chunk, b_tile, I_pad), lambda b, t: (t, b, 0)),  # x chunk
        pl.BlockSpec((I_pad, 4 * H_pad), lambda b, t: (0, 0)),           # Wx0
        pl.BlockSpec((1, 4 * H_pad), lambda b, t: (0, 0)),               # b0
        pl.BlockSpec((H_pad, 4 * H_pad), lambda b, t: (0, 0)),           # Wh0
    ]
    for _ in range(1, num_layers):
        in_specs += [
            pl.BlockSpec((H_pad, 4 * H_pad), lambda b, t: (0, 0)),       # Wx_l
            pl.BlockSpec((H_pad, 4 * H_pad), lambda b, t: (0, 0)),       # Wh_l
            pl.BlockSpec((1, 4 * H_pad), lambda b, t: (0, 0)),           # b_l
        ]
    # TODO(synk): single-buffer the grid-invariant weight/bias blocks
    # (pipeline_mode=pl.Buffered(1)) on jax versions that support it; at
    # realistic H this halves the largest resident VMEM consumers (v7x: 64 MiB).

    out_shape = (
        jax.ShapeDtypeStruct((S_pad, B_pad, H_pad), seq_dtype),          # per-step top h
        jax.ShapeDtypeStruct((num_layers, B_pad, H_pad), jnp.float32),   # final h
        jax.ShapeDtypeStruct((num_layers, B_pad, H_pad), jnp.float32),   # final c
    )
    out_specs = [
        pl.BlockSpec((t_chunk, b_tile, H_pad), lambda b, t: (t, b, 0)),
        pl.BlockSpec((num_layers, b_tile, H_pad), lambda b, t: (0, b, 0)),
        pl.BlockSpec((num_layers, b_tile, H_pad), lambda b, t: (0, b, 0)),
    ]

    kernel = functools.partial(
        lstm_kernel, num_layers=num_layers, h_pad=H_pad, t_chunk=t_chunk,
        tail_rem=tail_rem, compute_dtype=compute_dtype)

    vmem_limit = _vmem_limit_bytes(
        t_chunk, b_tile, I_pad, H_pad, num_layers, compute_dtype, seq_dtype)

    seq_sbh, h_t, c_t = pl.pallas_call(
        kernel,
        out_shape=out_shape,
        grid_spec=pltpu.PrefetchScalarGridSpec(
            num_scalar_prefetch=0,
            grid=(batch_tiles, n_chunks),
            in_specs=in_specs,
            out_specs=out_specs,
        ),
        compiler_params=pltpu.CompilerParams(
            # batch tiles are independent recurrences (megacore-parallel on
            # v7x); time is a sequential state-carrying axis.
            dimension_semantics=("parallel", "arbitrary"),
            vmem_limit_bytes=vmem_limit,
        ),
    )(x_p, wx0, b0, wh0, *upper)

    hidden_seq = jnp.transpose(
        seq_sbh[:S, :B, :H].astype(x.dtype), (1, 0, 2))      # (B, S, H)
    return hidden_seq, (h_t[:, :B, :H], c_t[:, :B, :H])


def init_params(key, input_size, hidden_size, num_layers):
    """Deterministic init mimicking reset_weigths(): U(-1/sqrt(H), 1/sqrt(H))."""
    H = hidden_size
    stdv = 1.0 / math.sqrt(H)
    params = []
    for l in range(num_layers):
        in_dim = input_size if l == 0 else H
        key, *ks = jax.random.split(key, 17)
        ks = iter(ks)
        w_i = [jax.random.uniform(next(ks), (H, in_dim), jnp.float32, -stdv, stdv)
               for _ in range(4)]
        w_h = [jax.random.uniform(next(ks), (H, H), jnp.float32, -stdv, stdv)
               for _ in range(4)]
        b_i = [jax.random.uniform(next(ks), (H,), jnp.float32, -stdv, stdv)
               for _ in range(4)]
        b_h = [jax.random.uniform(next(ks), (H,), jnp.float32, -stdv, stdv)
               for _ in range(4)]
        params.append({'w_i': w_i, 'w_h': w_h, 'b_i': b_i, 'b_h': b_h})
    return params


def lstm_reference(x, params, hidden_size, num_layers):
    """Plain-JAX f32 mirror of the PyTorch forward (numerical sanity check)."""
    B, S, I = x.shape
    H = hidden_size
    h = jnp.zeros((num_layers, B, H), jnp.float32)
    c = jnp.zeros((num_layers, B, H), jnp.float32)
    outs = []
    for t in range(S):
        xt = x[:, t, :]
        for l in range(num_layers):
            p = params[l]
            pre = [xt @ p['w_i'][g].T + h[l] @ p['w_h'][g].T + p['b_i'][g] + p['b_h'][g]
                   for g in range(4)]
            i_t = jax.nn.sigmoid(pre[0])
            f_t = jax.nn.sigmoid(pre[1])
            g_t = jnp.tanh(pre[2])
            o_t = jax.nn.sigmoid(pre[3])
            c_new = f_t * c[l] + i_t * g_t
            h_new = o_t * jnp.tanh(c_new)
            h = h.at[l].set(h_new)
            c = c.at[l].set(c_new)
            xt = h_new
        outs.append(xt)
    return jnp.stack(outs, axis=1), (h, c)


if __name__ == "__main__":
    batch, seq, input_size, hidden_size, num_layers = 2, 8, 16, 32, 2

    key = jax.random.PRNGKey(0)
    key, kx, kp = jax.random.split(key, 3)
    x = jax.random.normal(kx, (batch, seq, input_size), jnp.float32)
    params = init_params(kp, input_size, hidden_size, num_layers)

    ref_seq, (ref_h, ref_c) = lstm_reference(x, params, hidden_size, num_layers)

    # Default path: bf16 MXU operands on TPU (f32 accumulate / f32 gate math),
    # plain f32 on non-TPU backends.  TPU default matmul precision is bf16-ish
    # even for f32 operands, hence the tolerances below.
    auto_bf16 = jax.default_backend() == "tpu"
    tol = 5e-2 if auto_bf16 else 2e-2

    hidden_seq, (h_t, c_t) = my_lstm_forward(x, params, hidden_size, num_layers)
    jax.block_until_ready((hidden_seq, h_t, c_t))

    assert hidden_seq.shape == (batch, seq, hidden_size)
    assert h_t.shape == (num_layers, batch, hidden_size)
    assert c_t.shape == (num_layers, batch, hidden_size)
    assert jnp.allclose(hidden_seq, ref_seq, atol=tol)
    assert jnp.allclose(h_t, ref_h, atol=tol)
    assert jnp.allclose(c_t, ref_c, atol=tol)

    # Explicit f32-operand path.
    f32_seq, (f32_h, f32_c) = my_lstm_forward(
        x, params, hidden_size, num_layers, compute_dtype=jnp.float32)
    jax.block_until_ready((f32_seq, f32_h, f32_c))
    assert jnp.allclose(f32_seq, ref_seq, atol=2e-2)
    assert jnp.allclose(f32_h, ref_h, atol=2e-2)
    assert jnp.allclose(f32_c, ref_c, atol=2e-2)

    # Prime sequence length -> exercises the masked-tail chunk path.
    seq2 = 17
    key, kx2 = jax.random.split(key)
    x2 = jax.random.normal(kx2, (batch, seq2, input_size), jnp.float32)
    ref2_seq, (ref2_h, ref2_c) = lstm_reference(x2, params, hidden_size, num_layers)
    out2_seq, (out2_h, out2_c) = my_lstm_forward(x2, params, hidden_size, num_layers)
    jax.block_until_ready((out2_seq, out2_h, out2_c))
    assert out2_seq.shape == (batch, seq2, hidden_size)
    assert jnp.allclose(out2_seq, ref2_seq, atol=tol)
    assert jnp.allclose(out2_h, ref2_h, atol=tol)
    assert jnp.allclose(out2_c, ref2_c, atol=tol)

    print("KERNEL_OK")
</pallas_src>

<mosaic_0001>
module attributes {stable_mosaic.version = 11 : i64} {
  func.func @lstm_kernel(%arg0: i32, %arg1: i32, %arg2: memref<8x8x128xf32, #tpu.memory_space<vmem>>, %arg3: memref<128x512xf32, #tpu.memory_space<vmem>>, %arg4: memref<1x512xf32, #tpu.memory_space<vmem>>, %arg5: memref<128x512xf32, #tpu.memory_space<vmem>>, %arg6: memref<128x512xf32, #tpu.memory_space<vmem>>, %arg7: memref<128x512xf32, #tpu.memory_space<vmem>>, %arg8: memref<1x512xf32, #tpu.memory_space<vmem>>, %arg9: memref<8x8x128xf32, #tpu.memory_space<vmem>>, %arg10: memref<2x8x128xf32, #tpu.memory_space<vmem>>, %arg11: memref<2x8x128xf32, #tpu.memory_space<vmem>>) attributes {dimension_semantics = [#tpu.dimension_semantics<parallel>, #tpu.dimension_semantics<arbitrary>], iteration_bounds = array<i64: 1, 1>, scalar_prefetch = 0 : i64, scratch_operands = 0 : i64, tpu.core_type = #tpu.core_type<tc>, window_params = [{transform_indices = @transform_0, window_bounds = array<i64: 8, 8, 128>}, {pipeline_mode = #tpu.pipeline_mode<synchronous>, transform_indices = @transform_1, window_bounds = array<i64: 128, 512>}, {pipeline_mode = #tpu.pipeline_mode<synchronous>, transform_indices = @transform_2, window_bounds = array<i64: 1, 512>}, {pipeline_mode = #tpu.pipeline_mode<synchronous>, transform_indices = @transform_3, window_bounds = array<i64: 128, 512>}, {pipeline_mode = #tpu.pipeline_mode<synchronous>, transform_indices = @transform_4, window_bounds = array<i64: 128, 512>}, {pipeline_mode = #tpu.pipeline_mode<synchronous>, transform_indices = @transform_5, window_bounds = array<i64: 128, 512>}, {pipeline_mode = #tpu.pipeline_mode<synchronous>, transform_indices = @transform_6, window_bounds = array<i64: 1, 512>}, {transform_indices = @transform_7, window_bounds = array<i64: 8, 8, 128>}, {transform_indices = @transform_8, window_bounds = array<i64: 2, 8, 128>}, {transform_indices = @transform_9, window_bounds = array<i64: 2, 8, 128>}]} {
    %c0_i32 = arith.constant 0 : i32
    %0 = arith.cmpi eq, %arg1, %c0_i32 : i32
    %1 = arith.extui %0 : i1 to i32
    %c0_i32_0 = arith.constant 0 : i32
    %2 = arith.cmpi ne, %1, %c0_i32_0 : i32
    scf.if %2 {
      %cst_128 = arith.constant 0.000000e+00 : f32
      %516 = vector.broadcast %cst_128 : f32 to vector<2x8x128xf32>
      %c0_129 = arith.constant 0 : index
      %c0_130 = arith.constant 0 : index
      %c0_131 = arith.constant 0 : index
      %517 = vector.load %arg10[%c0_129, %c0_130, %c0_131] : memref<2x8x128xf32, #tpu.memory_space<vmem>>, vector<2x8x128xf32>
      tpu.vector_store %arg10[%c0_129, %c0_130, %c0_131], %516 {strides = array<i32>} : memref<2x8x128xf32, #tpu.memory_space<vmem>>, vector<2x8x128xf32>,
      %cst_132 = arith.constant 0.000000e+00 : f32
      %518 = vector.broadcast %cst_132 : f32 to vector<2x8x128xf32>
      %c0_133 = arith.constant 0 : index
      %c0_134 = arith.constant 0 : index
      %c0_135 = arith.constant 0 : index
      %519 = vector.load %arg11[%c0_133, %c0_134, %c0_135] : memref<2x8x128xf32, #tpu.memory_space<vmem>>, vector<2x8x128xf32>
      tpu.vector_store %arg11[%c0_133, %c0_134, %c0_135], %518 {strides = array<i32>} : memref<2x8x128xf32, #tpu.memory_space<vmem>>, vector<2x8x128xf32>,
    } else {
    }
    %c0 = arith.constant 0 : index
    %c0_1 = arith.constant 0 : index
    %c0_2 = arith.constant 0 : index
    %3 = vector.load %arg10[%c0, %c0_1, %c0_2] : memref<2x8x128xf32, #tpu.memory_space<vmem>>, vector<1x8x128xf32>
    %4 = vector.shape_cast %3 : vector<1x8x128xf32> to vector<8x128xf32>
    %c1 = arith.constant 1 : index
    %c0_3 = arith.constant 0 : index
    %c0_4 = arith.constant 0 : index
    %5 = vector.load %arg10[%c1, %c0_3, %c0_4] : memref<2x8x128xf32, #tpu.memory_space<vmem>>, vector<1x8x128xf32>
    %6 = vector.shape_cast %5 : vector<1x8x128xf32> to vector<8x128xf32>
    %c0_5 = arith.constant 0 : index
    %c0_6 = arith.constant 0 : index
    %c0_7 = arith.constant 0 : index
    %7 = vector.load %arg11[%c0_5, %c0_6, %c0_7] : memref<2x8x128xf32, #tpu.memory_space<vmem>>, vector<1x8x128xf32>
    %8 = vector.shape_cast %7 : vector<1x8x128xf32> to vector<8x128xf32>
    %c1_8 = arith.constant 1 : index
    %c0_9 = arith.constant 0 : index
    %c0_10 = arith.constant 0 : index
    %9 = vector.load %arg11[%c1_8, %c0_9, %c0_10] : memref<2x8x128xf32, #tpu.memory_space<vmem>>, vector<1x8x128xf32>
    %10 = vector.shape_cast %9 : vector<1x8x128xf32> to vector<8x128xf32>
    %c0_11 = arith.constant 0 : index
    %c0_12 = arith.constant 0 : index
    %c0_13 = arith.constant 0 : index
    %11 = vector.load %arg2[%c0_11, %c0_12, %c0_13] : memref<8x8x128xf32, #tpu.memory_space<vmem>>, vector<8x8x128xf32>
    %12 = vector.shape_cast %11 : vector<8x8x128xf32> to vector<64x128xf32>
    %c0_14 = arith.constant 0 : index
    %c0_15 = arith.constant 0 : index
    %13 = vector.load %arg3[%c0_14, %c0_15] : memref<128x512xf32, #tpu.memory_space<vmem>>, vector<128x512xf32>
    %cst = arith.constant dense<0.000000e+00> : vector<64x512xf32>
    %14 = tpu.matmul %12, %13, %cst {dimension_numbers = #tpu.dot_dimension_numbers<[1], [0], [0], [1], [0, 0, 1, 1], [], []>} : vector<64x128xf32>, vector<128x512xf32>, vector<64x512xf32> -> vector<64x512xf32>
    %c0_16 = arith.constant 0 : index
    %c0_17 = arith.constant 0 : index
    %15 = vector.load %arg4[%c0_16, %c0_17] : memref<1x512xf32, #tpu.memory_space<vmem>>, vector<1x512xf32>
    %16 = vector.broadcast %15 : vector<1x512xf32> to vector<64x512xf32>
    %17 = arith.addf %14, %16 : vector<64x512xf32>
    %c0_18 = arith.constant 0 : index
    %c0_19 = arith.constant 0 : index
    %18 = vector.load %arg5[%c0_18, %c0_19] : memref<128x512xf32, #tpu.memory_space<vmem>>, vector<128x512xf32>
    %c0_20 = arith.constant 0 : index
    %c0_21 = arith.constant 0 : index
    %19 = vector.load %arg6[%c0_20, %c0_21] : memref<128x512xf32, #tpu.memory_space<vmem>>, vector<128x512xf32>
    %c0_22 = arith.constant 0 : index
    %c0_23 = arith.constant 0 : index
    %20 = vector.load %arg7[%c0_22, %c0_23] : memref<128x512xf32, #tpu.memory_space<vmem>>, vector<128x512xf32>
    %c0_24 = arith.constant 0 : index
    %c0_25 = arith.constant 0 : index
    %21 = vector.load %arg8[%c0_24, %c0_25] : memref<1x512xf32, #tpu.memory_space<vmem>>, vector<1x512xf32>
    %22 = vector.shape_cast %21 : vector<1x512xf32> to vector<1x512xf32>
    %23 = vector.broadcast %22 : vector<1x512xf32> to vector<8x512xf32>
    %24 = vector.extract_strided_slice %17 {offsets = [0, 0], sizes = [8, 512], strides = [1, 1]} : vector<64x512xf32> to vector<8x512xf32>
    %cst_26 = arith.constant dense<0.000000e+00> : vector<8x512xf32>
    %25 = tpu.matmul %4, %18, %cst_26 {dimension_numbers = #tpu.dot_dimension_numbers<[1], [0], [0], [1], [0, 0, 1, 1], [], []>} : vector<8x128xf32>, vector<128x512xf32>, vector<8x512xf32> -> vector<8x512xf32>
    %26 = arith.addf %24, %25 : vector<8x512xf32>
    %27 = vector.extract_strided_slice %26 {offsets = [0, 0], sizes = [8, 128], strides = [1, 1]} : vector<8x512xf32> to vector<8x128xf32>
    %28 = arith.negf %27 : vector<8x128xf32>
    %29 = math.exp %28 : vector<8x128xf32>
    %cst_27 = arith.constant 1.000000e+00 : f32
    %30 = vector.broadcast %cst_27 : f32 to vector<8x128xf32>
    %31 = arith.addf %30, %29 : vector<8x128xf32>
    %32 = arith.divf %30, %31 : vector<8x128xf32>
    %33 = vector.extract_strided_slice %26 {offsets = [0, 128], sizes = [8, 128], strides = [1, 1]} : vector<8x512xf32> to vector<8x128xf32>
    %34 = arith.negf %33 : vector<8x128xf32>
    %35 = math.exp %34 : vector<8x128xf32>
    %cst_28 = arith.constant 1.000000e+00 : f32
    %36 = vector.broadcast %cst_28 : f32 to vector<8x128xf32>
    %37 = arith.addf %36, %35 : vector<8x128xf32>
    %38 = arith.divf %36, %37 : vector<8x128xf32>
    %39 = vector.extract_strided_slice %26 {offsets = [0, 256], sizes = [8, 128], strides = [1, 1]} : vector<8x512xf32> to vector<8x128xf32>
    %40 = math.tanh %39 : vector<8x128xf32>
    %41 = vector.extract_strided_slice %26 {offsets = [0, 384], sizes = [8, 128], strides = [1, 1]} : vector<8x512xf32> to vector<8x128xf32>
    %42 = arith.negf %41 : vector<8x128xf32>
    %43 = math.exp %42 : vector<8x128xf32>
    %cst_29 = arith.constant 1.000000e+00 : f32
    %44 = vector.broadcast %cst_29 : f32 to vector<8x128xf32>
    %45 = arith.addf %44, %43 : vector<8x128xf32>
    %46 = arith.divf %44, %45 : vector<8x128xf32>
    %47 = arith.mulf %38, %8 : vector<8x128xf32>
    %48 = arith.mulf %32, %40 : vector<8x128xf32>
    %49 = arith.addf %47, %48 : vector<8x128xf32>
    %50 = math.tanh %49 : vector<8x128xf32>
    %51 = arith.mulf %46, %50 : vector<8x128xf32>
    %cst_30 = arith.constant dense<0.000000e+00> : vector<8x512xf32>
    %52 = tpu.matmul %51, %19, %cst_30 {dimension_numbers = #tpu.dot_dimension_numbers<[1], [0], [0], [1], [0, 0, 1, 1], [], []>} : vector<8x128xf32>, vector<128x512xf32>, vector<8x512xf32> -> vector<8x512xf32>
    %cst_31 = arith.constant dense<0.000000e+00> : vector<8x512xf32>
    %53 = tpu.matmul %6, %20, %cst_31 {dimension_numbers = #tpu.dot_dimension_numbers<[1], [0], [0], [1], [0, 0, 1, 1], [], []>} : vector<8x128xf32>, vector<128x512xf32>, vector<8x512xf32> -> vector<8x512xf32>
    %54 = arith.addf %52, %53 : vector<8x512xf32>
    %55 = arith.addf %54, %23 : vector<8x512xf32>
    %56 = vector.extract_strided_slice %55 {offsets = [0, 0], sizes = [8, 128], strides = [1, 1]} : vector<8x512xf32> to vector<8x128xf32>
    %57 = arith.negf %56 : vector<8x128xf32>
    %58 = math.exp %57 : vector<8x128xf32>
    %cst_32 = arith.constant 1.000000e+00 : f32
    %59 = vector.broadcast %cst_32 : f32 to vector<8x128xf32>
    %60 = arith.addf %59, %58 : vector<8x128xf32>
    %61 = arith.divf %59, %60 : vector<8x128xf32>
    %62 = vector.extract_strided_slice %55 {offsets = [0, 128], sizes = [8, 128], strides = [1, 1]} : vector<8x512xf32> to vector<8x128xf32>
    %63 = arith.negf %62 : vector<8x128xf32>
    %64 = math.exp %63 : vector<8x128xf32>
    %cst_33 = arith.constant 1.000000e+00 : f32
    %65 = vector.broadcast %cst_33 : f32 to vector<8x128xf32>
    %66 = arith.addf %65, %64 : vector<8x128xf32>
    %67 = arith.divf %65, %66 : vector<8x128xf32>
    %68 = vector.extract_strided_slice %55 {offsets = [0, 256], sizes = [8, 128], strides = [1, 1]} : vector<8x512xf32> to vector<8x128xf32>
    %69 = math.tanh %68 : vector<8x128xf32>
    %70 = vector.extract_strided_slice %55 {offsets = [0, 384], sizes = [8, 128], strides = [1, 1]} : vector<8x512xf32> to vector<8x128xf32>
    %71 = arith.negf %70 : vector<8x128xf32>
    %72 = math.exp %71 : vector<8x128xf32>
    %cst_34 = arith.constant 1.000000e+00 : f32
    %73 = vector.broadcast %cst_34 : f32 to vector<8x128xf32>
    %74 = arith.addf %73, %72 : vector<8x128xf32>
    %75 = arith.divf %73, %74 : vector<8x128xf32>
    %76 = arith.mulf %67, %10 : vector<8x128xf32>
    %77 = arith.mulf %61, %69 : vector<8x128xf32>
    %78 = arith.addf %76, %77 : vector<8x128xf32>
    %79 = math.tanh %78 : vector<8x128xf32>
    %80 = arith.mulf %75, %79 : vector<8x128xf32>
    %c0_35 = arith.constant 0 : index
    %c0_36 = arith.constant 0 : index
    %c0_37 = arith.constant 0 : index
    %81 = vector.load %arg9[%c0_35, %c0_36, %c0_37] : memref<8x8x128xf32, #tpu.memory_space<vmem>>, vector<1x8x128xf32>
    %82 = vector.shape_cast %81 : vector<1x8x128xf32> to vector<8x128xf32>
    %83 = vector.shape_cast %80 : vector<8x128xf32> to vector<1x8x128xf32>
    tpu.vector_store %arg9[%c0_35, %c0_36, %c0_37], %83 {strides = array<i32>} : memref<8x8x128xf32, #tpu.memory_space<vmem>>, vector<1x8x128xf32>,
    %84 = vector.extract_strided_slice %17 {offsets = [8, 0], sizes = [8, 512], strides = [1, 1]} : vector<64x512xf32> to vector<8x512xf32>
    %cst_38 = arith.constant dense<0.000000e+00> : vector<8x512xf32>
    %85 = tpu.matmul %51, %18, %cst_38 {dimension_numbers = #tpu.dot_dimension_numbers<[1], [0], [0], [1], [0, 0, 1, 1], [], []>} : vector<8x128xf32>, vector<128x512xf32>, vector<8x512xf32> -> vector<8x512xf32>
    %86 = arith.addf %84, %85 : vector<8x512xf32>
    %87 = vector.extract_strided_slice %86 {offsets = [0, 0], sizes = [8, 128], strides = [1, 1]} : vector<8x512xf32> to vector<8x128xf32>
    %88 = arith.negf %87 : vector<8x128xf32>
    %89 = math.exp %88 : vector<8x128xf32>
    %cst_39 = arith.constant 1.000000e+00 : f32
    %90 = vector.broadcast %cst_39 : f32 to vector<8x128xf32>
    %91 = arith.addf %90, %89 : vector<8x128xf32>
    %92 = arith.divf %90, %91 : vector<8x128xf32>
    %93 = vector.extract_strided_slice %86 {offsets = [0, 128], sizes = [8, 128], strides = [1, 1]} : vector<8x512xf32> to vector<8x128xf32>
    %94 = arith.negf %93 : vector<8x128xf32>
    %95 = math.exp %94 : vector<8x128xf32>
    %cst_40 = arith.constant 1.000000e+00 : f32
    %96 = vector.broadcast %cst_40 : f32 to vector<8x128xf32>
    %97 = arith.addf %96, %95 : vector<8x128xf32>
    %98 = arith.divf %96, %97 : vector<8x128xf32>
    %99 = vector.extract_strided_slice %86 {offsets = [0, 256], sizes = [8, 128], strides = [1, 1]} : vector<8x512xf32> to vector<8x128xf32>
    %100 = math.tanh %99 : vector<8x128xf32>
    %101 = vector.extract_strided_slice %86 {offsets = [0, 384], sizes = [8, 128], strides = [1, 1]} : vector<8x512xf32> to vector<8x128xf32>
    %102 = arith.negf %101 : vector<8x128xf32>
    %103 = math.exp %102 : vector<8x128xf32>
    %cst_41 = arith.constant 1.000000e+00 : f32
    %104 = vector.broadcast %cst_41 : f32 to vector<8x128xf32>
    %105 = arith.addf %104, %103 : vector<8x128xf32>
    %106 = arith.divf %104, %105 : vector<8x128xf32>
    %107 = arith.mulf %98, %49 : vector<8x128xf32>
    %108 = arith.mulf %92, %100 : vector<8x128xf32>
    %109 = arith.addf %107, %108 : vector<8x128xf32>
    %110 = math.tanh %109 : vector<8x128xf32>
    %111 = arith.mulf %106, %110 : vector<8x128xf32>
    %cst_42 = arith.constant dense<0.000000e+00> : vector<8x512xf32>
    %112 = tpu.matmul %111, %19, %cst_42 {dimension_numbers = #tpu.dot_dimension_numbers<[1], [0], [0], [1], [0, 0, 1, 1], [], []>} : vector<8x128xf32>, vector<128x512xf32>, vector<8x512xf32> -> vector<8x512xf32>
    %cst_43 = arith.constant dense<0.000000e+00> : vector<8x512xf32>
    %113 = tpu.matmul %80, %20, %cst_43 {dimension_numbers = #tpu.dot_dimension_numbers<[1], [0], [0], [1], [0, 0, 1, 1], [], []>} : vector<8x128xf32>, vector<128x512xf32>, vector<8x512xf32> -> vector<8x512xf32>
    %114 = arith.addf %112, %113 : vector<8x512xf32>
    %115 = arith.addf %114, %23 : vector<8x512xf32>
    %116 = vector.extract_strided_slice %115 {offsets = [0, 0], sizes = [8, 128], strides = [1, 1]} : vector<8x512xf32> to vector<8x128xf32>
    %117 = arith.negf %116 : vector<8x128xf32>
    %118 = math.exp %117 : vector<8x128xf32>
    %cst_44 = arith.constant 1.000000e+00 : f32
    %119 = vector.broadcast %cst_44 : f32 to vector<8x128xf32>
    %120 = arith.addf %119, %118 : vector<8x128xf32>
    %121 = arith.divf %119, %120 : vector<8x128xf32>
    %122 = vector.extract_strided_slice %115 {offsets = [0, 128], sizes = [8, 128], strides = [1, 1]} : vector<8x512xf32> to vector<8x128xf32>
    %123 = arith.negf %122 : vector<8x128xf32>
    %124 = math.exp %123 : vector<8x128xf32>
    %cst_45 = arith.constant 1.000000e+00 : f32
    %125 = vector.broadcast %cst_45 : f32 to vector<8x128xf32>
    %126 = arith.addf %125, %124 : vector<8x128xf32>
    %127 = arith.divf %125, %126 : vector<8x128xf32>
    %128 = vector.extract_strided_slice %115 {offsets = [0, 256], sizes = [8, 128], strides = [1, 1]} : vector<8x512xf32> to vector<8x128xf32>
    %129 = math.tanh %128 : vector<8x128xf32>
    %130 = vector.extract_strided_slice %115 {offsets = [0, 384], sizes = [8, 128], strides = [1, 1]} : vector<8x512xf32> to vector<8x128xf32>
    %131 = arith.negf %130 : vector<8x128xf32>
    %132 = math.exp %131 : vector<8x128xf32>
    %cst_46 = arith.constant 1.000000e+00 : f32
    %133 = vector.broadcast %cst_46 : f32 to vector<8x128xf32>
    %134 = arith.addf %133, %132 : vector<8x128xf32>
    %135 = arith.divf %133, %134 : vector<8x128xf32>
    %136 = arith.mulf %127, %78 : vector<8x128xf32>
    %137 = arith.mulf %121, %129 : vector<8x128xf32>
    %138 = arith.addf %136, %137 : vector<8x128xf32>
    %139 = math.tanh %138 : vector<8x128xf32>
    %140 = arith.mulf %135, %139 : vector<8x128xf32>
    %c1_47 = arith.constant 1 : index
    %c0_48 = arith.constant 0 : index
    %c0_49 = arith.constant 0 : index
    %141 = vector.load %arg9[%c1_47, %c0_48, %c0_49] : memref<8x8x128xf32, #tpu.memory_space<vmem>>, vector<1x8x128xf32>
    %142 = vector.shape_cast %141 : vector<1x8x128xf32> to vector<8x128xf32>
    %143 = vector.shape_cast %140 : vector<8x128xf32> to vector<1x8x128xf32>
    tpu.vector_store %arg9[%c1_47, %c0_48, %c0_49], %143 {strides = array<i32>} : memref<8x8x128xf32, #tpu.memory_space<vmem>>, vector<1x8x128xf32>,
    %144 = vector.extract_strided_slice %17 {offsets = [16, 0], sizes = [8, 512], strides = [1, 1]} : vector<64x512xf32> to vector<8x512xf32>
    %cst_50 = arith.constant dense<0.000000e+00> : vector<8x512xf32>
    %145 = tpu.matmul %111, %18, %cst_50 {dimension_numbers = #tpu.dot_dimension_numbers<[1], [0], [0], [1], [0, 0, 1, 1], [], []>} : vector<8x128xf32>, vector<128x512xf32>, vector<8x512xf32> -> vector<8x512xf32>
    %146 = arith.addf %144, %145 : vector<8x512xf32>
    %147 = vector.extract_strided_slice %146 {offsets = [0, 0], sizes = [8, 128], strides = [1, 1]} : vector<8x512xf32> to vector<8x128xf32>
    %148 = arith.negf %147 : vector<8x128xf32>
    %149 = math.exp %148 : vector<8x128xf32>
    %cst_51 = arith.constant 1.000000e+00 : f32
    %150 = vector.broadcast %cst_51 : f32 to vector<8x128xf32>
    %151 = arith.addf %150, %149 : vector<8x128xf32>
    %152 = arith.divf %150, %151 : vector<8x128xf32>
    %153 = vector.extract_strided_slice %146 {offsets = [0, 128], sizes = [8, 128], strides = [1, 1]} : vector<8x512xf32> to vector<8x128xf32>
    %154 = arith.negf %153 : vector<8x128xf32>
    %155 = math.exp %154 : vector<8x128xf32>
    %cst_52 = arith.constant 1.000000e+00 : f32
    %156 = vector.broadcast %cst_52 : f32 to vector<8x128xf32>
    %157 = arith.addf %156, %155 : vector<8x128xf32>
    %158 = arith.divf %156, %157 : vector<8x128xf32>
    %159 = vector.extract_strided_slice %146 {offsets = [0, 256], sizes = [8, 128], strides = [1, 1]} : vector<8x512xf32> to vector<8x128xf32>
    %160 = math.tanh %159 : vector<8x128xf32>
    %161 = vector.extract_strided_slice %146 {offsets = [0, 384], sizes = [8, 128], strides = [1, 1]} : vector<8x512xf32> to vector<8x128xf32>
    %162 = arith.negf %161 : vector<8x128xf32>
    %163 = math.exp %162 : vector<8x128xf32>
    %cst_53 = arith.constant 1.000000e+00 : f32
    %164 = vector.broadcast %cst_53 : f32 to vector<8x128xf32>
    %165 = arith.addf %164, %163 : vector<8x128xf32>
    %166 = arith.divf %164, %165 : vector<8x128xf32>
    %167 = arith.mulf %158, %109 : vector<8x128xf32>
    %168 = arith.mulf %152, %160 : vector<8x128xf32>
    %169 = arith.addf %167, %168 : vector<8x128xf32>
    %170 = math.tanh %169 : vector<8x128xf32>
    %171 = arith.mulf %166, %170 : vector<8x128xf32>
    %cst_54 = arith.constant dense<0.000000e+00> : vector<8x512xf32>
    %172 = tpu.matmul %171, %19, %cst_54 {dimension_numbers = #tpu.dot_dimension_numbers<[1], [0], [0], [1], [0, 0, 1, 1], [], []>} : vector<8x128xf32>, vector<128x512xf32>, vector<8x512xf32> -> vector<8x512xf32>
    %cst_55 = arith.constant dense<0.000000e+00> : vector<8x512xf32>
    %173 = tpu.matmul %140, %20, %cst_55 {dimension_numbers = #tpu.dot_dimension_numbers<[1], [0], [0], [1], [0, 0, 1, 1], [], []>} : vector<8x128xf32>, vector<128x512xf32>, vector<8x512xf32> -> vector<8x512xf32>
    %174 = arith.addf %172, %173 : vector<8x512xf32>
    %175 = arith.addf %174, %23 : vector<8x512xf32>
    %176 = vector.extract_strided_slice %175 {offsets = [0, 0], sizes = [8, 128], strides = [1, 1]} : vector<8x512xf32> to vector<8x128xf32>
    %177 = arith.negf %176 : vector<8x128xf32>
    %178 = math.exp %177 : vector<8x128xf32>
    %cst_56 = arith.constant 1.000000e+00 : f32
    %179 = vector.broadcast %cst_56 : f32 to vector<8x128xf32>
    %180 = arith.addf %179, %178 : vector<8x128xf32>
    %181 = arith.divf %179, %180 : vector<8x128xf32>
    %182 = vector.extract_strided_slice %175 {offsets = [0, 128], sizes = [8, 128], strides = [1, 1]} : vector<8x512xf32> to vector<8x128xf32>
    %183 = arith.negf %182 : vector<8x128xf32>
    %184 = math.exp %183 : vector<8x128xf32>
    %cst_57 = arith.constant 1.000000e+00 : f32
    %185 = vector.broadcast %cst_57 : f32 to vector<8x128xf32>
    %186 = arith.addf %185, %184 : vector<8x128xf32>
    %187 = arith.divf %185, %186 : vector<8x128xf32>
    %188 = vector.extract_strided_slice %175 {offsets = [0, 256], sizes = [8, 128], strides = [1, 1]} : vector<8x512xf32> to vector<8x128xf32>
    %189 = math.tanh %188 : vector<8x128xf32>
    %190 = vector.extract_strided_slice %175 {offsets = [0, 384], sizes = [8, 128], strides = [1, 1]} : vector<8x512xf32> to vector<8x128xf32>
    %191 = arith.negf %190 : vector<8x128xf32>
    %192 = math.exp %191 : vector<8x128xf32>
    %cst_58 = arith.constant 1.000000e+00 : f32
    %193 = vector.broadcast %cst_58 : f32 to vector<8x128xf32>
    %194 = arith.addf %193, %192 : vector<8x128xf32>
    %195 = arith.divf %193, %194 : vector<8x128xf32>
    %196 = arith.mulf %187, %138 : vector<8x128xf32>
    %197 = arith.mulf %181, %189 : vector<8x128xf32>
    %198 = arith.addf %196, %197 : vector<8x128xf32>
    %199 = math.tanh %198 : vector<8x128xf32>
    %200 = arith.mulf %195, %199 : vector<8x128xf32>
    %c2 = arith.constant 2 : index
    %c0_59 = arith.constant 0 : index
    %c0_60 = arith.constant 0 : index
    %201 = vector.load %arg9[%c2, %c0_59, %c0_60] : memref<8x8x128xf32, #tpu.memory_space<vmem>>, vector<1x8x128xf32>
    %202 = vector.shape_cast %201 : vector<1x8x128xf32> to vector<8x128xf32>
    %203 = vector.shape_cast %200 : vector<8x128xf32> to vector<1x8x128xf32>
    tpu.vector_store %arg9[%c2, %c0_59, %c0_60], %203 {strides = array<i32>} : memref<8x8x128xf32, #tpu.memory_space<vmem>>, vector<1x8x128xf32>,
    %204 = vector.extract_strided_slice %17 {offsets = [24, 0], sizes = [8, 512], strides = [1, 1]} : vector<64x512xf32> to vector<8x512xf32>
    %cst_61 = arith.constant dense<0.000000e+00> : vector<8x512xf32>
    %205 = tpu.matmul %171, %18, %cst_61 {dimension_numbers = #tpu.dot_dimension_numbers<[1], [0], [0], [1], [0, 0, 1, 1], [], []>} : vector<8x128xf32>, vector<128x512xf32>, vector<8x512xf32> -> vector<8x512xf32>
    %206 = arith.addf %204, %205 : vector<8x512xf32>
    %207 = vector.extract_strided_slice %206 {offsets = [0, 0], sizes = [8, 128], strides = [1, 1]} : vector<8x512xf32> to vector<8x128xf32>
    %208 = arith.negf %207 : vector<8x128xf32>
    %209 = math.exp %208 : vector<8x128xf32>
    %cst_62 = arith.constant 1.000000e+00 : f32
    %210 = vector.broadcast %cst_62 : f32 to vector<8x128xf32>
    %211 = arith.addf %210, %209 : vector<8x128xf32>
    %212 = arith.divf %210, %211 : vector<8x128xf32>
    %213 = vector.extract_strided_slice %206 {offsets = [0, 128], sizes = [8, 128], strides = [1, 1]} : vector<8x512xf32> to vector<8x128xf32>
    %214 = arith.negf %213 : vector<8x128xf32>
    %215 = math.exp %214 : vector<8x128xf32>
    %cst_63 = arith.constant 1.000000e+00 : f32
    %216 = vector.broadcast %cst_63 : f32 to vector<8x128xf32>
    %217 = arith.addf %216, %215 : vector<8x128xf32>
    %218 = arith.divf %216, %217 : vector<8x128xf32>
    %219 = vector.extract_strided_slice %206 {offsets = [0, 256], sizes = [8, 128], strides = [1, 1]} : vector<8x512xf32> to vector<8x128xf32>
    %220 = math.tanh %219 : vector<8x128xf32>
    %221 = vector.extract_strided_slice %206 {offsets = [0, 384], sizes = [8, 128], strides = [1, 1]} : vector<8x512xf32> to vector<8x128xf32>
    %222 = arith.negf %221 : vector<8x128xf32>
    %223 = math.exp %222 : vector<8x128xf32>
    %cst_64 = arith.constant 1.000000e+00 : f32
    %224 = vector.broadcast %cst_64 : f32 to vector<8x128xf32>
    %225 = arith.addf %224, %223 : vector<8x128xf32>
    %226 = arith.divf %224, %225 : vector<8x128xf32>
    %227 = arith.mulf %218, %169 : vector<8x128xf32>
    %228 = arith.mulf %212, %220 : vector<8x128xf32>
    %229 = arith.addf %227, %228 : vector<8x128xf32>
    %230 = math.tanh %229 : vector<8x128xf32>
    %231 = arith.mulf %226, %230 : vector<8x128xf32>
    %cst_65 = arith.constant dense<0.000000e+00> : vector<8x512xf32>
    %232 = tpu.matmul %231, %19, %cst_65 {dimension_numbers = #tpu.dot_dimension_numbers<[1], [0], [0], [1], [0, 0, 1, 1], [], []>} : vector<8x128xf32>, vector<128x512xf32>, vector<8x512xf32> -> vector<8x512xf32>
    %cst_66 = arith.constant dense<0.000000e+00> : vector<8x512xf32>
    %233 = tpu.matmul %200, %20, %cst_66 {dimension_numbers = #tpu.dot_dimension_numbers<[1], [0], [0], [1], [0, 0, 1, 1], [], []>} : vector<8x128xf32>, vector<128x512xf32>, vector<8x512xf32> -> vector<8x512xf32>
    %234 = arith.addf %232, %233 : vector<8x512xf32>
    %235 = arith.addf %234, %23 : vector<8x512xf32>
    %236 = vector.extract_strided_slice %235 {offsets = [0, 0], sizes = [8, 128], strides = [1, 1]} : vector<8x512xf32> to vector<8x128xf32>
    %237 = arith.negf %236 : vector<8x128xf32>
    %238 = math.exp %237 : vector<8x128xf32>
    %cst_67 = arith.constant 1.000000e+00 : f32
    %239 = vector.broadcast %cst_67 : f32 to vector<8x128xf32>
    %240 = arith.addf %239, %238 : vector<8x128xf32>
    %241 = arith.divf %239, %240 : vector<8x128xf32>
    %242 = vector.extract_strided_slice %235 {offsets = [0, 128], sizes = [8, 128], strides = [1, 1]} : vector<8x512xf32> to vector<8x128xf32>
    %243 = arith.negf %242 : vector<8x128xf32>
    %244 = math.exp %243 : vector<8x128xf32>
    %cst_68 = arith.constant 1.000000e+00 : f32
    %245 = vector.broadcast %cst_68 : f32 to vector<8x128xf32>
    %246 = arith.addf %245, %244 : vector<8x128xf32>
    %247 = arith.divf %245, %246 : vector<8x128xf32>
    %248 = vector.extract_strided_slice %235 {offsets = [0, 256], sizes = [8, 128], strides = [1, 1]} : vector<8x512xf32> to vector<8x128xf32>
    %249 = math.tanh %248 : vector<8x128xf32>
    %250 = vector.extract_strided_slice %235 {offsets = [0, 384], sizes = [8, 128], strides = [1, 1]} : vector<8x512xf32> to vector<8x128xf32>
    %251 = arith.negf %250 : vector<8x128xf32>
    %252 = math.exp %251 : vector<8x128xf32>
    %cst_69 = arith.constant 1.000000e+00 : f32
    %253 = vector.broadcast %cst_69 : f32 to vector<8x128xf32>
    %254 = arith.addf %253, %252 : vector<8x128xf32>
    %255 = arith.divf %253, %254 : vector<8x128xf32>
    %256 = arith.mulf %247, %198 : vector<8x128xf32>
    %257 = arith.mulf %241, %249 : vector<8x128xf32>
    %258 = arith.addf %256, %257 : vector<8x128xf32>
    %259 = math.tanh %258 : vector<8x128xf32>
    %260 = arith.mulf %255, %259 : vector<8x128xf32>
    %c3 = arith.constant 3 : index
    %c0_70 = arith.constant 0 : index
    %c0_71 = arith.constant 0 : index
    %261 = vector.load %arg9[%c3, %c0_70, %c0_71] : memref<8x8x128xf32, #tpu.memory_space<vmem>>, vector<1x8x128xf32>
    %262 = vector.shape_cast %261 : vector<1x8x128xf32> to vector<8x128xf32>
    %263 = vector.shape_cast %260 : vector<8x128xf32> to vector<1x8x128xf32>
    tpu.vector_store %arg9[%c3, %c0_70, %c0_71], %263 {strides = array<i32>} : memref<8x8x128xf32, #tpu.memory_space<vmem>>, vector<1x8x128xf32>,
    %264 = vector.extract_strided_slice %17 {offsets = [32, 0], sizes = [8, 512], strides = [1, 1]} : vector<64x512xf32> to vector<8x512xf32>
    %cst_72 = arith.constant dense<0.000000e+00> : vector<8x512xf32>
    %265 = tpu.matmul %231, %18, %cst_72 {dimension_numbers = #tpu.dot_dimension_numbers<[1], [0], [0], [1], [0, 0, 1, 1], [], []>} : vector<8x128xf32>, vector<128x512xf32>, vector<8x512xf32> -> vector<8x512xf32>
    %266 = arith.addf %264, %265 : vector<8x512xf32>
    %267 = vector.extract_strided_slice %266 {offsets = [0, 0], sizes = [8, 128], strides = [1, 1]} : vector<8x512xf32> to vector<8x128xf32>
    %268 = arith.negf %267 : vector<8x128xf32>
    %269 = math.exp %268 : vector<8x128xf32>
    %cst_73 = arith.constant 1.000000e+00 : f32
    %270 = vector.broadcast %cst_73 : f32 to vector<8x128xf32>
    %271 = arith.addf %270, %269 : vector<8x128xf32>
    %272 = arith.divf %270, %271 : vector<8x128xf32>
    %273 = vector.extract_strided_slice %266 {offsets = [0, 128], sizes = [8, 128], strides = [1, 1]} : vector<8x512xf32> to vector<8x128xf32>
    %274 = arith.negf %273 : vector<8x128xf32>
    %275 = math.exp %274 : vector<8x128xf32>
    %cst_74 = arith.constant 1.000000e+00 : f32
    %276 = vector.broadcast %cst_74 : f32 to vector<8x128xf32>
    %277 = arith.addf %276, %275 : vector<8x128xf32>
    %278 = arith.divf %276, %277 : vector<8x128xf32>
    %279 = vector.extract_strided_slice %266 {offsets = [0, 256], sizes = [8, 128], strides = [1, 1]} : vector<8x512xf32> to vector<8x128xf32>
    %280 = math.tanh %279 : vector<8x128xf32>
    %281 = vector.extract_strided_slice %266 {offsets = [0, 384], sizes = [8, 128], strides = [1, 1]} : vector<8x512xf32> to vector<8x128xf32>
    %282 = arith.negf %281 : vector<8x128xf32>
    %283 = math.exp %282 : vector<8x128xf32>
    %cst_75 = arith.constant 1.000000e+00 : f32
    %284 = vector.broadcast %cst_75 : f32 to vector<8x128xf32>
    %285 = arith.addf %284, %283 : vector<8x128xf32>
    %286 = arith.divf %284, %285 : vector<8x128xf32>
    %287 = arith.mulf %278, %229 : vector<8x128xf32>
    %288 = arith.mulf %272, %280 : vector<8x128xf32>
    %289 = arith.addf %287, %288 : vector<8x128xf32>
    %290 = math.tanh %289 : vector<8x128xf32>
    %291 = arith.mulf %286, %290 : vector<8x128xf32>
    %cst_76 = arith.constant dense<0.000000e+00> : vector<8x512xf32>
    %292 = tpu.matmul %291, %19, %cst_76 {dimension_numbers = #tpu.dot_dimension_numbers<[1], [0], [0], [1], [0, 0, 1, 1], [], []>} : vector<8x128xf32>, vector<128x512xf32>, vector<8x512xf32> -> vector<8x512xf32>
    %cst_77 = arith.constant dense<0.000000e+00> : vector<8x512xf32>
    %293 = tpu.matmul %260, %20, %cst_77 {dimension_numbers = #tpu.dot_dimension_numbers<[1], [0], [0], [1], [0, 0, 1, 1], [], []>} : vector<8x128xf32>, vector<128x512xf32>, vector<8x512xf32> -> vector<8x512xf32>
    %294 = arith.addf %292, %293 : vector<8x512xf32>
    %295 = arith.addf %294, %23 : vector<8x512xf32>
    %296 = vector.extract_strided_slice %295 {offsets = [0, 0], sizes = [8, 128], strides = [1, 1]} : vector<8x512xf32> to vector<8x128xf32>
    %297 = arith.negf %296 : vector<8x128xf32>
    %298 = math.exp %297 : vector<8x128xf32>
    %cst_78 = arith.constant 1.000000e+00 : f32
    %299 = vector.broadcast %cst_78 : f32 to vector<8x128xf32>
    %300 = arith.addf %299, %298 : vector<8x128xf32>
    %301 = arith.divf %299, %300 : vector<8x128xf32>
    %302 = vector.extract_strided_slice %295 {offsets = [0, 128], sizes = [8, 128], strides = [1, 1]} : vector<8x512xf32> to vector<8x128xf32>
    %303 = arith.negf %302 : vector<8x128xf32>
    %304 = math.exp %303 : vector<8x128xf32>
    %cst_79 = arith.constant 1.000000e+00 : f32
    %305 = vector.broadcast %cst_79 : f32 to vector<8x128xf32>
    %306 = arith.addf %305, %304 : vector<8x128xf32>
    %307 = arith.divf %305, %306 : vector<8x128xf32>
    %308 = vector.extract_strided_slice %295 {offsets = [0, 256], sizes = [8, 128], strides = [1, 1]} : vector<8x512xf32> to vector<8x128xf32>
    %309 = math.tanh %308 : vector<8x128xf32>
    %310 = vector.extract_strided_slice %295 {offsets = [0, 384], sizes = [8, 128], strides = [1, 1]} : vector<8x512xf32> to vector<8x128xf32>
    %311 = arith.negf %310 : vector<8x128xf32>
    %312 = math.exp %311 : vector<8x128xf32>
    %cst_80 = arith.constant 1.000000e+00 : f32
    %313 = vector.broadcast %cst_80 : f32 to vector<8x128xf32>
    %314 = arith.addf %313, %312 : vector<8x128xf32>
    %315 = arith.divf %313, %314 : vector<8x128xf32>
    %316 = arith.mulf %307, %258 : vector<8x128xf32>
    %317 = arith.mulf %301, %309 : vector<8x128xf32>
    %318 = arith.addf %316, %317 : vector<8x128xf32>
    %319 = math.tanh %318 : vector<8x128xf32>
    %320 = arith.mulf %315, %319 : vector<8x128xf32>
    %c4 = arith.constant 4 : index
    %c0_81 = arith.constant 0 : index
    %c0_82 = arith.constant 0 : index
    %321 = vector.load %arg9[%c4, %c0_81, %c0_82] : memref<8x8x128xf32, #tpu.memory_space<vmem>>, vector<1x8x128xf32>
    %322 = vector.shape_cast %321 : vector<1x8x128xf32> to vector<8x128xf32>
    %323 = vector.shape_cast %320 : vector<8x128xf32> to vector<1x8x128xf32>
    tpu.vector_store %arg9[%c4, %c0_81, %c0_82], %323 {strides = array<i32>} : memref<8x8x128xf32, #tpu.memory_space<vmem>>, vector<1x8x128xf32>,
    %324 = vector.extract_strided_slice %17 {offsets = [40, 0], sizes = [8, 512], strides = [1, 1]} : vector<64x512xf32> to vector<8x512xf32>
    %cst_83 = arith.constant dense<0.000000e+00> : vector<8x512xf32>
    %325 = tpu.matmul %291, %18, %cst_83 {dimension_numbers = #tpu.dot_dimension_numbers<[1], [0], [0], [1], [0, 0, 1, 1], [], []>} : vector<8x128xf32>, vector<128x512xf32>, vector<8x512xf32> -> vector<8x512xf32>
    %326 = arith.addf %324, %325 : vector<8x512xf32>
    %327 = vector.extract_strided_slice %326 {offsets = [0, 0], sizes = [8, 128], strides = [1, 1]} : vector<8x512xf32> to vector<8x128xf32>
    %328 = arith.negf %327 : vector<8x128xf32>
    %329 = math.exp %328 : vector<8x128xf32>
    %cst_84 = arith.constant 1.000000e+00 : f32
    %330 = vector.broadcast %cst_84 : f32 to vector<8x128xf32>
    %331 = arith.addf %330, %329 : vector<8x128xf32>
    %332 = arith.divf %330, %331 : vector<8x128xf32>
    %333 = vector.extract_strided_slice %326 {offsets = [0, 128], sizes = [8, 128], strides = [1, 1]} : vector<8x512xf32> to vector<8x128xf32>
    %334 = arith.negf %333 : vector<8x128xf32>
    %335 = math.exp %334 : vector<8x128xf32>
    %cst_85 = arith.constant 1.000000e+00 : f32
    %336 = vector.broadcast %cst_85 : f32 to vector<8x128xf32>
    %337 = arith.addf %336, %335 : vector<8x128xf32>
    %338 = arith.divf %336, %337 : vector<8x128xf32>
    %339 = vector.extract_strided_slice %326 {offsets = [0, 256], sizes = [8, 128], strides = [1, 1]} : vector<8x512xf32> to vector<8x128xf32>
    %340 = math.tanh %339 : vector<8x128xf32>
    %341 = vector.extract_strided_slice %326 {offsets = [0, 384], sizes = [8, 128], strides = [1, 1]} : vector<8x512xf32> to vector<8x128xf32>
    %342 = arith.negf %341 : vector<8x128xf32>
    %343 = math.exp %342 : vector<8x128xf32>
    %cst_86 = arith.constant 1.000000e+00 : f32
    %344 = vector.broadcast %cst_86 : f32 to vector<8x128xf32>
    %345 = arith.addf %344, %343 : vector<8x128xf32>
    %346 = arith.divf %344, %345 : vector<8x128xf32>
    %347 = arith.mulf %338, %289 : vector<8x128xf32>
    %348 = arith.mulf %332, %340 : vector<8x128xf32>
    %349 = arith.addf %347, %348 : vector<8x128xf32>
    %350 = math.tanh %349 : vector<8x128xf32>
    %351 = arith.mulf %346, %350 : vector<8x128xf32>
    %cst_87 = arith.constant dense<0.000000e+00> : vector<8x512xf32>
    %352 = tpu.matmul %351, %19, %cst_87 {dimension_numbers = #tpu.dot_dimension_numbers<[1], [0], [0], [1], [0, 0, 1, 1], [], []>} : vector<8x128xf32>, vector<128x512xf32>, vector<8x512xf32> -> vector<8x512xf32>
    %cst_88 = arith.constant dense<0.000000e+00> : vector<8x512xf32>
    %353 = tpu.matmul %320, %20, %cst_88 {dimension_numbers = #tpu.dot_dimension_numbers<[1], [0], [0], [1], [0, 0, 1, 1], [], []>} : vector<8x128xf32>, vector<128x512xf32>, vector<8x512xf32> -> vector<8x512xf32>
    %354 = arith.addf %352, %353 : vector<8x512xf32>
    %355 = arith.addf %354, %23 : vector<8x512xf32>
    %356 = vector.extract_strided_slice %355 {offsets = [0, 0], sizes = [8, 128], strides = [1, 1]} : vector<8x512xf32> to vector<8x128xf32>
    %357 = arith.negf %356 : vector<8x128xf32>
    %358 = math.exp %357 : vector<8x128xf32>
    %cst_89 = arith.constant 1.000000e+00 : f32
    %359 = vector.broadcast %cst_89 : f32 to vector<8x128xf32>
    %360 = arith.addf %359, %358 : vector<8x128xf32>
    %361 = arith.divf %359, %360 : vector<8x128xf32>
    %362 = vector.extract_strided_slice %355 {offsets = [0, 128], sizes = [8, 128], strides = [1, 1]} : vector<8x512xf32> to vector<8x128xf32>
    %363 = arith.negf %362 : vector<8x128xf32>
    %364 = math.exp %363 : vector<8x128xf32>
    %cst_90 = arith.constant 1.000000e+00 : f32
    %365 = vector.broadcast %cst_90 : f32 to vector<8x128xf32>
    %366 = arith.addf %365, %364 : vector<8x128xf32>
    %367 = arith.divf %365, %366 : vector<8x128xf32>
    %368 = vector.extract_strided_slice %355 {offsets = [0, 256], sizes = [8, 128], strides = [1, 1]} : vector<8x512xf32> to vector<8x128xf32>
    %369 = math.tanh %368 : vector<8x128xf32>
    %370 = vector.extract_strided_slice %355 {offsets = [0, 384], sizes = [8, 128], strides = [1, 1]} : vector<8x512xf32> to vector<8x128xf32>
    %371 = arith.negf %370 : vector<8x128xf32>
    %372 = math.exp %371 : vector<8x128xf32>
    %cst_91 = arith.constant 1.000000e+00 : f32
    %373 = vector.broadcast %cst_91 : f32 to vector<8x128xf32>
    %374 = arith.addf %373, %372 : vector<8x128xf32>
    %375 = arith.divf %373, %374 : vector<8x128xf32>
    %376 = arith.mulf %367, %318 : vector<8x128xf32>
    %377 = arith.mulf %361, %369 : vector<8x128xf32>
    %378 = arith.addf %376, %377 : vector<8x128xf32>
    %379 = math.tanh %378 : vector<8x128xf32>
    %380 = arith.mulf %375, %379 : vector<8x128xf32>
    %c5 = arith.constant 5 : index
    %c0_92 = arith.constant 0 : index
    %c0_93 = arith.constant 0 : index
    %381 = vector.load %arg9[%c5, %c0_92, %c0_93] : memref<8x8x128xf32, #tpu.memory_space<vmem>>, vector<1x8x128xf32>
    %382 = vector.shape_cast %381 : vector<1x8x128xf32> to vector<8x128xf32>
    %383 = vector.shape_cast %380 : vector<8x128xf32> to vector<1x8x128xf32>
    tpu.vector_store %arg9[%c5, %c0_92, %c0_93], %383 {strides = array<i32>} : memref<8x8x128xf32, #tpu.memory_space<vmem>>, vector<1x8x128xf32>,
    %384 = vector.extract_strided_slice %17 {offsets = [48, 0], sizes = [8, 512], strides = [1, 1]} : vector<64x512xf32> to vector<8x512xf32>
    %cst_94 = arith.constant dense<0.000000e+00> : vector<8x512xf32>
    %385 = tpu.matmul %351, %18, %cst_94 {dimension_numbers = #tpu.dot_dimension_numbers<[1], [0], [0], [1], [0, 0, 1, 1], [], []>} : vector<8x128xf32>, vector<128x512xf32>, vector<8x512xf32> -> vector<8x512xf32>
    %386 = arith.addf %384, %385 : vector<8x512xf32>
    %387 = vector.extract_strided_slice %386 {offsets = [0, 0], sizes = [8, 128], strides = [1, 1]} : vector<8x512xf32> to vector<8x128xf32>
    %388 = arith.negf %387 : vector<8x128xf32>
    %389 = math.exp %388 : vector<8x128xf32>
    %cst_95 = arith.constant 1.000000e+00 : f32
    %390 = vector.broadcast %cst_95 : f32 to vector<8x128xf32>
    %391 = arith.addf %390, %389 : vector<8x128xf32>
    %392 = arith.divf %390, %391 : vector<8x128xf32>
    %393 = vector.extract_strided_slice %386 {offsets = [0, 128], sizes = [8, 128], strides = [1, 1]} : vector<8x512xf32> to vector<8x128xf32>
    %394 = arith.negf %393 : vector<8x128xf32>
    %395 = math.exp %394 : vector<8x128xf32>
    %cst_96 = arith.constant 1.000000e+00 : f32
    %396 = vector.broadcast %cst_96 : f32 to vector<8x128xf32>
    %397 = arith.addf %396, %395 : vector<8x128xf32>
    %398 = arith.divf %396, %397 : vector<8x128xf32>
    %399 = vector.extract_strided_slice %386 {offsets = [0, 256], sizes = [8, 128], strides = [1, 1]} : vector<8x512xf32> to vector<8x128xf32>
    %400 = math.tanh %399 : vector<8x128xf32>
    %401 = vector.extract_strided_slice %386 {offsets = [0, 384], sizes = [8, 128], strides = [1, 1]} : vector<8x512xf32> to vector<8x128xf32>
    %402 = arith.negf %401 : vector<8x128xf32>
    %403 = math.exp %402 : vector<8x128xf32>
    %cst_97 = arith.constant 1.000000e+00 : f32
    %404 = vector.broadcast %cst_97 : f32 to vector<8x128xf32>
    %405 = arith.addf %404, %403 : vector<8x128xf32>
    %406 = arith.divf %404, %405 : vector<8x128xf32>
    %407 = arith.mulf %398, %349 : vector<8x128xf32>
    %408 = arith.mulf %392, %400 : vector<8x128xf32>
    %409 = arith.addf %407, %408 : vector<8x128xf32>
    %410 = math.tanh %409 : vector<8x128xf32>
    %411 = arith.mulf %406, %410 : vector<8x128xf32>
    %cst_98 = arith.constant dense<0.000000e+00> : vector<8x512xf32>
    %412 = tpu.matmul %411, %19, %cst_98 {dimension_numbers = #tpu.dot_dimension_numbers<[1], [0], [0], [1], [0, 0, 1, 1], [], []>} : vector<8x128xf32>, vector<128x512xf32>, vector<8x512xf32> -> vector<8x512xf32>
    %cst_99 = arith.constant dense<0.000000e+00> : vector<8x512xf32>
    %413 = tpu.matmul %380, %20, %cst_99 {dimension_numbers = #tpu.dot_dimension_numbers<[1], [0], [0], [1], [0, 0, 1, 1], [], []>} : vector<8x128xf32>, vector<128x512xf32>, vector<8x512xf32> -> vector<8x512xf32>
    %414 = arith.addf %412, %413 : vector<8x512xf32>
    %415 = arith.addf %414, %23 : vector<8x512xf32>
    %416 = vector.extract_strided_slice %415 {offsets = [0, 0], sizes = [8, 128], strides = [1, 1]} : vector<8x512xf32> to vector<8x128xf32>
    %417 = arith.negf %416 : vector<8x128xf32>
    %418 = math.exp %417 : vector<8x128xf32>
    %cst_100 = arith.constant 1.000000e+00 : f32
    %419 = vector.broadcast %cst_100 : f32 to vector<8x128xf32>
    %420 = arith.addf %419, %418 : vector<8x128xf32>
    %421 = arith.divf %419, %420 : vector<8x128xf32>
    %422 = vector.extract_strided_slice %415 {offsets = [0, 128], sizes = [8, 128], strides = [1, 1]} : vector<8x512xf32> to vector<8x128xf32>
    %423 = arith.negf %422 : vector<8x128xf32>
    %424 = math.exp %423 : vector<8x128xf32>
    %cst_101 = arith.constant 1.000000e+00 : f32
    %425 = vector.broadcast %cst_101 : f32 to vector<8x128xf32>
    %426 = arith.addf %425, %424 : vector<8x128xf32>
    %427 = arith.divf %425, %426 : vector<8x128xf32>
    %428 = vector.extract_strided_slice %415 {offsets = [0, 256], sizes = [8, 128], strides = [1, 1]} : vector<8x512xf32> to vector<8x128xf32>
    %429 = math.tanh %428 : vector<8x128xf32>
    %430 = vector.extract_strided_slice %415 {offsets = [0, 384], sizes = [8, 128], strides = [1, 1]} : vector<8x512xf32> to vector<8x128xf32>
    %431 = arith.negf %430 : vector<8x128xf32>
    %432 = math.exp %431 : vector<8x128xf32>
    %cst_102 = arith.constant 1.000000e+00 : f32
    %433 = vector.broadcast %cst_102 : f32 to vector<8x128xf32>
    %434 = arith.addf %433, %432 : vector<8x128xf32>
    %435 = arith.divf %433, %434 : vector<8x128xf32>
    %436 = arith.mulf %427, %378 : vector<8x128xf32>
    %437 = arith.mulf %421, %429 : vector<8x128xf32>
    %438 = arith.addf %436, %437 : vector<8x128xf32>
    %439 = math.tanh %438 : vector<8x128xf32>
    %440 = arith.mulf %435, %439 : vector<8x128xf32>
    %c6 = arith.constant 6 : index
    %c0_103 = arith.constant 0 : index
    %c0_104 = arith.constant 0 : index
    %441 = vector.load %arg9[%c6, %c0_103, %c0_104] : memref<8x8x128xf32, #tpu.memory_space<vmem>>, vector<1x8x128xf32>
    %442 = vector.shape_cast %441 : vector<1x8x128xf32> to vector<8x128xf32>
    %443 = vector.shape_cast %440 : vector<8x128xf32> to vector<1x8x128xf32>
    tpu.vector_store %arg9[%c6, %c0_103, %c0_104], %443 {strides = array<i32>} : memref<8x8x128xf32, #tpu.memory_space<vmem>>, vector<1x8x128xf32>,
    %444 = vector.extract_strided_slice %17 {offsets = [56, 0], sizes = [8, 512], strides = [1, 1]} : vector<64x512xf32> to vector<8x512xf32>
    %cst_105 = arith.constant dense<0.000000e+00> : vector<8x512xf32>
    %445 = tpu.matmul %411, %18, %cst_105 {dimension_numbers = #tpu.dot_dimension_numbers<[1], [0], [0], [1], [0, 0, 1, 1], [], []>} : vector<8x128xf32>, vector<128x512xf32>, vector<8x512xf32> -> vector<8x512xf32>
    %446 = arith.addf %444, %445 : vector<8x512xf32>
    %447 = vector.extract_strided_slice %446 {offsets = [0, 0], sizes = [8, 128], strides = [1, 1]} : vector<8x512xf32> to vector<8x128xf32>
    %448 = arith.negf %447 : vector<8x128xf32>
    %449 = math.exp %448 : vector<8x128xf32>
    %cst_106 = arith.constant 1.000000e+00 : f32
    %450 = vector.broadcast %cst_106 : f32 to vector<8x128xf32>
    %451 = arith.addf %450, %449 : vector<8x128xf32>
    %452 = arith.divf %450, %451 : vector<8x128xf32>
    %453 = vector.extract_strided_slice %446 {offsets = [0, 128], sizes = [8, 128], strides = [1, 1]} : vector<8x512xf32> to vector<8x128xf32>
    %454 = arith.negf %453 : vector<8x128xf32>
    %455 = math.exp %454 : vector<8x128xf32>
    %cst_107 = arith.constant 1.000000e+00 : f32
    %456 = vector.broadcast %cst_107 : f32 to vector<8x128xf32>
    %457 = arith.addf %456, %455 : vector<8x128xf32>
    %458 = arith.divf %456, %457 : vector<8x128xf32>
    %459 = vector.extract_strided_slice %446 {offsets = [0, 256], sizes = [8, 128], strides = [1, 1]} : vector<8x512xf32> to vector<8x128xf32>
    %460 = math.tanh %459 : vector<8x128xf32>
    %461 = vector.extract_strided_slice %446 {offsets = [0, 384], sizes = [8, 128], strides = [1, 1]} : vector<8x512xf32> to vector<8x128xf32>
    %462 = arith.negf %461 : vector<8x128xf32>
    %463 = math.exp %462 : vector<8x128xf32>
    %cst_108 = arith.constant 1.000000e+00 : f32
    %464 = vector.broadcast %cst_108 : f32 to vector<8x128xf32>
    %465 = arith.addf %464, %463 : vector<8x128xf32>
    %466 = arith.divf %464, %465 : vector<8x128xf32>
    %467 = arith.mulf %458, %409 : vector<8x128xf32>
    %468 = arith.mulf %452, %460 : vector<8x128xf32>
    %469 = arith.addf %467, %468 : vector<8x128xf32>
    %470 = math.tanh %469 : vector<8x128xf32>
    %471 = arith.mulf %466, %470 : vector<8x128xf32>
    %cst_109 = arith.constant dense<0.000000e+00> : vector<8x512xf32>
    %472 = tpu.matmul %471, %19, %cst_109 {dimension_numbers = #tpu.dot_dimension_numbers<[1], [0], [0], [1], [0, 0, 1, 1], [], []>} : vector<8x128xf32>, vector<128x512xf32>, vector<8x512xf32> -> vector<8x512xf32>
    %cst_110 = arith.constant dense<0.000000e+00> : vector<8x512xf32>
    %473 = tpu.matmul %440, %20, %cst_110 {dimension_numbers = #tpu.dot_dimension_numbers<[1], [0], [0], [1], [0, 0, 1, 1], [], []>} : vector<8x128xf32>, vector<128x512xf32>, vector<8x512xf32> -> vector<8x512xf32>
    %474 = arith.addf %472, %473 : vector<8x512xf32>
    %475 = arith.addf %474, %23 : vector<8x512xf32>
    %476 = vector.extract_strided_slice %475 {offsets = [0, 0], sizes = [8, 128], strides = [1, 1]} : vector<8x512xf32> to vector<8x128xf32>
    %477 = arith.negf %476 : vector<8x128xf32>
    %478 = math.exp %477 : vector<8x128xf32>
    %cst_111 = arith.constant 1.000000e+00 : f32
    %479 = vector.broadcast %cst_111 : f32 to vector<8x128xf32>
    %480 = arith.addf %479, %478 : vector<8x128xf32>
    %481 = arith.divf %479, %480 : vector<8x128xf32>
    %482 = vector.extract_strided_slice %475 {offsets = [0, 128], sizes = [8, 128], strides = [1, 1]} : vector<8x512xf32> to vector<8x128xf32>
    %483 = arith.negf %482 : vector<8x128xf32>
    %484 = math.exp %483 : vector<8x128xf32>
    %cst_112 = arith.constant 1.000000e+00 : f32
    %485 = vector.broadcast %cst_112 : f32 to vector<8x128xf32>
    %486 = arith.addf %485, %484 : vector<8x128xf32>
    %487 = arith.divf %485, %486 : vector<8x128xf32>
    %488 = vector.extract_strided_slice %475 {offsets = [0, 256], sizes = [8, 128], strides = [1, 1]} : vector<8x512xf32> to vector<8x128xf32>
    %489 = math.tanh %488 : vector<8x128xf32>
    %490 = vector.extract_strided_slice %475 {offsets = [0, 384], sizes = [8, 128], strides = [1, 1]} : vector<8x512xf32> to vector<8x128xf32>
    %491 = arith.negf %490 : vector<8x128xf32>
    %492 = math.exp %491 : vector<8x128xf32>
    %cst_113 = arith.constant 1.000000e+00 : f32
    %493 = vector.broadcast %cst_113 : f32 to vector<8x128xf32>
    %494 = arith.addf %493, %492 : vector<8x128xf32>
    %495 = arith.divf %493, %494 : vector<8x128xf32>
    %496 = arith.mulf %487, %438 : vector<8x128xf32>
    %497 = arith.mulf %481, %489 : vector<8x128xf32>
    %498 = arith.addf %496, %497 : vector<8x128xf32>
    %499 = math.tanh %498 : vector<8x128xf32>
    %500 = arith.mulf %495, %499 : vector<8x128xf32>
    %c7 = arith.constant 7 : index
    %c0_114 = arith.constant 0 : index
    %c0_115 = arith.constant 0 : index
    %501 = vector.load %arg9[%c7, %c0_114, %c0_115] : memref<8x8x128xf32, #tpu.memory_space<vmem>>, vector<1x8x128xf32>
    %502 = vector.shape_cast %501 : vector<1x8x128xf32> to vector<8x128xf32>
    %503 = vector.shape_cast %500 : vector<8x128xf32> to vector<1x8x128xf32>
    tpu.vector_store %arg9[%c7, %c0_114, %c0_115], %503 {strides = array<i32>} : memref<8x8x128xf32, #tpu.memory_space<vmem>>, vector<1x8x128xf32>,
    %c0_116 = arith.constant 0 : index
    %c0_117 = arith.constant 0 : index
    %c0_118 = arith.constant 0 : index
    %504 = vector.load %arg10[%c0_116, %c0_117, %c0_118] : memref<2x8x128xf32, #tpu.memory_space<vmem>>, vector<1x8x128xf32>
    %505 = vector.shape_cast %504 : vector<1x8x128xf32> to vector<8x128xf32>
    %506 = vector.shape_cast %471 : vector<8x128xf32> to vector<1x8x128xf32>
    tpu.vector_store %arg10[%c0_116, %c0_117, %c0_118], %506 {strides = array<i32>} : memref<2x8x128xf32, #tpu.memory_space<vmem>>, vector<1x8x128xf32>,
    %c0_119 = arith.constant 0 : index
    %c0_120 = arith.constant 0 : index
    %c0_121 = arith.constant 0 : index
    %507 = vector.load %arg11[%c0_119, %c0_120, %c0_121] : memref<2x8x128xf32, #tpu.memory_space<vmem>>, vector<1x8x128xf32>
    %508 = vector.shape_cast %507 : vector<1x8x128xf32> to vector<8x128xf32>
    %509 = vector.shape_cast %469 : vector<8x128xf32> to vector<1x8x128xf32>
    tpu.vector_store %arg11[%c0_119, %c0_120, %c0_121], %509 {strides = array<i32>} : memref<2x8x128xf32, #tpu.memory_space<vmem>>, vector<1x8x128xf32>,
    %c1_122 = arith.constant 1 : index
    %c0_123 = arith.constant 0 : index
    %c0_124 = arith.constant 0 : index
    %510 = vector.load %arg10[%c1_122, %c0_123, %c0_124] : memref<2x8x128xf32, #tpu.memory_space<vmem>>, vector<1x8x128xf32>
    %511 = vector.shape_cast %510 : vector<1x8x128xf32> to vector<8x128xf32>
    %512 = vector.shape_cast %500 : vector<8x128xf32> to vector<1x8x128xf32>
    tpu.vector_store %arg10[%c1_122, %c0_123, %c0_124], %512 {strides = array<i32>} : memref<2x8x128xf32, #tpu.memory_space<vmem>>, vector<1x8x128xf32>,
    %c1_125 = arith.constant 1 : index
    %c0_126 = arith.constant 0 : index
    %c0_127 = arith.constant 0 : index
    %513 = vector.load %arg11[%c1_125, %c0_126, %c0_127] : memref<2x8x128xf32, #tpu.memory_space<vmem>>, vector<1x8x128xf32>
    %514 = vector.shape_cast %513 : vector<1x8x128xf32> to vector<8x128xf32>
    %515 = vector.shape_cast %498 : vector<8x128xf32> to vector<1x8x128xf32>
    tpu.vector_store %arg11[%c1_125, %c0_126, %c0_127], %515 {strides = array<i32>} : memref<2x8x128xf32, #tpu.memory_space<vmem>>, vector<1x8x128xf32>,
    return
  }
  func.func @transform_0(%arg0: i32, %arg1: i32) -> (i32, i32, i32) {
    %c0_i32 = arith.constant 0 : i32
    %c0_i32_0 = arith.constant 0 : i32
    return %arg1, %arg0, %c0_i32 : i32, i32, i32
  }
  func.func @transform_1(%arg0: i32, %arg1: i32) -> (i32, i32) {
    %c0_i32 = arith.constant 0 : i32
    %c0_i32_0 = arith.constant 0 : i32
    %c0_i32_1 = arith.constant 0 : i32
    return %c0_i32, %c0_i32_0 : i32, i32
  }
  func.func @transform_2(%arg0: i32, %arg1: i32) -> (i32, i32) {
    %c0_i32 = arith.constant 0 : i32
    %c0_i32_0 = arith.constant 0 : i32
    %c0_i32_1 = arith.constant 0 : i32
    return %c0_i32, %c0_i32_0 : i32, i32
  }
  func.func @transform_3(%arg0: i32, %arg1: i32) -> (i32, i32) {
    %c0_i32 = arith.constant 0 : i32
    %c0_i32_0 = arith.constant 0 : i32
    %c0_i32_1 = arith.constant 0 : i32
    return %c0_i32, %c0_i32_0 : i32, i32
  }
  func.func @transform_4(%arg0: i32, %arg1: i32) -> (i32, i32) {
    %c0_i32 = arith.constant 0 : i32
    %c0_i32_0 = arith.constant 0 : i32
    %c0_i32_1 = arith.constant 0 : i32
    return %c0_i32, %c0_i32_0 : i32, i32
  }
  func.func @transform_5(%arg0: i32, %arg1: i32) -> (i32, i32) {
    %c0_i32 = arith.constant 0 : i32
    %c0_i32_0 = arith.constant 0 : i32
    %c0_i32_1 = arith.constant 0 : i32
    return %c0_i32, %c0_i32_0 : i32, i32
  }
  func.func @transform_6(%arg0: i32, %arg1: i32) -> (i32, i32) {
    %c0_i32 = arith.constant 0 : i32
    %c0_i32_0 = arith.constant 0 : i32
    %c0_i32_1 = arith.constant 0 : i32
    return %c0_i32, %c0_i32_0 : i32, i32
  }
  func.func @transform_7(%arg0: i32, %arg1: i32) -> (i32, i32, i32) {
    %c0_i32 = arith.constant 0 : i32
    %c0_i32_0 = arith.constant 0 : i32
    return %arg1, %arg0, %c0_i32 : i32, i32, i32
  }
  func.func @transform_8(%arg0: i32, %arg1: i32) -> (i32, i32, i32) {
    %c0_i32 = arith.constant 0 : i32
    %c0_i32_0 = arith.constant 0 : i32
    %c0_i32_1 = arith.constant 0 : i32
    return %c0_i32, %arg0, %c0_i32_0 : i32, i32, i32
  }
  func.func @transform_9(%arg0: i32, %arg1: i32) -> (i32, i32, i32) {
    %c0_i32 = arith.constant 0 : i32
    %c0_i32_0 = arith.constant 0 : i32
    %c0_i32_1 = arith.constant 0 : i32
    return %c0_i32, %arg0, %c0_i32_0 : i32, i32, i32
  }
}

</mosaic_0001>

<bundles_post_ra>
// kernel: tpu_custom_call.1
= control target key start
LH: loop header
LB: loop body
LE: loop exit
PB: predicated region body
PF: predicated region fallthrough
CT: control target
= control target key end

     0   :  { %15 = vsyncpa [#allocation3], 0  ;;  %s8160_s0 = inlined_call_operand.hbm [shape: f32[8,8,128], index: 0, kind: input, shape index: {}]   ;;  %s8161_s1 = inlined_call_operand.hbm [shape: f32[128,512], index: 1, kind: input, shape index: {}]   ;;  %s8162_s2 = inlined_call_operand.vmem [shape: f32[1,512], index: 2, kind: input, shape index: {}]   ;;  %s8163_s3 = inlined_call_operand.hbm [shape: f32[128,512], index: 3, kind: input, shape index: {}]   ;;  %s8164_s4 = inlined_call_operand.hbm [shape: f32[128,512], index: 4, kind: input, shape index: {}]   ;;  %s8165_s5 = inlined_call_operand.hbm [shape: f32[128,512], index: 5, kind: input, shape index: {}]   ;;  %s8166_s6 = inlined_call_operand.vmem [shape: f32[1,512], index: 6, kind: input, shape index: {}]   ;;  %s8167_s7 = inlined_call_operand.hbm [shape: f32[8,8,128], index: 7, kind: output, shape index: {0}]   ;;  %s8168_s8 = inlined_call_operand.hbm [shape: f32[2,8,128], index: 8, kind: output, shape index: {1}]   ;;  %s8169_s9 = inlined_call_operand.hbm [shape: f32[2,8,128], index: 9, kind: output, shape index: {2}]  }
   0x1   :  { %16 = vsyncpa [#allocation6], 0 }
   0x2   :  { %17 = vsyncpa [#allocation9], 0 }
   0x3   :  { %18 = vsyncpa [#allocation4], 0 }
   0x4   :  { %19 = vsyncpa [#allocation13], 0  ;;  %s6771_s30 = smov [#allocation5]   ;;  %s6585_s13 = scalar_lea.hbm %s8161_s1, 8192 }
   0x5   :  { %s37_s10 = sshll.u32 %s6771_s30, 4  ;;  %p6586_p0 = scmp.ne.s32.totalorder %s8161_s1, %s6585_s13  ;;  %s38_s10 = int_to_ptr.vmem [resolvable:$true] %s37_s10 }
   0x6   :  { %p6589_p1 = scmp.lt.u32.totalorder %s6585_s13, %s8161_s1 }
   0x8   :  { %p6591_p2 = pnand %p6589_p1, %p6586_p0 }
   0xa   :  { %6594 = shalt.err (!%p6591_p2)
}
   0xb   :  { %s6595_s18 = scalar_lea.vmem %s38_s10, 8192  ;;  %p6600_p4 = scmp.lt.s32.totalorder %s38_s10, %s38_s10 }
   0xc   :  { %p6596_p3 = scmp.ne.s32.totalorder %s38_s10, %s6595_s18  ;;  %p6601_p5 = scmp.lt.s32.totalorder %s6595_s18, %s6595_s18 }
   0xe   :  { %p6602_p6 = por %p6601_p5, %p6600_p4 }
  0x10   :  { %p6603_p7 = pnand %p6602_p6, %p6596_p3 }
  0x12   :  { %6606 = shalt.err (!%p6603_p7)
}
  0x13   :  { %s6772_s19 = smov 512   ;;  %s6773_s20 = smov 32  }
  0x14   :  { %43 = dma.hbm_to_vmem [thread:$0]  %s8161_s1, 8192, %s38_s10, [#allocation6], %s6772_s19, %s6772_s19, %s6773_s20  }
  0x15   :  { %s6774_s23 = smov [#allocation8]   ;;  %s6775_s25 = smov [#allocation2]  }
  0x16   :  { %s63_s24 = sshll.u32 %s6774_s23, 4  ;;  %s25_s26 = sshll.u32 %s6775_s25, 4  ;;  %s64_s24 = int_to_ptr.vmem [resolvable:$true] %s63_s24  ;;  %s26_s26 = int_to_ptr.vmem [resolvable:$true] %s25_s26 }
  0x17   :  { %s6607_s29 = scalar_lea.hbm %s8164_s4, 8192 }
  0x18   :  { %p6608_p8 = scmp.ne.s32.totalorder %s8164_s4, %s6607_s29  ;;  %p6611_p9 = scmp.lt.u32.totalorder %s6607_s29, %s8164_s4 }
  0x1a   :  { %p6613_p10 = pnand %p6611_p9, %p6608_p8 }
  0x1c   :  { %6616 = shalt.err (!%p6613_p10)
}
  0x1d   :  { %s6617_s1 = scalar_lea.vmem %s64_s24, 8192  ;;  %p6622_p12 = scmp.lt.s32.totalorder %s64_s24, %s64_s24 }
  0x1e   :  { %p6618_p11 = scmp.ne.s32.totalorder %s64_s24, %s6617_s1  ;;  %p6623_p13 = scmp.lt.s32.totalorder %s6617_s1, %s6617_s1 }
  0x20   :  { %p6624_p0 = por %p6623_p13, %p6622_p12 }
  0x22   :  { %p6625_p1 = pnand %p6624_p0, %p6618_p11 }
  0x24   :  { %6628 = shalt.err (!%p6625_p1)
}
  0x25   :  { %69 = dma.hbm_to_vmem [thread:$0]  %s8164_s4, 8192, %s64_s24, [#allocation9], %s6772_s19, %s6772_s19, %s6773_s20  }
  0x26   :  { %s6629_s17 = scalar_lea.hbm %s8160_s0, 1024 }
  0x27   :  { %p6630_p2 = scmp.ne.s32.totalorder %s8160_s0, %s6629_s17  ;;  %p6633_p3 = scmp.lt.u32.totalorder %s6629_s17, %s8160_s0 }
  0x29   :  { %p6635_p4 = pnand %p6633_p3, %p6630_p2 }
  0x2b   :  { %6638 = shalt.err (!%p6635_p4)
}
  0x2c   :  { %s6639_s25 = scalar_lea.vmem %s26_s26, 1024  ;;  %p6644_p6 = scmp.lt.s32.totalorder %s26_s26, %s26_s26 }
  0x2d   :  { %p6640_p5 = scmp.ne.s32.totalorder %s26_s26, %s6639_s25  ;;  %p6645_p7 = scmp.lt.s32.totalorder %s6639_s25, %s6639_s25 }
  0x2f   :  { %p6646_p8 = por %p6645_p7, %p6644_p6 }
  0x31   :  { %p6647_p9 = pnand %p6646_p8, %p6640_p5 }
  0x33   :  { %6650 = shalt.err (!%p6647_p9)
}
  0x34   :  { %s6776_s4 = smov 128   ;;  %s6777_s24 = smov 8  }
  0x35   :  { %31 = dma.hbm_to_vmem [thread:$0]  %s8160_s0, 1024, %s26_s26, [#allocation3], %s6776_s4, %s6776_s4, %s6777_s24  }
  0x36   :  { %s6778_s29 = smov [#allocation7]   ;;  %s6779_s11 = smov [#allocation10]  }
  0x37   :  { %s51_s30 = sshll.u32 %s6778_s29, 4  ;;  %s75_s12 = sshll.u32 %s6779_s11, 4  ;;  %s52_s30 = int_to_ptr.vmem [resolvable:$true] %s51_s30  ;;  %s76_s12 = int_to_ptr.vmem [resolvable:$true] %s75_s12 }
  0x38   :  { %s6651_s10 = scalar_lea.hbm %s8163_s3, 8192 }
  0x39   :  { %p6652_p10 = scmp.ne.s32.totalorder %s8163_s3, %s6651_s10  ;;  %p6655_p11 = scmp.lt.u32.totalorder %s6651_s10, %s8163_s3 }
  0x3b   :  { %p6657_p12 = pnand %p6655_p11, %p6652_p10 }
  0x3d   :  { %6660 = shalt.err (!%p6657_p12)
}
  0x3e   :  { %s6661_s0 = scalar_lea.vmem %s52_s30, 8192  ;;  %p6666_p0 = scmp.lt.s32.totalorder %s52_s30, %s52_s30 }
  0x3f   :  { %p6662_p13 = scmp.ne.s32.totalorder %s52_s30, %s6661_s0  ;;  %p6667_p1 = scmp.lt.s32.totalorder %s6661_s0, %s6661_s0 }
  0x41   :  { %p6668_p2 = por %p6667_p1, %p6666_p0 }
  0x43   :  { %p6669_p3 = pnand %p6668_p2, %p6662_p13 }
  0x45   :  { %6672 = shalt.err (!%p6669_p3)
}
  0x46   :  { %57 = dma.hbm_to_vmem [thread:$0]  %s8163_s3, 8192, %s52_s30, [#allocation6], %s6772_s19, %s6772_s19, %s6773_s20  }
  0x47   :  { %s6673_s23 = scalar_lea.hbm %s8165_s5, 8192 }
  0x48   :  { %p6674_p4 = scmp.ne.s32.totalorder %s8165_s5, %s6673_s23  ;;  %p6677_p5 = scmp.lt.u32.totalorder %s6673_s23, %s8165_s5 }
  0x4a   :  { %p6679_p6 = pnand %p6677_p5, %p6674_p4 }
  0x4c   :  { %6682 = shalt.err (!%p6679_p6)
}
  0x4d   :  { %s6683_s11 = scalar_lea.vmem %s76_s12, 8192  ;;  %p6688_p8 = scmp.lt.s32.totalorder %s76_s12, %s76_s12 }
  0x4e   :  { %p6684_p7 = scmp.ne.s32.totalorder %s76_s12, %s6683_s11  ;;  %p6689_p9 = scmp.lt.s32.totalorder %s6683_s11, %s6683_s11 }
  0x50   :  { %p6690_p10 = por %p6689_p9, %p6688_p8 }
  0x52   :  { %p6691_p11 = pnand %p6690_p10, %p6684_p7 }
  0x54   :  { %6694 = shalt.err (!%p6691_p11)
}
  0x55   :  { %81 = dma.hbm_to_vmem [thread:$0]  %s8165_s5, 8192, %s76_s12, [#allocation9], %s6772_s19, %s6772_s19, %s6773_s20  }
  0x56   :  { %6761 = dma.done.wait [#allocation3], 1024  }
  0x57   :  { %6762 = vsyncadd [#allocation3], 4294966272 }
  0x58   :  { %6763 = dma.done.wait [#allocation6], 16384  }
  0x59   :  { %6764 = vsyncadd [#allocation6], 4294950912 }
  0x5a   :  { %6765 = dma.done.wait [#allocation9], 16384  }
  0x5b   :  { %6766 = vsyncadd [#allocation9], 4294950912  ;;  %v8170_v0 = vmov 0.0   ;;  %v122_v1 = vld [vmem:[#allocation5 + $0x8] sm:$0xff]  ;;  %v124_v3 = vld [vmem:[#allocation5 + $0x18] sm:$0xff]  ;;  %s6782_s13 = smov [#allocation11]  }
  0x5c   :  { %271 = vmatprep.mubr.f32.mxu0 %v8170_v0  ;;  %384 = vmatprep.mubr.f32.mxu1 %v8170_v0  ;;  %v126_v2 = vld [vmem:[#allocation5 + $0x28] sm:$0xff]  ;;  %v128_v5 = vld [vmem:[#allocation5 + $0x38] sm:$0xff]  ;;  %v121_v6 = vld [vmem:[#allocation5] sm:$0xff]  ;;  %s4527_s1 = sshll.u32 %s6782_s13, 4  ;;  %s6783_s10 = smov [#allocation14]   ;;  %s8101_s1 = int_to_ptr.vmem [resolvable:$true] %s4527_s1 }
  0x5d   :  { %v4620_v4 = vpack.c.bf16 %v126_v2, %v122_v1  ;;  %v125_v7 = vld [vmem:[#allocation5 + $0x20] sm:$0xff]  ;;  %v4652_v8 = vpack.c.bf16 %v128_v5, %v124_v3  ;;  %v123_v10 = vld [vmem:[#allocation5 + $0x10] sm:$0xff]  ;;  %v130_v12 = vld [vmem:[#allocation5 + $0x48] sm:$0xff]  ;;  %s4551_s14 = sshll.u32 %s6783_s10, 4  ;;  %s8103_s14 = int_to_ptr.vmem [resolvable:$true] %s4551_s14 }
  0x5e   :  { %v4622_v9 = vpack.c.bf16 %v125_v7, %v121_v6  ;;  %v127_v11 = vld [vmem:[#allocation5 + $0x30] sm:$0xff]  ;;  %v134_v14 = vld [vmem:[#allocation5 + $0x68] sm:$0xff]  ;;  %v132_v15 = vld [vmem:[#allocation5 + $0x58] sm:$0xff] }
  0x5f   :  { %4621 = vmatprep.subr.bf16.mxu0 %v4620_v4  ;;  %v4654_v13 = vpack.c.bf16 %v127_v11, %v123_v10  ;;  %v136_v16 = vld [vmem:[#allocation5 + $0x78] sm:$0xff]  ;;  %4653 = vmatprep.subr.bf16.mxu1 %v4652_v8  ;;  %v4624_v17 = vpack.c.bf16 %v134_v14, %v130_v12  ;;  %v129_v19 = vld [vmem:[#allocation5 + $0x40] sm:$0xff]  ;;  %v131_v21 = vld [vmem:[#allocation5 + $0x50] sm:$0xff] }
  0x60   :  { %4623 = vmatpush1.bf16.msra.mxu0 %v4622_v9  ;;  %v4656_v18 = vpack.c.bf16 %v136_v16, %v132_v15  ;;  %v133_v20 = vld [vmem:[#allocation5 + $0x60] sm:$0xff]  ;;  %v135_v23 = vld [vmem:[#allocation5 + $0x70] sm:$0xff]  ;;  %v138_v24 = vld [vmem:[#allocation5 + $0x88] sm:$0xff] }
  0x61   :  { %4655 = vmatpush1.bf16.msra.mxu1 %v4654_v13  ;;  %v4626_v22 = vpack.c.bf16 %v133_v20, %v129_v19  ;;  %v142_v25 = vld [vmem:[#allocation5 + $0xa8] sm:$0xff]  ;;  %4625 = vmatprep.subr.bf16.mxu0 %v4624_v17  ;;  %v4658_v26 = vpack.c.bf16 %v135_v23, %v131_v21  ;;  %v140_v28 = vld [vmem:[#allocation5 + $0x98] sm:$0xff]  ;;  %v137_v30 = vld [vmem:[#allocation5 + $0x80] sm:$0xff] }
  0x62   :  { %4657 = vmatprep.subr.bf16.mxu1 %v4656_v18  ;;  %v4628_v27 = vpack.c.bf16 %v142_v25, %v138_v24  ;;  %v144_v29 = vld [vmem:[#allocation5 + $0xb8] sm:$0xff]  ;;  %v141_v32 = vld [vmem:[#allocation5 + $0xa0] sm:$0xff]  ;;  %v139_v33 = vld [vmem:[#allocation5 + $0x90] sm:$0xff] }
  0x63   :  { %v4660_v31 = vpack.c.bf16 %v144_v29, %v140_v28  ;;  %v143_v34 = vld [vmem:[#allocation5 + $0xb0] sm:$0xff]  ;;  %v4630_v35 = vpack.c.bf16 %v141_v32, %v137_v30  ;;  %v146_v36 = vld [vmem:[#allocation5 + $0xc8] sm:$0xff]  ;;  %v148_v38 = vld [vmem:[#allocation5 + $0xd8] sm:$0xff] }
  0x64   :  { %4627 = vmatpush1.bf16.msra.mxu0 %v4626_v22  ;;  %v150_v37 = vld [vmem:[#allocation5 + $0xe8] sm:$0xff]  ;;  %v4662_v39 = vpack.c.bf16 %v143_v34, %v139_v33  ;;  %v152_v41 = vld [vmem:[#allocation5 + $0xf8] sm:$0xff]  ;;  %v145_v42 = vld [vmem:[#allocation5 + $0xc0] sm:$0xff] }
  0x65   :  { %4659 = vmatpush1.bf16.msra.mxu1 %v4658_v26  ;;  %4629 = vmatprep.subr.bf16.mxu0 %v4628_v27  ;;  %v4632_v40 = vpack.c.bf16 %v150_v37, %v146_v36  ;;  %v149_v43 = vld [vmem:[#allocation5 + $0xe0] sm:$0xff]  ;;  %v4664_v44 = vpack.c.bf16 %v152_v41, %v148_v38  ;;  %v147_v45 = vld [vmem:[#allocation5 + $0xd0] sm:$0xff]  ;;  %v154_v47 = vld [vmem:[#allocation5 + $0x108] sm:$0xff] }
  0x66   :  { %4661 = vmatprep.subr.bf16.mxu1 %v4660_v31  ;;  %v151_v46 = vld [vmem:[#allocation5 + $0xf0] sm:$0xff]  ;;  %v158_v48 = vld [vmem:[#allocation5 + $0x128] sm:$0xff]  ;;  %v156_v49 = vld [vmem:[#allocation5 + $0x118] sm:$0xff]  ;;  %v4634_v51 = vpack.c.bf16 %v149_v43, %v145_v42 }
  0x67   :  { %v160_v50 = vld [vmem:[#allocation5 + $0x138] sm:$0xff]  ;;  %v4666_v52 = vpack.c.bf16 %v151_v46, %v147_v45  ;;  %v4636_v53 = vpack.c.bf16 %v158_v48, %v154_v47  ;;  %v153_v54 = vld [vmem:[#allocation5 + $0x100] sm:$0xff]  ;;  %v155_v56 = vld [vmem:[#allocation5 + $0x110] sm:$0xff] }
  0x68   :  { %4631 = vmatpush1.bf16.msra.mxu0 %v4630_v35  ;;  %v157_v55 = vld [vmem:[#allocation5 + $0x120] sm:$0xff]  ;;  %v4668_v57 = vpack.c.bf16 %v160_v50, %v156_v49  ;;  %v159_v58 = vld [vmem:[#allocation5 + $0x130] sm:$0xff]  ;;  %v162_v59 = vld [vmem:[#allocation5 + $0x148] sm:$0xff] }
  0x69   :  { %4663 = vmatpush1.bf16.msra.mxu1 %v4662_v39  ;;  %4633 = vmatprep.subr.bf16.mxu0 %v4632_v40  ;;  %v166_v60 = vld [vmem:[#allocation5 + $0x168] sm:$0xff]  ;;  %v164_v61 = vld [vmem:[#allocation5 + $0x158] sm:$0xff]  ;;  %v4638_v63 = vpack.c.bf16 %v157_v55, %v153_v54  ;;  %v4670_v1 = vpack.c.bf16 %v159_v58, %v155_v56  ;;  %v161_v3 = vld [vmem:[#allocation5 + $0x140] sm:$0xff] }
  0x6a   :  { %4665 = vmatprep.subr.bf16.mxu1 %v4664_v44  ;;  %v168_v62 = vld [vmem:[#allocation5 + $0x178] sm:$0xff]  ;;  %v4640_v2 = vpack.c.bf16 %v166_v60, %v162_v59  ;;  %v165_v4 = vld [vmem:[#allocation5 + $0x160] sm:$0xff]  ;;  %v163_v5 = vld [vmem:[#allocation5 + $0x150] sm:$0xff] }
  0x6b   :  { %v4672_v6 = vpack.c.bf16 %v168_v62, %v164_v61  ;;  %v167_v7 = vld [vmem:[#allocation5 + $0x170] sm:$0xff]  ;;  %v170_v8 = vld [vmem:[#allocation5 + $0x188] sm:$0xff]  ;;  %v172_v10 = vld [vmem:[#allocation5 + $0x198] sm:$0xff]  ;;  %v4642_v12 = vpack.c.bf16 %v165_v4, %v161_v3 }
  0x6c   :  { %4635 = vmatpush1.bf16.msra.mxu0 %v4634_v51  ;;  %v174_v9 = vld [vmem:[#allocation5 + $0x1a8] sm:$0xff]  ;;  %v176_v11 = vld [vmem:[#allocation5 + $0x1b8] sm:$0xff]  ;;  %v4674_v13 = vpack.c.bf16 %v167_v7, %v163_v5  ;;  %v169_v15 = vld [vmem:[#allocation5 + $0x180] sm:$0xff] }
  0x6d   :  { %4667 = vmatpush1.bf16.msra.mxu1 %v4666_v52  ;;  %4637 = vmatprep.subr.bf16.mxu0 %v4636_v53  ;;  %v4644_v14 = vpack.c.bf16 %v174_v9, %v170_v8  ;;  %v173_v16 = vld [vmem:[#allocation5 + $0x1a0] sm:$0xff]  ;;  %v171_v17 = vld [vmem:[#allocation5 + $0x190] sm:$0xff]  ;;  %v4676_v18 = vpack.c.bf16 %v176_v11, %v172_v10  ;;  %v178_v20 = vld [vmem:[#allocation5 + $0x1c8] sm:$0xff] }
  0x6e   :  { %4669 = vmatprep.subr.bf16.mxu1 %v4668_v57  ;;  %v175_v19 = vld [vmem:[#allocation5 + $0x1b0] sm:$0xff]  ;;  %v182_v21 = vld [vmem:[#allocation5 + $0x1e8] sm:$0xff]  ;;  %v180_v22 = vld [vmem:[#allocation5 + $0x1d8] sm:$0xff]  ;;  %v4646_v24 = vpack.c.bf16 %v173_v16, %v169_v15 }
  0x6f   :  { %v184_v23 = vld [vmem:[#allocation5 + $0x1f8] sm:$0xff]  ;;  %v4678_v25 = vpack.c.bf16 %v175_v19, %v171_v17  ;;  %v4648_v26 = vpack.c.bf16 %v182_v21, %v178_v20  ;;  %v177_v27 = vld [vmem:[#allocation5 + $0x1c0] sm:$0xff]  ;;  %v179_v29 = vld [vmem:[#allocation5 + $0x1d0] sm:$0xff] }
  0x70   :  { %4639 = vmatpush1.bf16.msra.mxu0 %v4638_v63  ;;  %v181_v28 = vld [vmem:[#allocation5 + $0x1e0] sm:$0xff]  ;;  %v4680_v30 = vpack.c.bf16 %v184_v23, %v180_v22  ;;  %v183_v31 = vld [vmem:[#allocation5 + $0x1f0] sm:$0xff]  ;;  %v434_v32 = vld [vmem:[#allocation7 + $0x8] sm:$0xff] }
  0x71   :  { %4671 = vmatpush1.bf16.msra.mxu1 %v4670_v1  ;;  %4641 = vmatprep.subr.bf16.mxu0 %v4640_v2  ;;  %v438_v33 = vld [vmem:[#allocation7 + $0x28] sm:$0xff]  ;;  %v436_v34 = vld [vmem:[#allocation7 + $0x18] sm:$0xff]  ;;  %v4650_v36 = vpack.c.bf16 %v181_v28, %v177_v27  ;;  %v4682_v37 = vpack.c.bf16 %v183_v31, %v179_v29  ;;  %v433_v39 = vld [vmem:[#allocation7] sm:$0xff] }
  0x72   :  { %4673 = vmatprep.subr.bf16.mxu1 %v4672_v6  ;;  %v440_v35 = vld [vmem:[#allocation7 + $0x38] sm:$0xff]  ;;  %v6911_v38 = vpack.c.bf16 %v438_v33, %v434_v32  ;;  %v437_v40 = vld [vmem:[#allocation7 + $0x20] sm:$0xff]  ;;  %v435_v42 = vld [vmem:[#allocation7 + $0x10] sm:$0xff] }
  0x73   :  { %v6913_v41 = vpack.c.bf16 %v440_v35, %v436_v34  ;;  %v439_v43 = vld [vmem:[#allocation7 + $0x30] sm:$0xff]  ;;  %v442_v44 = vld [vmem:[#allocation7 + $0x48] sm:$0xff]  ;;  %v113_v46 = vld [vmem:[#allocation2] sm:$0xff]  ;;  %v6915_v47 = vpack.c.bf16 %v437_v40, %v433_v39 }
  0x74   :  { %4643 = vmatpush1.bf16.msra.mxu0 %v4642_v12  ;;  %8370 = vst [vmem:[#allocation20_spill] sm:$0xff] %v6911_v38  ;;  %v446_v45 = vld [vmem:[#allocation7 + $0x68] sm:$0xff]  ;;  %v444_v48 = vld [vmem:[#allocation7 + $0x58] sm:$0xff]  ;;  %v6918_v50 = vpack.c.bf16 %v439_v43, %v435_v42  ;;  %v441_v51 = vld [vmem:[#allocation7 + $0x40] sm:$0xff] }
  0x75   :  { %4675 = vmatpush1.bf16.msra.mxu1 %v4674_v13  ;;  %4645 = vmatprep.subr.bf16.mxu0 %v4644_v14  ;;  %8371 = vst [vmem:[#allocation21_spill] sm:$0xff] %v6913_v41  ;;  %v448_v49 = vld [vmem:[#allocation7 + $0x78] sm:$0xff]  ;;  %v445_v52 = vld [vmem:[#allocation7 + $0x60] sm:$0xff]  ;;  %v6921_v53 = vpack.c.bf16 %v446_v45, %v442_v44  ;;  %v443_v54 = vld [vmem:[#allocation7 + $0x50] sm:$0xff] }
  0x76   :  { %4677 = vmatprep.subr.bf16.mxu1 %v4676_v18  ;;  %v447_v55 = vld [vmem:[#allocation7 + $0x70] sm:$0xff]  ;;  %v6923_v56 = vpack.c.bf16 %v448_v49, %v444_v48  ;;  %v450_v57 = vld [vmem:[#allocation7 + $0x88] sm:$0xff]  ;;  %v6926_v60 = vpack.c.bf16 %v445_v52, %v441_v51  ;;  %v452_v61 = vld [vmem:[#allocation7 + $0x98] sm:$0xff] }
  0x77   :  { %v454_v58 = vld [vmem:[#allocation7 + $0xa8] sm:$0xff]  ;;  %v456_v62 = vld [vmem:[#allocation7 + $0xb8] sm:$0xff]  ;;  %v6930_v63 = vpack.c.bf16 %v447_v55, %v443_v54  ;;  %v449_v1 = vld [vmem:[#allocation7 + $0x80] sm:$0xff] }
  0x78   :  { %4647 = vmatpush1.bf16.msra.mxu0 %v4646_v24  ;;  %v114_v59 = vld [vmem:[#allocation2 + $0x8] sm:$0xff]  ;;  %v453_v2 = vld [vmem:[#allocation7 + $0xa0] sm:$0xff]  ;;  %v6934_v3 = vpack.c.bf16 %v454_v58, %v450_v57  ;;  %v451_v4 = vld [vmem:[#allocation7 + $0x90] sm:$0xff]  ;;  %v6937_v6 = vpack.c.bf16 %v456_v62, %v452_v61 }
  0x79   :  { %4679 = vmatpush1.bf16.msra.mxu1 %v4678_v25  ;;  %4649 = vmatprep.subr.bf16.mxu0 %v4648_v26  ;;  %v455_v5 = vld [vmem:[#allocation7 + $0xb0] sm:$0xff]  ;;  %v458_v7 = vld [vmem:[#allocation7 + $0xc8] sm:$0xff]  ;;  %v6940_v10 = vpack.c.bf16 %v453_v2, %v449_v1  ;;  %v460_v11 = vld [vmem:[#allocation7 + $0xd8] sm:$0xff] }
  0x7a   :  { %4681 = vmatprep.subr.bf16.mxu1 %v4680_v30  ;;  %8372 = vst [vmem:[#allocation22_spill] sm:$0xff] %v6934_v3  ;;  %8373 = vst [vmem:[#allocation23_spill] sm:$0xff] %v6937_v6  ;;  %v462_v8 = vld [vmem:[#allocation7 + $0xe8] sm:$0xff]  ;;  %v115_v9 = vld [vmem:[#allocation2 + $0x10] sm:$0xff]  ;;  %v6944_v13 = vpack.c.bf16 %v455_v5, %v451_v4 }
  0x7b   :  { %8374 = vst [vmem:[#allocation24_spill] sm:$0xff] %v6940_v10  ;;  %v464_v12 = vld [vmem:[#allocation7 + $0xf8] sm:$0xff]  ;;  %v457_v14 = vld [vmem:[#allocation7 + $0xc0] sm:$0xff]  ;;  %v6948_v16 = vpack.c.bf16 %v462_v8, %v458_v7  ;;  %v459_v17 = vld [vmem:[#allocation7 + $0xd0] sm:$0xff] }
  0x7c   :  { %4651 = vmatpush1.bf16.msra.mxu0 %v4650_v36  ;;  %8375 = vst [vmem:[#allocation25_spill] sm:$0xff] %v6944_v13  ;;  %v461_v15 = vld [vmem:[#allocation7 + $0xe0] sm:$0xff]  ;;  %v463_v18 = vld [vmem:[#allocation7 + $0xf0] sm:$0xff]  ;;  %v6951_v19 = vpack.c.bf16 %v464_v12, %v460_v11  ;;  %v466_v20 = vld [vmem:[#allocation7 + $0x108] sm:$0xff] }
  0x7d   :  { %4683 = vmatpush1.bf16.msra.mxu1 %v4682_v37  ;;  %4685 = vmatprep.subr.bf16.mxu0 %v6911_v38  ;;  %8376 = vst [vmem:[#allocation26_spill] sm:$0xff] %v6948_v16  ;;  %v470_v21 = vld [vmem:[#allocation7 + $0x128] sm:$0xff]  ;;  %v116_v22 = vld [vmem:[#allocation2 + $0x18] sm:$0xff]  ;;  %v6954_v23 = vpack.c.bf16 %v461_v15, %v457_v14  ;;  %v6958_v26 = vpack.c.bf16 %v463_v18, %v459_v17  ;;  %v465_v27 = vld [vmem:[#allocation7 + $0x100] sm:$0xff] }
  0x7e   :  { %4717 = vmatprep.subr.bf16.mxu1 %v6913_v41  ;;  %8377 = vst [vmem:[#allocation27_spill] sm:$0xff] %v6951_v19  ;;  %v468_v24 = vld [vmem:[#allocation7 + $0x118] sm:$0xff]  ;;  %v469_v28 = vld [vmem:[#allocation7 + $0x120] sm:$0xff]  ;;  %v6962_v29 = vpack.c.bf16 %v470_v21, %v466_v20  ;;  %v467_v30 = vld [vmem:[#allocation7 + $0x110] sm:$0xff] }
  0x7f   :  { %272 = vmatmul.mubr.f32.vlgmr.msra.gmra.mrb[0].mxu0 %v113_v46  ;;  %8378 = vst [vmem:[#allocation28_spill] sm:$0xff] %v6954_v23  ;;  %v472_v25 = vld [vmem:[#allocation7 + $0x138] sm:$0xff]  ;;  %8379 = vst [vmem:[#allocation29_spill] sm:$0xff] %v6958_v26  ;;  %v471_v31 = vld [vmem:[#allocation7 + $0x130] sm:$0xff]  ;;  %v6968_v36 = vpack.c.bf16 %v469_v28, %v465_v27 }
  0x80   :  { %385 = vmatmul.mubr.f32.vlgmr.msra.gmra.mrb[0].mxu1 %v113_v46  ;;  %4687 = vmatpush1.bf16.msra.mxu0 %v6915_v47  ;;  %8380 = vst [vmem:[#allocation30_spill] sm:$0xff] %v6962_v29  ;;  %v6965_v32 = vpack.c.bf16 %v472_v25, %v468_v24  ;;  %v474_v33 = vld [vmem:[#allocation7 + $0x148] sm:$0xff]  ;;  %v117_v35 = vld [vmem:[#allocation2 + $0x20] sm:$0xff]  ;;  %v476_v37 = vld [vmem:[#allocation7 + $0x158] sm:$0xff]  ;;  %v6972_v40 = vpack.c.bf16 %v471_v31, %v467_v30 }
  0x81   :  { %4719 = vmatpush1.bf16.msra.mxu1 %v6918_v50  ;;  %277 = vmatprep.mubr.f32.mxu0 %v8170_v0  ;;  %v478_v34 = vld [vmem:[#allocation7 + $0x168] sm:$0xff]  ;;  %8382 = vst [vmem:[#allocation32_spill] sm:$0xff] %v6968_v36  ;;  %v480_v39 = vld [vmem:[#allocation7 + $0x178] sm:$0xff]  ;;  %v473_v42 = vld [vmem:[#allocation7 + $0x140] sm:$0xff] }
  0x82   :  { %390 = vmatprep.mubr.f32.mxu1 %v8170_v0  ;;  %4689 = vmatprep.subr.bf16.mxu0 %v6921_v53  ;;  %8381 = vst [vmem:[#allocation31_spill] sm:$0xff] %v6965_v32  ;;  %8383 = vst [vmem:[#allocation33_spill] sm:$0xff] %v6972_v40  ;;  %v477_v43 = vld [vmem:[#allocation7 + $0x160] sm:$0xff]  ;;  %v6976_v44 = vpack.c.bf16 %v478_v34, %v474_v33  ;;  %v475_v45 = vld [vmem:[#allocation7 + $0x150] sm:$0xff]  ;;  %v6979_v48 = vpack.c.bf16 %v480_v39, %v476_v37 }
  0x83   :  { %278 = vmatmul.mubr.f32.gmra.mrb[2].mxu0 %v114_v59  ;;  %4721 = vmatprep.subr.bf16.mxu1 %v6923_v56  ;;  %v479_v46 = vld [vmem:[#allocation7 + $0x170] sm:$0xff]  ;;  %v482_v49 = vld [vmem:[#allocation7 + $0x188] sm:$0xff]  ;;  %v6982_v54 = vpack.c.bf16 %v477_v43, %v473_v42  ;;  %v484_v55 = vld [vmem:[#allocation7 + $0x198] sm:$0xff] }
  0x84   :  { %391 = vmatmul.mubr.f32.gmra.mrb[2].mxu1 %v114_v59  ;;  %4691 = vmatpush1.bf16.msra.mxu0 %v6926_v60  ;;  %8384 = vst [vmem:[#allocation34_spill] sm:$0xff] %v6976_v44  ;;  %8385 = vst [vmem:[#allocation35_spill] sm:$0xff] %v6979_v48  ;;  %v486_v51 = vld [vmem:[#allocation7 + $0x1a8] sm:$0xff]  ;;  %v488_v57 = vld [vmem:[#allocation7 + $0x1b8] sm:$0xff]  ;;  %v6986_v58 = vpack.c.bf16 %v479_v46, %v475_v45 }
  0x85   :  { %4723 = vmatpush1.bf16.msra.mxu1 %v6930_v63  ;;  %283 = vmatprep.mubr.f32.mxu0 %v8170_v0  ;;  %v118_v52 = vld [vmem:[#allocation2 + $0x28] sm:$0xff]  ;;  %8386 = vst [vmem:[#allocation36_spill] sm:$0xff] %v6982_v54  ;;  %v481_v59 = vld [vmem:[#allocation7 + $0x180] sm:$0xff]  ;;  %v6990_v62 = vpack.c.bf16 %v486_v51, %v482_v49  ;;  %v483_v1 = vld [vmem:[#allocation7 + $0x190] sm:$0xff]  ;;  %v6993_v4 = vpack.c.bf16 %v488_v57, %v484_v55 }
  0x86   :  { %396 = vmatprep.mubr.f32.mxu1 %v8170_v0  ;;  %4693 = vmatprep.subr.bf16.mxu0 %v6934_v3  ;;  %8387 = vst [vmem:[#allocation37_spill] sm:$0xff] %v6986_v58  ;;  %v485_v61 = vld [vmem:[#allocation7 + $0x1a0] sm:$0xff]  ;;  %v487_v2 = vld [vmem:[#allocation7 + $0x1b0] sm:$0xff]  ;;  %v490_v5 = vld [vmem:[#allocation7 + $0x1c8] sm:$0xff] }
  0x87   :  { %284 = vmatmul.mubr.f32.gmra.mrb[4].mxu0 %v115_v9  ;;  %4725 = vmatprep.subr.bf16.mxu1 %v6937_v6  ;;  %8388 = vst [vmem:[#allocation38_spill] sm:$0xff] %v6990_v62  ;;  %8389 = vst [vmem:[#allocation39_spill] sm:$0xff] %v6993_v4  ;;  %v494_v7 = vld [vmem:[#allocation7 + $0x1e8] sm:$0xff]  ;;  %v119_v8 = vld [vmem:[#allocation2 + $0x30] sm:$0xff]  ;;  %v7000_v14 = vpack.c.bf16 %v487_v2, %v483_v1 }
  0x88   :  { %397 = vmatmul.mubr.f32.gmra.mrb[4].mxu1 %v115_v9  ;;  %4695 = vmatpush1.bf16.msra.mxu0 %v6940_v10  ;;  %v6996_v9 = vpack.c.bf16 %v485_v61, %v481_v59  ;;  %v492_v11 = vld [vmem:[#allocation7 + $0x1d8] sm:$0xff]  ;;  %v489_v15 = vld [vmem:[#allocation7 + $0x1c0] sm:$0xff]  ;;  %v7004_v18 = vpack.c.bf16 %v494_v7, %v490_v5  ;;  %v491_v20 = vld [vmem:[#allocation7 + $0x1d0] sm:$0xff] }
  0x89   :  { %4727 = vmatpush1.bf16.msra.mxu1 %v6944_v13  ;;  %289 = vmatprep.mubr.f32.mxu0 %v8170_v0  ;;  %v496_v12 = vld [vmem:[#allocation7 + $0x1f8] sm:$0xff]  ;;  %8391 = vst [vmem:[#allocation41_spill] sm:$0xff] %v7000_v14  ;;  %v493_v17 = vld [vmem:[#allocation7 + $0x1e0] sm:$0xff]  ;;  %v495_v21 = vld [vmem:[#allocation7 + $0x1f0] sm:$0xff] }
  0x8a   :  { %402 = vmatprep.mubr.f32.mxu1 %v8170_v0  ;;  %4697 = vmatprep.subr.bf16.mxu0 %v6948_v16  ;;  %8390 = vst [vmem:[#allocation40_spill] sm:$0xff] %v6996_v9  ;;  %8392 = vst [vmem:[#allocation42_spill] sm:$0xff] %v7004_v18  ;;  %v562_v24 = vld [vmem:[#allocation10 + $0x8] sm:$0xff]  ;;  %v120_v27 = vld [vmem:[#allocation2 + $0x38] sm:$0xff]  ;;  %v7010_v28 = vpack.c.bf16 %v493_v17, %v489_v15  ;;  %v7014_v33 = vpack.c.bf16 %v495_v21, %v491_v20 }
  0x8b   :  { %290 = vmatmul.mubr.f32.gmra.mrb[6].mxu0 %v116_v22  ;;  %4729 = vmatprep.subr.bf16.mxu1 %v6951_v19  ;;  %v566_v25 = vld [vmem:[#allocation10 + $0x28] sm:$0xff]  ;;  %v564_v30 = vld [vmem:[#allocation10 + $0x18] sm:$0xff]  ;;  %v561_v34 = vld [vmem:[#allocation10] sm:$0xff] }
  0x8c   :  { %403 = vmatmul.mubr.f32.gmra.mrb[6].mxu1 %v116_v22  ;;  %4699 = vmatpush1.bf16.msra.mxu0 %v6954_v23  ;;  %v7007_v22 = vpack.c.bf16 %v496_v12, %v492_v11  ;;  %8394 = vst [vmem:[#allocation44_spill] sm:$0xff] %v7010_v28  ;;  %v568_v31 = vld [vmem:[#allocation10 + $0x38] sm:$0xff]  ;;  %8395 = vst [vmem:[#allocation45_spill] sm:$0xff] %v7014_v33  ;;  %v563_v37 = vld [vmem:[#allocation10 + $0x10] sm:$0xff]  ;;  %v7018_v39 = vpack.c.bf16 %v566_v25, %v562_v24 }
  0x8d   :  { %4731 = vmatpush1.bf16.msra.mxu1 %v6958_v26  ;;  %295 = vmatprep.mubr.f32.mxu0 %v8170_v0  ;;  %v567_v42 = vld [vmem:[#allocation10 + $0x30] sm:$0xff]  ;;  %v570_v43 = vld [vmem:[#allocation10 + $0x48] sm:$0xff]  ;;  %v7021_v46 = vpack.c.bf16 %v568_v31, %v564_v30  ;;  %v572_v49 = vld [vmem:[#allocation10 + $0x58] sm:$0xff] }
  0x8e   :  { %408 = vmatprep.mubr.f32.mxu1 %v8170_v0  ;;  %4701 = vmatprep.subr.bf16.mxu0 %v6962_v29  ;;  %8393 = vst [vmem:[#allocation43_spill] sm:$0xff] %v7007_v22  ;;  %8396 = vst [vmem:[#allocation46_spill] sm:$0xff] %v7018_v39  ;;  %v574_v45 = vld [vmem:[#allocation10 + $0x68] sm:$0xff]  ;;  %v576_v51 = vld [vmem:[#allocation10 + $0x78] sm:$0xff]  ;;  %v7028_v55 = vpack.c.bf16 %v567_v42, %v563_v37 }
  0x8f   :  { %296 = vmatmul.mubr.f32.gmra.mrb[8].mxu0 %v117_v35  ;;  %4733 = vmatprep.subr.bf16.mxu1 %v6965_v32  ;;  %8397 = vst [vmem:[#allocation47_spill] sm:$0xff] %v7021_v46  ;;  %v7030_v57 = vpack.c.bf16 %v574_v45, %v570_v43  ;;  %v569_v59 = vld [vmem:[#allocation10 + $0x40] sm:$0xff]  ;;  %v571_v1 = vld [vmem:[#allocation10 + $0x50] sm:$0xff]  ;;  %v7034_v2 = vpack.c.bf16 %v576_v51, %v572_v49  ;;  %v578_v7 = vld [vmem:[#allocation10 + $0x88] sm:$0xff] }
  0x90   :  { %409 = vmatmul.mubr.f32.gmra.mrb[8].mxu1 %v117_v35  ;;  %4703 = vmatpush1.bf16.msra.mxu0 %v6968_v36  ;;  %v565_v35 = vld [vmem:[#allocation10 + $0x20] sm:$0xff]  ;;  %8399 = vst [vmem:[#allocation49_spill] sm:$0xff] %v7028_v55  ;;  %v575_v5 = vld [vmem:[#allocation10 + $0x70] sm:$0xff]  ;;  %v580_v11 = vld [vmem:[#allocation10 + $0x98] sm:$0xff] }
  0x91   :  { %4735 = vmatpush1.bf16.msra.mxu1 %v6972_v40  ;;  %301 = vmatprep.mubr.f32.mxu0 %v8170_v0  ;;  %8400 = vst [vmem:[#allocation50_spill] sm:$0xff] %v7030_v57  ;;  %v573_v61 = vld [vmem:[#allocation10 + $0x60] sm:$0xff]  ;;  %8401 = vst [vmem:[#allocation51_spill] sm:$0xff] %v7034_v2  ;;  %v584_v12 = vld [vmem:[#allocation10 + $0xb8] sm:$0xff]  ;;  %v7044_v17 = vpack.c.bf16 %v575_v5, %v571_v1 }
  0x92   :  { %414 = vmatprep.mubr.f32.mxu1 %v8170_v0  ;;  %4705 = vmatprep.subr.bf16.mxu0 %v6976_v44  ;;  %v7040_v15 = vpack.c.bf16 %v573_v61, %v569_v59  ;;  %v577_v21 = vld [vmem:[#allocation10 + $0x80] sm:$0xff]  ;;  %v579_v25 = vld [vmem:[#allocation10 + $0x90] sm:$0xff]  ;;  %v586_v31 = vld [vmem:[#allocation10 + $0xc8] sm:$0xff] }
  0x93   :  { %302 = vmatmul.mubr.f32.gmra.mrb[10].mxu0 %v118_v52  ;;  %4737 = vmatprep.subr.bf16.mxu1 %v6979_v48  ;;  %8403 = vst [vmem:[#allocation53_spill] sm:$0xff] %v7044_v17  ;;  %v581_v24 = vld [vmem:[#allocation10 + $0xa0] sm:$0xff]  ;;  %v583_v30 = vld [vmem:[#allocation10 + $0xb0] sm:$0xff]  ;;  %v592_v37 = vld [vmem:[#allocation10 + $0xf8] sm:$0xff] }
  0x94   :  { %415 = vmatmul.mubr.f32.gmra.mrb[10].mxu1 %v118_v52  ;;  %4707 = vmatpush1.bf16.msra.mxu0 %v6982_v54  ;;  %v7024_v52 = vpack.c.bf16 %v565_v35, %v561_v34  ;;  %8402 = vst [vmem:[#allocation52_spill] sm:$0xff] %v7040_v15  ;;  %v590_v34 = vld [vmem:[#allocation10 + $0xe8] sm:$0xff]  ;;  %v588_v35 = vld [vmem:[#allocation10 + $0xd8] sm:$0xff]  ;;  %v7054_v42 = vpack.c.bf16 %v581_v24, %v577_v21  ;;  %v585_v49 = vld [vmem:[#allocation10 + $0xc0] sm:$0xff] }
  0x95   :  { %4739 = vmatpush1.bf16.msra.mxu1 %v6986_v58  ;;  %307 = vmatprep.mubr.f32.mxu0 %v8170_v0  ;;  %v7058_v43 = vpack.c.bf16 %v583_v30, %v579_v25  ;;  %v7060_v45 = vpack.c.bf16 %v590_v34, %v586_v31  ;;  %v589_v51 = vld [vmem:[#allocation10 + $0xe0] sm:$0xff]  ;;  %v587_v59 = vld [vmem:[#allocation10 + $0xd0] sm:$0xff]  ;;  %v7063_v61 = vpack.c.bf16 %v592_v37, %v588_v35  ;;  %v594_v5 = vld [vmem:[#allocation10 + $0x108] sm:$0xff] }
  0x96   :  { %420 = vmatprep.mubr.f32.mxu1 %v8170_v0  ;;  %4709 = vmatprep.subr.bf16.mxu0 %v6990_v62  ;;  %8398 = vst [vmem:[#allocation48_spill] sm:$0xff] %v7024_v52  ;;  %8406 = vst [vmem:[#allocation56_spill] sm:$0xff] %v7054_v42  ;;  %v591_v1 = vld [vmem:[#allocation10 + $0xf0] sm:$0xff]  ;;  %v593_v25 = vld [vmem:[#allocation10 + $0x100] sm:$0xff] }
  0x97   :  { %308 = vmatmul.mubr.f32.gmra.mrb[12].mxu0 %v119_v8  ;;  %4741 = vmatprep.subr.bf16.mxu1 %v6993_v4  ;;  %8407 = vst [vmem:[#allocation57_spill] sm:$0xff] %v7058_v43  ;;  %8408 = vst [vmem:[#allocation58_spill] sm:$0xff] %v7060_v45  ;;  %v7070_v21 = vpack.c.bf16 %v591_v1, %v587_v59  ;;  %v597_v30 = vld [vmem:[#allocation10 + $0x120] sm:$0xff]  ;;  %v595_v34 = vld [vmem:[#allocation10 + $0x110] sm:$0xff] }
  0x98   :  { %421 = vmatmul.mubr.f32.gmra.mrb[12].mxu1 %v119_v8  ;;  %4711 = vmatpush1.bf16.msra.mxu0 %v6996_v9  ;;  %v582_v8 = vld [vmem:[#allocation10 + $0xa8] sm:$0xff]  ;;  %8409 = vst [vmem:[#allocation59_spill] sm:$0xff] %v7063_v61  ;;  %v599_v35 = vld [vmem:[#allocation10 + $0x130] sm:$0xff]  ;;  %v7078_v37 = vpack.c.bf16 %v597_v30, %v593_v25  ;;  %v604_v1 = vld [vmem:[#allocation10 + $0x158] sm:$0xff] }
  0x99   :  { %4743 = vmatpush1.bf16.msra.mxu1 %v7000_v14  ;;  %313 = vmatprep.mubr.f32.mxu0 %v8170_v0  ;;  %v7046_v20 = vpack.c.bf16 %v582_v8, %v578_v7  ;;  %v598_v7 = vld [vmem:[#allocation10 + $0x128] sm:$0xff]  ;;  %v596_v8 = vld [vmem:[#allocation10 + $0x118] sm:$0xff]  ;;  %8411 = vst [vmem:[#allocation61_spill] sm:$0xff] %v7070_v21 }
  0x9a   :  { %426 = vmatprep.mubr.f32.mxu1 %v8170_v0  ;;  %4713 = vmatprep.subr.bf16.mxu0 %v7004_v18  ;;  %v7072_v24 = vpack.c.bf16 %v598_v7, %v594_v5  ;;  %8414 = vst [vmem:[#allocation64_spill] sm:$0xff] %v7078_v37  ;;  %v606_v59 = vld [vmem:[#allocation10 + $0x168] sm:$0xff]  ;;  %v608_v7 = vld [vmem:[#allocation10 + $0x178] sm:$0xff] }
  0x9b   :  { %314 = vmatmul.mubr.f32.gmra.mrb[14].mxu0 %v120_v27  ;;  %4745 = vmatprep.subr.bf16.mxu1 %v7007_v22  ;;  %8404 = vst [vmem:[#allocation54_spill] sm:$0xff] %v7046_v20  ;;  %v7089_v25 = vpack.c.bf16 %v608_v7, %v604_v1  ;;  %v616_v1 = vld [vmem:[#allocation10 + $0x1b8] sm:$0xff]  ;;  %v609_v7 = vld [vmem:[#allocation10 + $0x180] sm:$0xff] }
  0x9c   :  { %427 = vmatmul.mubr.f32.gmra.mrb[14].mxu1 %v120_v27  ;;  %4715 = vmatpush1.bf16.msra.mxu0 %v7010_v28  ;;  %v7049_v27 = vpack.c.bf16 %v584_v12, %v580_v11  ;;  %v600_v11 = vld [vmem:[#allocation10 + $0x138] sm:$0xff]  ;;  %v7066_v12 = vpack.c.bf16 %v589_v51, %v585_v49  ;;  %8412 = vst [vmem:[#allocation62_spill] sm:$0xff] %v7072_v24  ;;  %v602_v51 = vld [vmem:[#allocation10 + $0x148] sm:$0xff] }
  0x9d   :  { %4747 = vmatpush1.bf16.msra.mxu1 %v7014_v33  ;;  %711 = vmatprep.mubr.f32.mxu0 %v8170_v0  ;;  %v7075_v31 = vpack.c.bf16 %v600_v11, %v596_v8  ;;  %v7082_v49 = vpack.c.bf16 %v599_v35, %v595_v34  ;;  %v7087_v5 = vpack.c.bf16 %v606_v59, %v602_v51  ;;  %v601_v8 = vld [vmem:[#allocation10 + $0x140] sm:$0xff]  ;;  %v603_v34 = vld [vmem:[#allocation10 + $0x150] sm:$0xff]  ;;  %v614_v51 = vld [vmem:[#allocation10 + $0x1a8] sm:$0xff] }
  0x9e   :  { %782 = vmatprep.mubr.f32.mxu1 %v8170_v0  ;;  %4749 = vmatprep.subr.bf16.mxu0 %v7018_v39  ;;  %8405 = vst [vmem:[#allocation55_spill] sm:$0xff] %v7049_v27  ;;  %8410 = vst [vmem:[#allocation60_spill] sm:$0xff] %v7066_v12  ;;  %v605_v11 = vld [vmem:[#allocation10 + $0x160] sm:$0xff]  ;;  %v607_v35 = vld [vmem:[#allocation10 + $0x170] sm:$0xff] }
  0x9f   :  { %712 = vmatmul.mubr.f32.vlgmr.msra.gmra.mrb[0].mxu0 %v8170_v0  ;;  %4781 = vmatprep.subr.bf16.mxu1 %v7021_v46  ;;  %8413 = vst [vmem:[#allocation63_spill] sm:$0xff] %v7075_v31  ;;  %8415 = vst [vmem:[#allocation65_spill] sm:$0xff] %v7082_v49  ;;  %v7091_v30 = vpack.c.bf16 %v605_v11, %v601_v8  ;;  %v612_v59 = vld [vmem:[#allocation10 + $0x198] sm:$0xff]  ;;  %v613_v8 = vld [vmem:[#allocation10 + $0x1a0] sm:$0xff] }
  0xa0   :  { %783 = vmatmul.mubr.f32.vlgmr.msra.gmra.mrb[0].mxu1 %v8170_v0  ;;  %4751 = vmatpush1.bf16.msra.mxu0 %v7024_v52  ;;  %8416 = vst [vmem:[#allocation66_spill] sm:$0xff] %v7087_v5  ;;  %8417 = vst [vmem:[#allocation67_spill] sm:$0xff] %v7089_v25  ;;  %v7101_v11 = vpack.c.bf16 %v616_v1, %v612_v59  ;;  %v624_v59 = vld [vmem:[#allocation10 + $0x1f8] sm:$0xff]  ;;  %v617_v1 = vld [vmem:[#allocation10 + $0x1c0] sm:$0xff] }
  0xa1   :  { %4783 = vmatpush1.bf16.msra.mxu1 %v7028_v55  ;;  %4753 = vmatprep.subr.bf16.mxu0 %v7030_v57  ;;  %8418 = vst [vmem:[#allocation68_spill] sm:$0xff] %v7091_v30 }
  0xa2   :  { %4785 = vmatprep.subr.bf16.mxu1 %v7034_v2  ;;  %881 = vmatprep.mubr.f32.mxu0 %v8170_v0  ;;  %8421 = vst [vmem:[#allocation71_spill] sm:$0xff] %v7101_v11 }
  0xa3   :  { %952 = vmatprep.mubr.f32.mxu1 %v8170_v0  ;;  %v7094_v0 = vpack.c.bf16 %v607_v35, %v603_v34  ;;  %v611_v34 = vld [vmem:[#allocation10 + $0x190] sm:$0xff] }
  0xa4   :  { %4755 = vmatpush1.bf16.msra.mxu0 %v7040_v15  ;;  %v615_v35 = vld [vmem:[#allocation10 + $0x1b0] sm:$0xff] }
  0xa5   :  { %4787 = vmatpush1.bf16.msra.mxu1 %v7044_v17  ;;  %4757 = vmatprep.subr.bf16.mxu0 %v7046_v20  ;;  %8419 = vst [vmem:[#allocation69_spill] sm:$0xff] %v7094_v0 }
  0xa6   :  { %4789 = vmatprep.subr.bf16.mxu1 %v7049_v27 }
  0xa8   :  { %4759 = vmatpush1.bf16.msra.mxu0 %v7054_v42 }
  0xa9   :  { %4791 = vmatpush1.bf16.msra.mxu1 %v7058_v43  ;;  %4761 = vmatprep.subr.bf16.mxu0 %v7060_v45 }
  0xaa   :  { %4793 = vmatprep.subr.bf16.mxu1 %v7063_v61 }
  0xac   :  { %4763 = vmatpush1.bf16.msra.mxu0 %v7066_v12  ;;  %v552_v12 = vld [vmem:[#allocation8 + $0x1b8] sm:$0xff] }
  0xad   :  { %4795 = vmatpush1.bf16.msra.mxu1 %v7070_v21  ;;  %4765 = vmatprep.subr.bf16.mxu0 %v7072_v24  ;;  %v550_v21 = vld [vmem:[#allocation8 + $0x1a8] sm:$0xff] }
  0xae   :  { %4797 = vmatprep.subr.bf16.mxu1 %v7075_v31  ;;  %v7103_v31 = vpack.c.bf16 %v613_v8, %v609_v7  ;;  %v621_v7 = vld [vmem:[#allocation10 + $0x1e0] sm:$0xff] }
  0xb0   :  { %4767 = vmatpush1.bf16.msra.mxu0 %v7078_v37  ;;  %8422 = vst [vmem:[#allocation72_spill] sm:$0xff] %v7103_v31 }
  0xb1   :  { %4799 = vmatpush1.bf16.msra.mxu1 %v7082_v49  ;;  %4769 = vmatprep.subr.bf16.mxu0 %v7087_v5  ;;  %v610_v49 = vld [vmem:[#allocation10 + $0x188] sm:$0xff]  ;;  %v7115_v5 = vpack.c.bf16 %v621_v7, %v617_v1  ;;  %v501_v1 = vld [vmem:[#allocation8 + $0x20] sm:$0xff] }
  0xb2   :  { %4801 = vmatprep.subr.bf16.mxu1 %v7089_v25  ;;  %v7099_v37 = vpack.c.bf16 %v614_v51, %v610_v49  ;;  %v7106_v25 = vpack.c.bf16 %v615_v35, %v611_v34  ;;  %v622_v49 = vld [vmem:[#allocation10 + $0x1e8] sm:$0xff]  ;;  %v620_v51 = vld [vmem:[#allocation10 + $0x1d8] sm:$0xff]  ;;  %v619_v34 = vld [vmem:[#allocation10 + $0x1d0] sm:$0xff] }
  0xb3   :  { %v7113_v8 = vpack.c.bf16 %v624_v59, %v620_v51  ;;  %8426 = vst [vmem:[#allocation76_spill] sm:$0xff] %v7115_v5  ;;  %v623_v35 = vld [vmem:[#allocation10 + $0x1f0] sm:$0xff]  ;;  %v504_v51 = vld [vmem:[#allocation8 + $0x38] sm:$0xff]  ;;  %v497_v59 = vld [vmem:[#allocation8] sm:$0xff] }
  0xb4   :  { %4771 = vmatpush1.bf16.msra.mxu0 %v7091_v30  ;;  %8420 = vst [vmem:[#allocation70_spill] sm:$0xff] %v7099_v37  ;;  %8423 = vst [vmem:[#allocation73_spill] sm:$0xff] %v7106_v25 }
  0xb5   :  { %4803 = vmatpush1.bf16.msra.mxu1 %v7094_v0  ;;  %4773 = vmatprep.subr.bf16.mxu0 %v7099_v37  ;;  %v618_v0 = vld [vmem:[#allocation10 + $0x1c8] sm:$0xff]  ;;  %8425 = vst [vmem:[#allocation75_spill] sm:$0xff] %v7113_v8  ;;  %v7127_v37 = vpack.c.bf16 %v501_v1, %v497_v59  ;;  %v505_v59 = vld [vmem:[#allocation8 + $0x40] sm:$0xff] }
  0xb6   :  { %4805 = vmatprep.subr.bf16.mxu1 %v7101_v11  ;;  %v7111_v30 = vpack.c.bf16 %v622_v49, %v618_v0  ;;  %v7118_v11 = vpack.c.bf16 %v623_v35, %v619_v34  ;;  %v502_v0 = vld [vmem:[#allocation8 + $0x28] sm:$0xff]  ;;  %v500_v49 = vld [vmem:[#allocation8 + $0x18] sm:$0xff]  ;;  %v499_v34 = vld [vmem:[#allocation8 + $0x10] sm:$0xff] }
  0xb7   :  { %v7125_v7 = vpack.c.bf16 %v504_v51, %v500_v49  ;;  %8430 = vst [vmem:[#allocation80_spill] sm:$0xff] %v7127_v37  ;;  %v503_v35 = vld [vmem:[#allocation8 + $0x30] sm:$0xff]  ;;  %v512_v51 = vld [vmem:[#allocation8 + $0x78] sm:$0xff]  ;;  %v509_v1 = vld [vmem:[#allocation8 + $0x60] sm:$0xff] }
  0xb8   :  { %4775 = vmatpush1.bf16.msra.mxu0 %v7103_v31  ;;  %8424 = vst [vmem:[#allocation74_spill] sm:$0xff] %v7111_v30  ;;  %8427 = vst [vmem:[#allocation77_spill] sm:$0xff] %v7118_v11 }
  0xb9   :  { %4807 = vmatpush1.bf16.msra.mxu1 %v7106_v25  ;;  %4777 = vmatprep.subr.bf16.mxu0 %v7111_v30  ;;  %v498_v25 = vld [vmem:[#allocation8 + $0x8] sm:$0xff]  ;;  %8429 = vst [vmem:[#allocation79_spill] sm:$0xff] %v7125_v7 }
  0xba   :  { %4809 = vmatprep.subr.bf16.mxu1 %v7113_v8  ;;  %v7123_v31 = vpack.c.bf16 %v502_v0, %v498_v25  ;;  %v8431_v8 = vmov 0.0   ;;  %v506_v25 = vld [vmem:[#allocation8 + $0x48] sm:$0xff] }
  0xbb   :  { %v510_v0 = vld [vmem:[#allocation8 + $0x68] sm:$0xff] }
  0xbc   :  { %4779 = vmatpush1.bf16.msra.mxu0 %v7115_v5  ;;  %8428 = vst [vmem:[#allocation78_spill] sm:$0xff] %v7123_v31  ;;  %v7131_v5 = vpack.c.bf16 %v503_v35, %v499_v34  ;;  %v7137_v49 = vpack.c.bf16 %v510_v0, %v506_v25  ;;  %v7141_v34 = vpack.c.bf16 %v509_v1, %v505_v59  ;;  %v507_v35 = vld [vmem:[#allocation8 + $0x50] sm:$0xff]  ;;  %v514_v25 = vld [vmem:[#allocation8 + $0x88] sm:$0xff]  ;;  %v513_v59 = vld [vmem:[#allocation8 + $0x80] sm:$0xff] }
  0xbd   :  { %4811 = vmatpush1.bf16.msra.mxu1 %v7118_v11  ;;  %4813 = vmatprep.subr.bf16.mxu0 %v7123_v31  ;;  %v508_v11 = vld [vmem:[#allocation8 + $0x58] sm:$0xff]  ;;  %v518_v0 = vld [vmem:[#allocation8 + $0xa8] sm:$0xff]  ;;  %v517_v1 = vld [vmem:[#allocation8 + $0xa0] sm:$0xff] }
  0xbe   :  { %8432 = vst [vmem:[#allocation81_spill] sm:$0xff] %v7131_v5  ;;  %4845 = vmatprep.subr.bf16.mxu1 %v7125_v7  ;;  %8433 = vst [vmem:[#allocation82_spill] sm:$0xff] %v7137_v49  ;;  %v7139_v31 = vpack.c.bf16 %v512_v51, %v508_v11  ;;  %v511_v7 = vld [vmem:[#allocation8 + $0x70] sm:$0xff]  ;;  %v7151_v11 = vpack.c.bf16 %v518_v0, %v514_v25  ;;  %v520_v51 = vld [vmem:[#allocation8 + $0xb8] sm:$0xff]  ;;  %v7155_v24 = vpack.c.bf16 %v517_v1, %v513_v59 }
  0xbf   :  { %882 = vmatmul.mubr.f32.vlgmr.msra.gmra.mrb[16].mxu0 %v8431_v8  ;;  %8435 = vst [vmem:[#allocation84_spill] sm:$0xff] %v7141_v34  ;;  %v521_v0 = vld [vmem:[#allocation8 + $0xc0] sm:$0xff] }
  0xc0   :  { %953 = vmatmul.mubr.f32.vlgmr.msra.gmra.mrb[16].mxu1 %v8431_v8  ;;  %4815 = vmatpush1.bf16.msra.mxu0 %v7127_v37  ;;  %8434 = vst [vmem:[#allocation83_spill] sm:$0xff] %v7139_v31  ;;  %v7146_v37 = vpack.c.bf16 %v511_v7, %v507_v35  ;;  %8437 = vst [vmem:[#allocation86_spill] sm:$0xff] %v7151_v11  ;;  %v515_v7 = vld [vmem:[#allocation8 + $0x90] sm:$0xff] }
  0xc1   :  { %4847 = vmatpush1.bf16.msra.mxu1 %v7131_v5  ;;  %1023 = vmatprep.mubr.f32.mxu0 %v8431_v8  ;;  %v516_v5 = vld [vmem:[#allocation8 + $0x98] sm:$0xff]  ;;  %8439 = vst [vmem:[#allocation88_spill] sm:$0xff] %v7155_v24  ;;  %v519_v35 = vld [vmem:[#allocation8 + $0xb0] sm:$0xff] }
  0xc2   :  { %1094 = vmatprep.mubr.f32.mxu1 %v8431_v8  ;;  %4817 = vmatprep.subr.bf16.mxu0 %v7137_v49  ;;  %8436 = vst [vmem:[#allocation85_spill] sm:$0xff] %v7146_v37  ;;  %v7153_v30 = vpack.c.bf16 %v520_v51, %v516_v5  ;;  %v526_v49 = vld [vmem:[#allocation8 + $0xe8] sm:$0xff]  ;;  %v528_v5 = vld [vmem:[#allocation8 + $0xf8] sm:$0xff]  ;;  %v525_v51 = vld [vmem:[#allocation8 + $0xe0] sm:$0xff] }
  0xc3   :  { %4849 = vmatprep.subr.bf16.mxu1 %v7139_v31  ;;  %v7158_v31 = vpack.c.bf16 %v519_v35, %v515_v7  ;;  %v7167_v1 = vpack.c.bf16 %v525_v51, %v521_v0  ;;  %v523_v7 = vld [vmem:[#allocation8 + $0xd0] sm:$0xff] }
  0xc4   :  { %4819 = vmatpush1.bf16.msra.mxu0 %v7141_v34  ;;  %8438 = vst [vmem:[#allocation87_spill] sm:$0xff] %v7153_v30  ;;  %v522_v34 = vld [vmem:[#allocation8 + $0xc8] sm:$0xff]  ;;  %v527_v35 = vld [vmem:[#allocation8 + $0xf0] sm:$0xff] }
  0xc5   :  { %4851 = vmatpush1.bf16.msra.mxu1 %v7146_v37  ;;  %4821 = vmatprep.subr.bf16.mxu0 %v7151_v11  ;;  %8440 = vst [vmem:[#allocation89_spill] sm:$0xff] %v7158_v31  ;;  %v524_v37 = vld [vmem:[#allocation8 + $0xd8] sm:$0xff]  ;;  %v7163_v25 = vpack.c.bf16 %v526_v49, %v522_v34  ;;  %8443 = vst [vmem:[#allocation92_spill] sm:$0xff] %v7167_v1  ;;  %v534_v11 = vld [vmem:[#allocation8 + $0x128] sm:$0xff] }
  0xc6   :  { %4853 = vmatprep.subr.bf16.mxu1 %v7153_v30  ;;  %v7165_v59 = vpack.c.bf16 %v528_v5, %v524_v37  ;;  %v7170_v30 = vpack.c.bf16 %v527_v35, %v523_v7  ;;  %v536_v37 = vld [vmem:[#allocation8 + $0x138] sm:$0xff]  ;;  %v529_v34 = vld [vmem:[#allocation8 + $0x100] sm:$0xff]  ;;  %v531_v7 = vld [vmem:[#allocation8 + $0x110] sm:$0xff] }
  0xc7   :  { %8441 = vst [vmem:[#allocation90_spill] sm:$0xff] %v7163_v25  ;;  %v533_v5 = vld [vmem:[#allocation8 + $0x120] sm:$0xff]  ;;  %v535_v35 = vld [vmem:[#allocation8 + $0x130] sm:$0xff] }
  0xc8   :  { %4823 = vmatpush1.bf16.msra.mxu0 %v7155_v24  ;;  %8442 = vst [vmem:[#allocation91_spill] sm:$0xff] %v7165_v59  ;;  %8444 = vst [vmem:[#allocation93_spill] sm:$0xff] %v7170_v30  ;;  %v530_v24 = vld [vmem:[#allocation8 + $0x108] sm:$0xff]  ;;  %v7179_v51 = vpack.c.bf16 %v533_v5, %v529_v34 }
  0xc9   :  { %4855 = vmatpush1.bf16.msra.mxu1 %v7158_v31  ;;  %4825 = vmatprep.subr.bf16.mxu0 %v7163_v25  ;;  %v532_v31 = vld [vmem:[#allocation8 + $0x118] sm:$0xff]  ;;  %v7175_v49 = vpack.c.bf16 %v534_v11, %v530_v24  ;;  %v542_v25 = vld [vmem:[#allocation8 + $0x168] sm:$0xff]  ;;  %v537_v11 = vld [vmem:[#allocation8 + $0x140] sm:$0xff] }
  0xca   :  { %4857 = vmatprep.subr.bf16.mxu1 %v7165_v59  ;;  %v7177_v0 = vpack.c.bf16 %v536_v37, %v532_v31  ;;  %8447 = vst [vmem:[#allocation96_spill] sm:$0xff] %v7179_v51  ;;  %v7182_v59 = vpack.c.bf16 %v535_v35, %v531_v7  ;;  %v544_v31 = vld [vmem:[#allocation8 + $0x178] sm:$0xff]  ;;  %v541_v37 = vld [vmem:[#allocation8 + $0x160] sm:$0xff]  ;;  %v539_v7 = vld [vmem:[#allocation8 + $0x150] sm:$0xff] }
  0xcb   :  { %8445 = vst [vmem:[#allocation94_spill] sm:$0xff] %v7175_v49  ;;  %v7191_v5 = vpack.c.bf16 %v541_v37, %v537_v11  ;;  %v543_v35 = vld [vmem:[#allocation8 + $0x170] sm:$0xff] }
  0xcc   :  { %4827 = vmatpush1.bf16.msra.mxu0 %v7167_v1  ;;  %8446 = vst [vmem:[#allocation95_spill] sm:$0xff] %v7177_v0  ;;  %8448 = vst [vmem:[#allocation97_spill] sm:$0xff] %v7182_v59  ;;  %v538_v1 = vld [vmem:[#allocation8 + $0x148] sm:$0xff]  ;;  %v547_v11 = vld [vmem:[#allocation8 + $0x190] sm:$0xff] }
  0xcd   :  { %4859 = vmatpush1.bf16.msra.mxu1 %v7170_v30  ;;  %4829 = vmatprep.subr.bf16.mxu0 %v7175_v49  ;;  %v540_v30 = vld [vmem:[#allocation8 + $0x158] sm:$0xff]  ;;  %v7187_v24 = vpack.c.bf16 %v542_v25, %v538_v1  ;;  %8451 = vst [vmem:[#allocation100_spill] sm:$0xff] %v7191_v5  ;;  %v546_v49 = vld [vmem:[#allocation8 + $0x188] sm:$0xff] }
  0xce   :  { %4861 = vmatprep.subr.bf16.mxu1 %v7177_v0  ;;  %v7189_v34 = vpack.c.bf16 %v544_v31, %v540_v30  ;;  %v7194_v0 = vpack.c.bf16 %v543_v35, %v539_v7  ;;  %v7197_v25 = vpack.c.bf16 %v550_v21, %v546_v49  ;;  %v545_v30 = vld [vmem:[#allocation8 + $0x180] sm:$0xff]  ;;  %v551_v7 = vld [vmem:[#allocation8 + $0x1b0] sm:$0xff]  ;;  %v554_v35 = vld [vmem:[#allocation8 + $0x1c8] sm:$0xff] }
  0xcf   :  { %8449 = vst [vmem:[#allocation98_spill] sm:$0xff] %v7187_v24  ;;  %v549_v31 = vld [vmem:[#allocation8 + $0x1a0] sm:$0xff]  ;;  %v7207_v21 = vpack.c.bf16 %v551_v7, %v547_v11  ;;  %v556_v49 = vld [vmem:[#allocation8 + $0x1d8] sm:$0xff] }
  0xd0   :  { %4831 = vmatpush1.bf16.msra.mxu0 %v7179_v51  ;;  %8450 = vst [vmem:[#allocation99_spill] sm:$0xff] %v7189_v34  ;;  %8452 = vst [vmem:[#allocation101_spill] sm:$0xff] %v7194_v0  ;;  %v548_v51 = vld [vmem:[#allocation8 + $0x198] sm:$0xff]  ;;  %v7203_v37 = vpack.c.bf16 %v549_v31, %v545_v30  ;;  %v559_v30 = vld [vmem:[#allocation8 + $0x1f0] sm:$0xff] }
  0xd1   :  { %4863 = vmatpush1.bf16.msra.mxu1 %v7182_v59  ;;  %4833 = vmatprep.subr.bf16.mxu0 %v7187_v24  ;;  %8453 = vst [vmem:[#allocation102_spill] sm:$0xff] %v7197_v25  ;;  %v7199_v1 = vpack.c.bf16 %v552_v12, %v548_v51  ;;  %v558_v24 = vld [vmem:[#allocation8 + $0x1e8] sm:$0xff]  ;;  %8456 = vst [vmem:[#allocation105_spill] sm:$0xff] %v7207_v21  ;;  %v560_v51 = vld [vmem:[#allocation8 + $0x1f8] sm:$0xff] }
  0xd2   :  { %4865 = vmatprep.subr.bf16.mxu1 %v7189_v34  ;;  %8455 = vst [vmem:[#allocation104_spill] sm:$0xff] %v7203_v37  ;;  %v7209_v12 = vpack.c.bf16 %v558_v24, %v554_v35  ;;  %v553_v34 = vld [vmem:[#allocation8 + $0x1c0] sm:$0xff]  ;;  %v7211_v59 = vpack.c.bf16 %v560_v51, %v556_v49  ;;  %v187_v24 = vlaneseq }
  0xd3   :  { %8454 = vst [vmem:[#allocation103_spill] sm:$0xff] %v7199_v1 }
  0xd4   :  { %4835 = vmatpush1.bf16.msra.mxu0 %v7191_v5  ;;  %8457 = vst [vmem:[#allocation106_spill] sm:$0xff] %v7209_v12  ;;  %8458 = vst [vmem:[#allocation107_spill] sm:$0xff] %v7211_v59  ;;  %v557_v5 = vld [vmem:[#allocation8 + $0x1e0] sm:$0xff]  ;;  %v7225_v11 = vshrl.u32 %v187_v24, 7 }
  0xd5   :  { %4867 = vmatpush1.bf16.msra.mxu1 %v7194_v0  ;;  %4837 = vmatprep.subr.bf16.mxu0 %v7197_v25  ;;  %v555_v0 = vld [vmem:[#allocation8 + $0x1d0] sm:$0xff]  ;;  %v7215_v31 = vpack.c.bf16 %v557_v5, %v553_v34 }
  0xd6   :  { %4869 = vmatprep.subr.bf16.mxu1 %v7199_v1  ;;  %v7217_v25 = vpack.c.bf16 %v559_v30, %v555_v0  ;;  %v8268_v34 = vsub.s32 0, %v7225_v11  ;;  %v185_v0 = vld [vmem:[%s8162_s2] sm:$0xf]  ;;  %v8269_v5 = vsub.s32 1, %v7225_v11  ;;  %v8276_v51 = vsub.s32 3, %v7225_v11 }
  0xd7   :  { %8459 = vst [vmem:[#allocation108_spill] sm:$0xff] %v7215_v31 }
  0xd8   :  { %4839 = vmatpush1.bf16.msra.mxu0 %v7203_v37  ;;  %8460 = vst [vmem:[#allocation109_spill] sm:$0xff] %v7217_v25  ;;  %v7234_v7 = vrot.slane %v185_v0, %v8268_v34  ;;  %v7238_v35 = vrot.slane %v185_v0, %v8269_v5  ;;  %v7245_v34 = vrot.slane %v185_v0, %v8276_v51  ;;  %v8285_v5 = vsub.s32 2, %v7225_v11 }
  0xd9   :  { %4871 = vmatpush1.bf16.msra.mxu1 %v7207_v21  ;;  %4841 = vmatprep.subr.bf16.mxu0 %v7209_v12 }
  0xda   :  { %4873 = vmatprep.subr.bf16.mxu1 %v7211_v59  ;;  %8461 = vst [vmem:[#allocation110_spill] sm:$0xff] %v7234_v7  ;;  %8462 = vst [vmem:[#allocation111_spill] sm:$0xff] %v7238_v35 }
  0xdb   :  { %8463 = vst [vmem:[#allocation112_spill] sm:$0xff] %v7245_v34 }
  0xdc   :  { %4843 = vmatpush1.bf16.msra.mxu0 %v7215_v31 }
  0xdd   :  { %4875 = vmatpush1.bf16.msra.mxu1 %v7217_v25  ;;  %4877 = vmatprep.subr.bf16.mxu0 %v6911_v38 }
  0xde   :  { %4909 = vmatprep.subr.bf16.mxu1 %v6913_v41 }
 0x172   :  { %v713_v49 = vpop.f32.mrb[0].mxu0 }
 0x173   :  { %v6220_v30 = vadd.f32 %v713_v49, %v7234_v7  ;;  %v784_v24 = vpop.f32.mrb[0].mxu1  ;;  %v715_v41 = vpop.f32.mrb[1].mxu0  ;;  %v7251_v49 = vrot.slane %v185_v0, %v8285_v5  ;;  %v8479_v5 = vld [vmem:[#allocation75_spill] sm:$0xff] }
 0x174   :  { %v6221_v38 = vadd.f32 %v715_v41, %v7238_v35  ;;  %v786_v25 = vpop.f32.mrb[1].mxu1 }
 0x175   :  { %v4572_v31 = vmul.f32 -1.442695, %v6220_v30  ;;  %v6237_v12 = vadd.f32 %v786_v25, %v7245_v34  ;;  %v6236_v41 = vadd.f32 %v784_v24, %v7251_v49 }
 0x176   :  { %v4573_v59 = vmul.f32 -1.442695, %v6221_v38 }
 0x177   :  { %6329 = vpow2.f32 %v4572_v31  ;;  %v4574_v21 = vmul.f32 -1.442695, %v6237_v12 }
 0x178   :  { %6331 = vpow2.f32 %v4573_v59 }
 0x179   :  { %6333 = vpow2.f32 %v4574_v21  ;;  %v8465_v21 = vld [vmem:[#allocation61_spill] sm:$0xff] }
 0x17a   :  { %6335 = vtanh.f32 %v6236_v41  ;;  %v8470_v41 = vld [vmem:[#allocation66_spill] sm:$0xff] }
 0x181   :  { %v6330_v37 = vpop.eup %6329 }
 0x182   :  { %v6332_v30 = vpop.eup %6331  ;;  %v796_v38 = vadd.f32 1.0, %v6330_v37 }
 0x183   :  { %v802_v51 = vadd.f32 1.0, %v6332_v30  ;;  %v6334_v31 = vpop.eup %6333  ;;  %v8471_v30 = vld [vmem:[#allocation67_spill] sm:$0xff] }
 0x184   :  { %6337 = vrcp.f32 %v796_v38  ;;  %v6336_v1 = vpop.eup %6335  ;;  %v809_v34 = vadd.f32 1.0, %v6334_v31  ;;  %v8472_v38 = vld [vmem:[#allocation68_spill] sm:$0xff]  ;;  %v8473_v31 = vld [vmem:[#allocation69_spill] sm:$0xff] }
 0x185   :  { %6339 = vrcp.f32 %v802_v51  ;;  %v8469_v51 = vld [vmem:[#allocation65_spill] sm:$0xff] }
 0x186   :  { %6341 = vrcp.f32 %v809_v34  ;;  %v8466_v34 = vld [vmem:[#allocation62_spill] sm:$0xff] }
 0x18e   :  { %v6338_v59 = vpop.eup %6337 }
 0x18f   :  { %v6340_v35 = vpop.eup %6339  ;;  %v813_v25 = vmul.f32 %v6338_v59, %v6336_v1  ;;  %v8464_v1 = vld [vmem:[#allocation60_spill] sm:$0xff]  ;;  %v8474_v59 = vld [vmem:[#allocation70_spill] sm:$0xff] }
 0x190   :  { %v812_v7 = vmul.f32 0.0, %v6340_v35  ;;  %v6342_v12 = vpop.eup %6341  ;;  %v8468_v35 = vld [vmem:[#allocation64_spill] sm:$0xff] }
 0x192   :  { %v7254_v0 = vadd.f32 %v813_v25, %v812_v7  ;;  %v8467_v7 = vld [vmem:[#allocation63_spill] sm:$0xff] }
 0x193   :  { %v8475_v25 = vld [vmem:[#allocation71_spill] sm:$0xff] }
 0x194   :  { %6343 = vtanh.f32 %v7254_v0 }
 0x19e   :  { %v6344_v24 = vpop.eup %6343 }
 0x19f   :  { %v816_v37 = vmul.f32 %v6344_v24, %v6342_v12  ;;  %v8476_v12 = vld [vmem:[#allocation72_spill] sm:$0xff]  ;;  %v8477_v24 = vld [vmem:[#allocation73_spill] sm:$0xff] }
 0x1a1   :  { %1024 = vmatmul.mubr.f32.vlgmr.msra.gmra.mrb[16].mxu0 %v816_v37  ;;  %1095 = vmatmul.mubr.f32.vlgmr.msra.gmra.mrb[16].mxu1 %v816_v37 }
 0x1a2   :  { %4879 = vmatpush1.bf16.msra.mxu0 %v6915_v47  ;;  %4911 = vmatpush1.bf16.msra.mxu1 %v6918_v50 }
 0x1a3   :  { %4881 = vmatprep.subr.bf16.mxu0 %v6921_v53  ;;  %4913 = vmatprep.subr.bf16.mxu1 %v6923_v56 }
 0x1a4   :  { %1194 = vmatprep.mubr.f32.mxu0 %v8431_v8  ;;  %1265 = vmatprep.mubr.f32.mxu1 %v8431_v8 }
 0x1a6   :  { %4883 = vmatpush1.bf16.msra.mxu0 %v6926_v60  ;;  %4915 = vmatpush1.bf16.msra.mxu1 %v6930_v63 }
 0x1a7   :  { %4885 = vmatprep.subr.bf16.mxu0 %v6934_v3  ;;  %4917 = vmatprep.subr.bf16.mxu1 %v6937_v6 }
 0x1aa   :  { %4887 = vmatpush1.bf16.msra.mxu0 %v6940_v10  ;;  %4919 = vmatpush1.bf16.msra.mxu1 %v6944_v13 }
 0x1ab   :  { %4889 = vmatprep.subr.bf16.mxu0 %v6948_v16  ;;  %4921 = vmatprep.subr.bf16.mxu1 %v6951_v19 }
 0x1ae   :  { %4891 = vmatpush1.bf16.msra.mxu0 %v6954_v23  ;;  %4923 = vmatpush1.bf16.msra.mxu1 %v6958_v26 }
 0x1af   :  { %4893 = vmatprep.subr.bf16.mxu0 %v6962_v29  ;;  %4925 = vmatprep.subr.bf16.mxu1 %v6965_v32 }
 0x1b2   :  { %4895 = vmatpush1.bf16.msra.mxu0 %v6968_v36  ;;  %4927 = vmatpush1.bf16.msra.mxu1 %v6972_v40 }
 0x1b3   :  { %4897 = vmatprep.subr.bf16.mxu0 %v6976_v44  ;;  %4929 = vmatprep.subr.bf16.mxu1 %v6979_v48 }
 0x1b6   :  { %4899 = vmatpush1.bf16.msra.mxu0 %v6982_v54  ;;  %4931 = vmatpush1.bf16.msra.mxu1 %v6986_v58 }
 0x1b7   :  { %4901 = vmatprep.subr.bf16.mxu0 %v6990_v62  ;;  %4933 = vmatprep.subr.bf16.mxu1 %v6993_v4 }
 0x1ba   :  { %4903 = vmatpush1.bf16.msra.mxu0 %v6996_v9  ;;  %4935 = vmatpush1.bf16.msra.mxu1 %v7000_v14 }
 0x1bb   :  { %4905 = vmatprep.subr.bf16.mxu0 %v7004_v18  ;;  %4937 = vmatprep.subr.bf16.mxu1 %v7007_v22 }
 0x1be   :  { %4907 = vmatpush1.bf16.msra.mxu0 %v7010_v28  ;;  %4939 = vmatpush1.bf16.msra.mxu1 %v7014_v33 }
 0x1bf   :  { %4941 = vmatprep.subr.bf16.mxu0 %v7018_v39  ;;  %4973 = vmatprep.subr.bf16.mxu1 %v7021_v46 }
 0x1c1   :  { %1195 = vmatmul.mubr.f32.vlgmr.msra.gmra.mrb[2].mxu0 %v816_v37  ;;  %1266 = vmatmul.mubr.f32.vlgmr.msra.gmra.mrb[2].mxu1 %v816_v37  ;;  %v8478_v37 = vld [vmem:[#allocation74_spill] sm:$0xff] }
 0x1c2   :  { %4943 = vmatpush1.bf16.msra.mxu0 %v7024_v52  ;;  %4975 = vmatpush1.bf16.msra.mxu1 %v7028_v55 }
 0x1c3   :  { %4945 = vmatprep.subr.bf16.mxu0 %v7030_v57  ;;  %4977 = vmatprep.subr.bf16.mxu1 %v7034_v2 }
 0x1c4   :  { %1364 = vmatprep.mubr.f32.mxu0 %v8431_v8  ;;  %1435 = vmatprep.mubr.f32.mxu1 %v8431_v8 }
 0x1c6   :  { %4947 = vmatpush1.bf16.msra.mxu0 %v7040_v15  ;;  %4979 = vmatpush1.bf16.msra.mxu1 %v7044_v17 }
 0x1c7   :  { %4949 = vmatprep.subr.bf16.mxu0 %v7046_v20  ;;  %4981 = vmatprep.subr.bf16.mxu1 %v7049_v27 }
 0x1ca   :  { %4951 = vmatpush1.bf16.msra.mxu0 %v7054_v42  ;;  %4983 = vmatpush1.bf16.msra.mxu1 %v7058_v43 }
 0x1cb   :  { %4953 = vmatprep.subr.bf16.mxu0 %v7060_v45  ;;  %4985 = vmatprep.subr.bf16.mxu1 %v7063_v61 }
 0x1ce   :  { %4955 = vmatpush1.bf16.msra.mxu0 %v8464_v1  ;;  %4987 = vmatpush1.bf16.msra.mxu1 %v8465_v21 }
 0x1cf   :  { %4957 = vmatprep.subr.bf16.mxu0 %v8466_v34  ;;  %4989 = vmatprep.subr.bf16.mxu1 %v8467_v7  ;;  %v8488_v34 = vsub.s32 3, %v7225_v11 }
 0x1d2   :  { %4959 = vmatpush1.bf16.msra.mxu0 %v8468_v35  ;;  %4991 = vmatpush1.bf16.msra.mxu1 %v8469_v51  ;;  %v8480_v51 = vld [vmem:[#allocation76_spill] sm:$0xff] }
 0x1d3   :  { %4961 = vmatprep.subr.bf16.mxu0 %v8470_v41  ;;  %4993 = vmatprep.subr.bf16.mxu1 %v8471_v30  ;;  %v8481_v41 = vld [vmem:[#allocation77_spill] sm:$0xff]  ;;  %v8482_v30 = vld [vmem:[#allocation78_spill] sm:$0xff] }
 0x1d6   :  { %4963 = vmatpush1.bf16.msra.mxu0 %v8472_v38  ;;  %4995 = vmatpush1.bf16.msra.mxu1 %v8473_v31  ;;  %v8483_v38 = vld [vmem:[#allocation79_spill] sm:$0xff] }
 0x1d7   :  { %4965 = vmatprep.subr.bf16.mxu0 %v8474_v59  ;;  %4997 = vmatprep.subr.bf16.mxu1 %v8475_v25  ;;  %v625_v25 = vld [vmem:[%s8166_s6] sm:$0xf]  ;;  %s6781_s6 = smov [#allocation12]  }
 0x1d8   :  { %v7340_v21 = vrot.slane %v625_v25, %v8488_v34  ;;  %s4539_s12 = sshll.u32 %s6781_s6, 4  ;;  %s4540_s12 = int_to_ptr.vmem [resolvable:$true] %s4539_s12 }
 0x1d9   :  { %s6695_s15 = scalar_lea.vmem %s4540_s12, 256  ;;  %p6700_p13 = scmp.lt.s32.totalorder %s4540_s12, %s4540_s12 }
 0x1da   :  { %4967 = vmatpush1.bf16.msra.mxu0 %v8476_v12  ;;  %4999 = vmatpush1.bf16.msra.mxu1 %v8477_v24  ;;  %v8484_v12 = vsub.s32 0, %v7225_v11  ;;  %8489 = vst [vmem:[#allocation115_spill] sm:$0xff] %v7340_v21  ;;  %p6696_p12 = scmp.ne.s32.totalorder %s4540_s12, %s6695_s15  ;;  %p6701_p0 = scmp.lt.s32.totalorder %s6695_s15, %s6695_s15 }
 0x1db   :  { %4969 = vmatprep.subr.bf16.mxu0 %v8478_v37  ;;  %5001 = vmatprep.subr.bf16.mxu1 %v8479_v5  ;;  %v8486_v37 = vsub.s32 1, %v7225_v11 }
 0x1dc   :  { %v7330_v59 = vrot.slane %v625_v25, %v8484_v12  ;;  %p6702_p1 = por %p6701_p0, %p6700_p13 }
 0x1dd   :  { %v7334_v24 = vrot.slane %v625_v25, %v8486_v37  ;;  %v8490_v37 = vsub.s32 2, %v7225_v11 }
 0x1de   :  { %4971 = vmatpush1.bf16.msra.mxu0 %v8480_v51  ;;  %5003 = vmatpush1.bf16.msra.mxu1 %v8481_v41  ;;  %8485 = vst [vmem:[#allocation113_spill] sm:$0xff] %v7330_v59  ;;  %p6703_p2 = pnand %p6702_p1, %p6696_p12 }
 0x1df   :  { %5005 = vmatprep.subr.bf16.mxu0 %v8482_v30  ;;  %5037 = vmatprep.subr.bf16.mxu1 %v8483_v38  ;;  %8487 = vst [vmem:[#allocation114_spill] sm:$0xff] %v7334_v24  ;;  %v7345_v1 = vrot.slane %v625_v25, %v8490_v37 }
 0x1e1   :  { %8491 = vst [vmem:[#allocation116_spill] sm:$0xff] %v7345_v1 }
 0x274   :  { %v1025_v5 = vpop.f32.mrb[16].mxu0  ;;  %v1096_v51 = vpop.f32.mrb[16].mxu1 }
 0x275   :  { %v1101_v41 = vadd.f32 %v1025_v5, %v7330_v59  ;;  %v1027_v31 = vpop.f32.mrb[17].mxu0  ;;  %v1098_v30 = vpop.f32.mrb[17].mxu1  ;;  %v1103_v5 = vadd.f32 %v1096_v51, %v7345_v1  ;;  %v8492_v51 = vld [vmem:[#allocation110_spill] sm:$0xff] }
 0x276   :  { %v1102_v38 = vadd.f32 %v1027_v31, %v7334_v24  ;;  %v1104_v12 = vadd.f32 %v1098_v30, %v7340_v21 }
 0x277   :  { %v4575_v35 = vmul.f32 -1.442695, %v1101_v41 }
 0x278   :  { %v4576_v7 = vmul.f32 -1.442695, %v1102_v38  ;;  %v4577_v61 = vmul.f32 -1.442695, %v1104_v12 }
 0x279   :  { %6345 = vpow2.f32 %v4575_v35 }
 0x27a   :  { %6347 = vpow2.f32 %v4576_v7 }
 0x27b   :  { %6349 = vpow2.f32 %v4577_v61 }
 0x27c   :  { %6351 = vtanh.f32 %v1103_v5  ;;  %v8493_v5 = vld [vmem:[#allocation111_spill] sm:$0xff] }
 0x283   :  { %v6346_v59 = vpop.eup %6345 }
 0x284   :  { %v6348_v45 = vpop.eup %6347  ;;  %v1108_v31 = vadd.f32 1.0, %v6346_v59 }
 0x285   :  { %v1114_v41 = vadd.f32 1.0, %v6348_v45  ;;  %v6350_v34 = vpop.eup %6349 }
 0x286   :  { %6353 = vrcp.f32 %v1108_v31  ;;  %v6352_v35 = vpop.eup %6351  ;;  %v1121_v21 = vadd.f32 1.0, %v6350_v34 }
 0x287   :  { %6355 = vrcp.f32 %v1114_v41 }
 0x288   :  { %6357 = vrcp.f32 %v1121_v21 }
 0x290   :  { %v6354_v7 = vpop.eup %6353 }
 0x291   :  { %v6356_v38 = vpop.eup %6355  ;;  %v1125_v30 = vmul.f32 %v6354_v7, %v6352_v35  ;;  %v8494_v35 = vld [vmem:[#allocation112_spill] sm:$0xff] }
 0x292   :  { %v1124_v11 = vmul.f32 0.0, %v6356_v38  ;;  %v6358_v7 = vpop.eup %6357 }
 0x294   :  { %v7348_v25 = vadd.f32 %v1125_v30, %v1124_v11  ;;  %v1196_v12 = vpop.f32.mrb[2].mxu0  ;;  %v1267_v37 = vpop.f32.mrb[2].mxu1 }
 0x295   :  { %v6222_v1 = vadd.f32 %v1196_v12, %v8492_v51  ;;  %v1198_v59 = vpop.f32.mrb[3].mxu0  ;;  %v1269_v61 = vpop.f32.mrb[3].mxu1  ;;  %v6238_v11 = vadd.f32 %v1267_v37, %v7251_v49  ;;  %v8499_v37 = vld [vmem:[#allocation84_spill] sm:$0xff] }
 0x296   :  { %v6223_v45 = vadd.f32 %v1198_v59, %v8493_v5  ;;  %6359 = vtanh.f32 %v7348_v25  ;;  %v6239_v34 = vadd.f32 %v1269_v61, %v8494_v35  ;;  %v8495_v5 = vld [vmem:[#allocation80_spill] sm:$0xff]  ;;  %v8497_v61 = vld [vmem:[#allocation82_spill] sm:$0xff] }
 0x297   :  { %v4578_v31 = vmul.f32 -1.442695, %v6222_v1  ;;  %v8496_v1 = vld [vmem:[#allocation81_spill] sm:$0xff] }
 0x298   :  { %v4579_v41 = vmul.f32 -1.442695, %v6223_v45  ;;  %v4580_v30 = vmul.f32 -1.442695, %v6239_v34  ;;  %v8502_v34 = vld [vmem:[#allocation87_spill] sm:$0xff] }
 0x299   :  { %6361 = vpow2.f32 %v4578_v31  ;;  %v8498_v31 = vld [vmem:[#allocation83_spill] sm:$0xff] }
 0x29a   :  { %6363 = vpow2.f32 %v4579_v41  ;;  %v8501_v41 = vld [vmem:[#allocation86_spill] sm:$0xff] }
 0x29b   :  { %6365 = vpow2.f32 %v4580_v30  ;;  %v8505_v30 = vld [vmem:[#allocation90_spill] sm:$0xff] }
 0x29c   :  { %6367 = vtanh.f32 %v6238_v11  ;;  %v8506_v11 = vld [vmem:[#allocation91_spill] sm:$0xff] }
 0x2a0   :  { %v6360_v38 = vpop.eup %6359 }
 0x2a1   :  { %v1128_v21 = vmul.f32 %v6360_v38, %v6358_v7  ;;  %v8503_v7 = vld [vmem:[#allocation88_spill] sm:$0xff]  ;;  %v8504_v38 = vld [vmem:[#allocation89_spill] sm:$0xff] }
 0x2a3   :  { %v6362_v24 = vpop.eup %6361  ;;  %1129 = vst [vmem:[#allocation11] sm:$0xff] %v1128_v21  ;;  %1365 = vmatmul.mubr.f32.vlgmr.msra.gmra.mrb[18].mxu0 %v1128_v21  ;;  %1436 = vmatmul.mubr.f32.vlgmr.msra.gmra.mrb[18].mxu1 %v1128_v21 }
 0x2a4   :  { %v6364_v12 = vpop.eup %6363  ;;  %v1279_v59 = vadd.f32 1.0, %v6362_v24  ;;  %5007 = vmatpush1.bf16.msra.mxu0 %v8495_v5  ;;  %5039 = vmatpush1.bf16.msra.mxu1 %v8496_v1  ;;  %v8500_v24 = vld [vmem:[#allocation85_spill] sm:$0xff]  ;;  %v8513_v1 = vld [vmem:[#allocation98_spill] sm:$0xff] }
 0x2a5   :  { %v1285_v45 = vadd.f32 1.0, %v6364_v12  ;;  %5009 = vmatprep.subr.bf16.mxu0 %v8497_v61  ;;  %5041 = vmatprep.subr.bf16.mxu1 %v8498_v31  ;;  %v6366_v21 = vpop.eup %6365  ;;  %v8509_v61 = vld [vmem:[#allocation94_spill] sm:$0xff] }
 0x2a6   :  { %6369 = vrcp.f32 %v1279_v59  ;;  %1506 = vmatprep.mubr.f32.mxu0 %v8431_v8  ;;  %1577 = vmatprep.mubr.f32.mxu1 %v8431_v8  ;;  %v6368_v12 = vpop.eup %6367 }
 0x2a7   :  { %6371 = vrcp.f32 %v1285_v45  ;;  %v8507_v45 = vld [vmem:[#allocation92_spill] sm:$0xff] }
 0x2a8   :  { %5011 = vmatpush1.bf16.msra.mxu0 %v8499_v37  ;;  %5043 = vmatpush1.bf16.msra.mxu1 %v8500_v24  ;;  %v8508_v37 = vld [vmem:[#allocation93_spill] sm:$0xff] }
 0x2a9   :  { %5013 = vmatprep.subr.bf16.mxu0 %v8501_v41  ;;  %5045 = vmatprep.subr.bf16.mxu1 %v8502_v34  ;;  %v1292_v41 = vadd.f32 1.0, %v6366_v21  ;;  %v8510_v34 = vld [vmem:[#allocation95_spill] sm:$0xff]  ;;  %v8515_v21 = vld [vmem:[#allocation100_spill] sm:$0xff] }
 0x2ab   :  { %6373 = vrcp.f32 %v1292_v41  ;;  %v8522_v41 = vld [vmem:[#allocation107_spill] sm:$0xff] }
 0x2ac   :  { %5015 = vmatpush1.bf16.msra.mxu0 %v8503_v7  ;;  %5047 = vmatpush1.bf16.msra.mxu1 %v8504_v38 }
 0x2ad   :  { %5017 = vmatprep.subr.bf16.mxu0 %v8505_v30  ;;  %5049 = vmatprep.subr.bf16.mxu1 %v8506_v11  ;;  %v8511_v30 = vld [vmem:[#allocation96_spill] sm:$0xff]  ;;  %v8512_v11 = vld [vmem:[#allocation97_spill] sm:$0xff] }
 0x2b0   :  { %v6370_v59 = vpop.eup %6369  ;;  %5019 = vmatpush1.bf16.msra.mxu0 %v8507_v45  ;;  %5051 = vmatpush1.bf16.msra.mxu1 %v8508_v37  ;;  %v8514_v45 = vld [vmem:[#allocation99_spill] sm:$0xff] }
 0x2b1   :  { %v6372_v24 = vpop.eup %6371  ;;  %v1296_v31 = vmul.f32 %v6370_v59, %v6368_v12  ;;  %5021 = vmatprep.subr.bf16.mxu0 %v8509_v61  ;;  %5053 = vmatprep.subr.bf16.mxu1 %v8510_v34  ;;  %v8516_v12 = vld [vmem:[#allocation101_spill] sm:$0xff]  ;;  %v8517_v59 = vld [vmem:[#allocation102_spill] sm:$0xff] }
 0x2b2   :  { %v1295_v38 = vmul.f32 %v6372_v24, %v7254_v0  ;;  %v8518_v0 = vld [vmem:[#allocation103_spill] sm:$0xff]  ;;  %v8520_v24 = vld [vmem:[#allocation105_spill] sm:$0xff] }
 0x2b4   :  { %v7374_v7 = vadd.f32 %v1296_v31, %v1295_v38  ;;  %5023 = vmatpush1.bf16.msra.mxu0 %v8511_v30  ;;  %5055 = vmatpush1.bf16.msra.mxu1 %v8512_v11  ;;  %v8519_v31 = vld [vmem:[#allocation104_spill] sm:$0xff]  ;;  %v8521_v38 = vld [vmem:[#allocation106_spill] sm:$0xff]  ;;  %v8524_v30 = vld [vmem:[#allocation109_spill] sm:$0xff] }
 0x2b5   :  { %5025 = vmatprep.subr.bf16.mxu0 %v8513_v1  ;;  %5057 = vmatprep.subr.bf16.mxu1 %v8514_v45  ;;  %v6374_v1 = vpop.eup %6373  ;;  %v8523_v11 = vld [vmem:[#allocation108_spill] sm:$0xff] }
 0x2b6   :  { %6375 = vtanh.f32 %v7374_v7 }
 0x2b8   :  { %5027 = vmatpush1.bf16.msra.mxu0 %v8515_v21  ;;  %5059 = vmatpush1.bf16.msra.mxu1 %v8516_v12  ;;  %v8525_v12 = vld [vmem:[#allocation20_spill] sm:$0xff] }
 0x2b9   :  { %5029 = vmatprep.subr.bf16.mxu0 %v8517_v59  ;;  %5061 = vmatprep.subr.bf16.mxu1 %v8518_v0  ;;  %v8526_v59 = vld [vmem:[#allocation21_spill] sm:$0xff] }
 0x2bc   :  { %5031 = vmatpush1.bf16.msra.mxu0 %v8519_v31  ;;  %5063 = vmatpush1.bf16.msra.mxu1 %v8520_v24 }
 0x2bd   :  { %5033 = vmatprep.subr.bf16.mxu0 %v8521_v38  ;;  %5065 = vmatprep.subr.bf16.mxu1 %v8522_v41 }
 0x2c0   :  { %v6376_v45 = vpop.eup %6375  ;;  %5035 = vmatpush1.bf16.msra.mxu0 %v8523_v11  ;;  %5067 = vmatpush1.bf16.msra.mxu1 %v8524_v30 }
 0x2c1   :  { %v1299_v21 = vmul.f32 %v6376_v45, %v6374_v1  ;;  %5069 = vmatprep.subr.bf16.mxu0 %v8525_v12  ;;  %5101 = vmatprep.subr.bf16.mxu1 %v8526_v59  ;;  %v8527_v1 = vld [vmem:[#allocation58_spill] sm:$0xff]  ;;  %v8528_v45 = vld [vmem:[#allocation59_spill] sm:$0xff] }
 0x2c3   :  { %1507 = vmatmul.mubr.f32.vlgmr.msra.gmra.mrb[18].mxu0 %v1299_v21  ;;  %1578 = vmatmul.mubr.f32.vlgmr.msra.gmra.mrb[18].mxu1 %v1299_v21 }
 0x2c4   :  { %5071 = vmatpush1.bf16.msra.mxu0 %v6915_v47  ;;  %5103 = vmatpush1.bf16.msra.mxu1 %v6918_v50 }
 0x2c5   :  { %5073 = vmatprep.subr.bf16.mxu0 %v6921_v53  ;;  %5105 = vmatprep.subr.bf16.mxu1 %v6923_v56 }
 0x2c6   :  { %1678 = vmatprep.mubr.f32.mxu0 %v8431_v8  ;;  %1749 = vmatprep.mubr.f32.mxu1 %v8431_v8 }
 0x2c8   :  { %5075 = vmatpush1.bf16.msra.mxu0 %v6926_v60  ;;  %5107 = vmatpush1.bf16.msra.mxu1 %v6930_v63 }
 0x2c9   :  { %5077 = vmatprep.subr.bf16.mxu0 %v6934_v3  ;;  %5109 = vmatprep.subr.bf16.mxu1 %v6937_v6 }
 0x2cc   :  { %5079 = vmatpush1.bf16.msra.mxu0 %v6940_v10  ;;  %5111 = vmatpush1.bf16.msra.mxu1 %v6944_v13 }
 0x2cd   :  { %5081 = vmatprep.subr.bf16.mxu0 %v6948_v16  ;;  %5113 = vmatprep.subr.bf16.mxu1 %v6951_v19 }
 0x2d0   :  { %5083 = vmatpush1.bf16.msra.mxu0 %v6954_v23  ;;  %5115 = vmatpush1.bf16.msra.mxu1 %v6958_v26 }
 0x2d1   :  { %5085 = vmatprep.subr.bf16.mxu0 %v6962_v29  ;;  %5117 = vmatprep.subr.bf16.mxu1 %v6965_v32 }
 0x2d4   :  { %5087 = vmatpush1.bf16.msra.mxu0 %v6968_v36  ;;  %5119 = vmatpush1.bf16.msra.mxu1 %v6972_v40 }
 0x2d5   :  { %5089 = vmatprep.subr.bf16.mxu0 %v6976_v44  ;;  %5121 = vmatprep.subr.bf16.mxu1 %v6979_v48 }
 0x2d8   :  { %5091 = vmatpush1.bf16.msra.mxu0 %v6982_v54  ;;  %5123 = vmatpush1.bf16.msra.mxu1 %v6986_v58 }
 0x2d9   :  { %5093 = vmatprep.subr.bf16.mxu0 %v6990_v62  ;;  %5125 = vmatprep.subr.bf16.mxu1 %v6993_v4 }
 0x2dc   :  { %5095 = vmatpush1.bf16.msra.mxu0 %v6996_v9  ;;  %5127 = vmatpush1.bf16.msra.mxu1 %v7000_v14 }
 0x2dd   :  { %5097 = vmatprep.subr.bf16.mxu0 %v7004_v18  ;;  %5129 = vmatprep.subr.bf16.mxu1 %v7007_v22 }
 0x2e0   :  { %5099 = vmatpush1.bf16.msra.mxu0 %v7010_v28  ;;  %5131 = vmatpush1.bf16.msra.mxu1 %v7014_v33 }
 0x2e1   :  { %5133 = vmatprep.subr.bf16.mxu0 %v7018_v39  ;;  %5165 = vmatprep.subr.bf16.mxu1 %v7021_v46  ;;  %v8550_v46 = vld [vmem:[#allocation114_spill] sm:$0xff] }
 0x2e3   :  { %1679 = vmatmul.mubr.f32.vlgmr.msra.gmra.mrb[4].mxu0 %v1299_v21  ;;  %1750 = vmatmul.mubr.f32.vlgmr.msra.gmra.mrb[4].mxu1 %v1299_v21  ;;  %v8529_v21 = vld [vmem:[#allocation60_spill] sm:$0xff] }
 0x2e4   :  { %5135 = vmatpush1.bf16.msra.mxu0 %v7024_v52  ;;  %5167 = vmatpush1.bf16.msra.mxu1 %v7028_v55  ;;  %v8549_v55 = vld [vmem:[#allocation113_spill] sm:$0xff] }
 0x2e5   :  { %5137 = vmatprep.subr.bf16.mxu0 %v7030_v57  ;;  %5169 = vmatprep.subr.bf16.mxu1 %v7034_v2  ;;  %v8530_v2 = vld [vmem:[#allocation61_spill] sm:$0xff]  ;;  %v8531_v57 = vld [vmem:[#allocation62_spill] sm:$0xff] }
 0x2e6   :  { %1848 = vmatprep.mubr.f32.mxu0 %v8431_v8  ;;  %1919 = vmatprep.mubr.f32.mxu1 %v8431_v8 }
 0x2e8   :  { %5139 = vmatpush1.bf16.msra.mxu0 %v7040_v15  ;;  %5171 = vmatpush1.bf16.msra.mxu1 %v7044_v17  ;;  %v8532_v15 = vld [vmem:[#allocation63_spill] sm:$0xff]  ;;  %v8533_v17 = vld [vmem:[#allocation64_spill] sm:$0xff] }
 0x2e9   :  { %5141 = vmatprep.subr.bf16.mxu0 %v7046_v20  ;;  %5173 = vmatprep.subr.bf16.mxu1 %v7049_v27  ;;  %v8534_v20 = vld [vmem:[#allocation65_spill] sm:$0xff]  ;;  %v8535_v27 = vld [vmem:[#allocation66_spill] sm:$0xff] }
 0x2ec   :  { %5143 = vmatpush1.bf16.msra.mxu0 %v7054_v42  ;;  %5175 = vmatpush1.bf16.msra.mxu1 %v7058_v43  ;;  %v8536_v42 = vld [vmem:[#allocation67_spill] sm:$0xff]  ;;  %v8537_v43 = vld [vmem:[#allocation68_spill] sm:$0xff] }
 0x2ed   :  { %5145 = vmatprep.subr.bf16.mxu0 %v8527_v1  ;;  %5177 = vmatprep.subr.bf16.mxu1 %v8528_v45  ;;  %v8538_v1 = vld [vmem:[#allocation69_spill] sm:$0xff]  ;;  %v8539_v45 = vld [vmem:[#allocation70_spill] sm:$0xff] }
 0x2f0   :  { %5147 = vmatpush1.bf16.msra.mxu0 %v8529_v21  ;;  %5179 = vmatpush1.bf16.msra.mxu1 %v8530_v2  ;;  %v8540_v21 = vld [vmem:[#allocation71_spill] sm:$0xff]  ;;  %v8541_v2 = vld [vmem:[#allocation72_spill] sm:$0xff] }
 0x2f1   :  { %5149 = vmatprep.subr.bf16.mxu0 %v8531_v57  ;;  %5181 = vmatprep.subr.bf16.mxu1 %v8532_v15  ;;  %v8542_v57 = vld [vmem:[#allocation73_spill] sm:$0xff]  ;;  %v8543_v15 = vld [vmem:[#allocation74_spill] sm:$0xff] }
 0x2f4   :  { %5151 = vmatpush1.bf16.msra.mxu0 %v8533_v17  ;;  %5183 = vmatpush1.bf16.msra.mxu1 %v8534_v20  ;;  %v8544_v17 = vld [vmem:[#allocation75_spill] sm:$0xff]  ;;  %v8545_v20 = vld [vmem:[#allocation76_spill] sm:$0xff] }
 0x2f5   :  { %5153 = vmatprep.subr.bf16.mxu0 %v8535_v27  ;;  %5185 = vmatprep.subr.bf16.mxu1 %v8536_v42  ;;  %v8546_v27 = vld [vmem:[#allocation77_spill] sm:$0xff]  ;;  %v8547_v42 = vld [vmem:[#allocation78_spill] sm:$0xff] }
 0x2f8   :  { %5155 = vmatpush1.bf16.msra.mxu0 %v8537_v43  ;;  %5187 = vmatpush1.bf16.msra.mxu1 %v8538_v1  ;;  %v8548_v43 = vld [vmem:[#allocation79_spill] sm:$0xff] }
 0x2f9   :  { %5157 = vmatprep.subr.bf16.mxu0 %v8539_v45  ;;  %5189 = vmatprep.subr.bf16.mxu1 %v8540_v21 }
 0x2fc   :  { %5159 = vmatpush1.bf16.msra.mxu0 %v8541_v2  ;;  %5191 = vmatpush1.bf16.msra.mxu1 %v8542_v57 }
 0x2fd   :  { %5161 = vmatprep.subr.bf16.mxu0 %v8543_v15  ;;  %5193 = vmatprep.subr.bf16.mxu1 %v8544_v17  ;;  %v8551_v17 = vld [vmem:[#allocation115_spill] sm:$0xff] }
 0x300   :  { %5163 = vmatpush1.bf16.msra.mxu0 %v8545_v20  ;;  %5195 = vmatpush1.bf16.msra.mxu1 %v8546_v27  ;;  %v8552_v27 = vld [vmem:[#allocation116_spill] sm:$0xff] }
 0x301   :  { %5197 = vmatprep.subr.bf16.mxu0 %v8547_v42  ;;  %5229 = vmatprep.subr.bf16.mxu1 %v8548_v43 }
 0x396   :  { %v1508_v1 = vpop.f32.mrb[18].mxu0  ;;  %v1579_v45 = vpop.f32.mrb[18].mxu1 }
 0x397   :  { %v1584_v21 = vadd.f32 %v1508_v1, %v8549_v55  ;;  %v1510_v52 = vpop.f32.mrb[19].mxu0  ;;  %v1581_v2 = vpop.f32.mrb[19].mxu1  ;;  %v1586_v28 = vadd.f32 %v1579_v45, %v8552_v27 }
 0x398   :  { %v1585_v57 = vadd.f32 %v1510_v52, %v8550_v46  ;;  %v1587_v20 = vadd.f32 %v1581_v2, %v8551_v17 }
 0x399   :  { %v4581_v39 = vmul.f32 -1.442695, %v1584_v21 }
 0x39a   :  { %v4582_v15 = vmul.f32 -1.442695, %v1585_v57  ;;  %v4583_v33 = vmul.f32 -1.442695, %v1587_v20 }
 0x39b   :  { %6377 = vpow2.f32 %v4581_v39 }
 0x39c   :  { %6379 = vpow2.f32 %v4582_v15 }
 0x39d   :  { %6381 = vpow2.f32 %v4583_v33 }
 0x39e   :  { %6383 = vtanh.f32 %v1586_v28 }
 0x3a5   :  { %v6378_v42 = vpop.eup %6377 }
 0x3a6   :  { %v6380_v22 = vpop.eup %6379  ;;  %v1591_v43 = vadd.f32 1.0, %v6378_v42 }
 0x3a7   :  { %v1597_v18 = vadd.f32 1.0, %v6380_v22  ;;  %v6382_v1 = vpop.eup %6381  ;;  %v8553_v22 = vld [vmem:[#allocation111_spill] sm:$0xff] }
 0x3a8   :  { %6385 = vrcp.f32 %v1591_v43  ;;  %v6384_v55 = vpop.eup %6383  ;;  %v1604_v39 = vadd.f32 1.0, %v6382_v1 }
 0x3a9   :  { %6387 = vrcp.f32 %v1597_v18 }
 0x3aa   :  { %6389 = vrcp.f32 %v1604_v39 }
 0x3b2   :  { %v6386_v52 = vpop.eup %6385 }
 0x3b3   :  { %v6388_v21 = vpop.eup %6387  ;;  %v1608_v57 = vmul.f32 %v6386_v52, %v6384_v55 }
 0x3b4   :  { %v1607_v15 = vmul.f32 %v6388_v21, %v7348_v25  ;;  %v6390_v25 = vpop.eup %6389 }
 0x3b6   :  { %v7466_v2 = vadd.f32 %v1608_v57, %v1607_v15  ;;  %v1680_v20 = vpop.f32.mrb[4].mxu0  ;;  %v1751_v45 = vpop.f32.mrb[4].mxu1 }
 0x3b7   :  { %v6224_v42 = vadd.f32 %v1680_v20, %v8492_v51  ;;  %v1682_v33 = vpop.f32.mrb[5].mxu0  ;;  %v1753_v28 = vpop.f32.mrb[5].mxu1  ;;  %v6240_v21 = vadd.f32 %v1751_v45, %v7251_v49  ;;  %v8557_v45 = vld [vmem:[#allocation84_spill] sm:$0xff] }
 0x3b8   :  { %v6225_v43 = vadd.f32 %v1682_v33, %v8553_v22  ;;  %6391 = vtanh.f32 %v7466_v2  ;;  %v6241_v55 = vadd.f32 %v1753_v28, %v8494_v35  ;;  %v8555_v33 = vld [vmem:[#allocation82_spill] sm:$0xff]  ;;  %v8556_v28 = vld [vmem:[#allocation83_spill] sm:$0xff] }
 0x3b9   :  { %v4584_v18 = vmul.f32 -1.442695, %v6224_v42  ;;  %v8554_v42 = vld [vmem:[#allocation81_spill] sm:$0xff] }
 0x3ba   :  { %v4585_v27 = vmul.f32 -1.442695, %v6225_v43  ;;  %v4586_v52 = vmul.f32 -1.442695, %v6241_v55  ;;  %v8558_v43 = vld [vmem:[#allocation85_spill] sm:$0xff]  ;;  %v8560_v55 = vld [vmem:[#allocation87_spill] sm:$0xff] }
 0x3bb   :  { %6393 = vpow2.f32 %v4584_v18  ;;  %v8559_v18 = vld [vmem:[#allocation86_spill] sm:$0xff] }
 0x3bc   :  { %6395 = vpow2.f32 %v4585_v27 }
 0x3bd   :  { %6397 = vpow2.f32 %v4586_v52  ;;  %v8563_v52 = vld [vmem:[#allocation90_spill] sm:$0xff] }
 0x3be   :  { %6399 = vtanh.f32 %v6240_v21  ;;  %v8564_v21 = vld [vmem:[#allocation91_spill] sm:$0xff] }
 0x3c2   :  { %v6392_v1 = vpop.eup %6391 }
 0x3c3   :  { %v1611_v57 = vmul.f32 %v6392_v1, %v6390_v25  ;;  %v8561_v25 = vld [vmem:[#allocation88_spill] sm:$0xff]  ;;  %v8562_v1 = vld [vmem:[#allocation89_spill] sm:$0xff] }
 0x3c5   :  { %v6394_v39 = vpop.eup %6393  ;;  %1613 = vst [vmem:[#allocation11 + $0x8] sm:$0xff] %v1611_v57  ;;  %1849 = vmatmul.mubr.f32.vlgmr.msra.gmra.mrb[20].mxu0 %v1611_v57  ;;  %1920 = vmatmul.mubr.f32.vlgmr.msra.gmra.mrb[20].mxu1 %v1611_v57 }
 0x3c6   :  { %v6396_v15 = vpop.eup %6395  ;;  %v1763_v20 = vadd.f32 1.0, %v6394_v39  ;;  %5199 = vmatpush1.bf16.msra.mxu0 %v8495_v5  ;;  %5231 = vmatpush1.bf16.msra.mxu1 %v8554_v42 }
 0x3c7   :  { %v1769_v27 = vadd.f32 1.0, %v6396_v15  ;;  %5201 = vmatprep.subr.bf16.mxu0 %v8555_v33  ;;  %5233 = vmatprep.subr.bf16.mxu1 %v8556_v28  ;;  %v6398_v57 = vpop.eup %6397 }
 0x3c8   :  { %6401 = vrcp.f32 %v1763_v20  ;;  %1990 = vmatprep.mubr.f32.mxu0 %v8431_v8  ;;  %2061 = vmatprep.mubr.f32.mxu1 %v8431_v8  ;;  %v6400_v39 = vpop.eup %6399  ;;  %v8565_v20 = vld [vmem:[#allocation92_spill] sm:$0xff] }
 0x3c9   :  { %6403 = vrcp.f32 %v1769_v27 }
 0x3ca   :  { %5203 = vmatpush1.bf16.msra.mxu0 %v8557_v45  ;;  %5235 = vmatpush1.bf16.msra.mxu1 %v8558_v43 }
 0x3cb   :  { %5205 = vmatprep.subr.bf16.mxu0 %v8559_v18  ;;  %5237 = vmatprep.subr.bf16.mxu1 %v8560_v55  ;;  %v1776_v18 = vadd.f32 1.0, %v6398_v57  ;;  %v8568_v55 = vld [vmem:[#allocation98_spill] sm:$0xff]  ;;  %v8570_v57 = vld [vmem:[#allocation100_spill] sm:$0xff] }
 0x3cd   :  { %6405 = vrcp.f32 %v1776_v18 }
 0x3ce   :  { %5207 = vmatpush1.bf16.msra.mxu0 %v8561_v25  ;;  %5239 = vmatpush1.bf16.msra.mxu1 %v8562_v1 }
 0x3cf   :  { %5209 = vmatprep.subr.bf16.mxu0 %v8563_v52  ;;  %5241 = vmatprep.subr.bf16.mxu1 %v8564_v21  ;;  %v8566_v52 = vld [vmem:[#allocation96_spill] sm:$0xff]  ;;  %v8567_v21 = vld [vmem:[#allocation97_spill] sm:$0xff] }
 0x3d2   :  { %v6402_v15 = vpop.eup %6401  ;;  %5211 = vmatpush1.bf16.msra.mxu0 %v8565_v20  ;;  %5243 = vmatpush1.bf16.msra.mxu1 %v8508_v37  ;;  %v8569_v20 = vld [vmem:[#allocation99_spill] sm:$0xff] }
 0x3d3   :  { %v6404_v27 = vpop.eup %6403  ;;  %v1780_v43 = vmul.f32 %v6402_v15, %v6400_v39  ;;  %5213 = vmatprep.subr.bf16.mxu0 %v8509_v61  ;;  %5245 = vmatprep.subr.bf16.mxu1 %v8510_v34  ;;  %v8571_v39 = vld [vmem:[#allocation101_spill] sm:$0xff]  ;;  %v8572_v15 = vld [vmem:[#allocation102_spill] sm:$0xff] }
 0x3d4   :  { %v1779_v1 = vmul.f32 %v6404_v27, %v7374_v7  ;;  %v8574_v27 = vld [vmem:[#allocation43_spill] sm:$0xff] }
 0x3d6   :  { %v7492_v25 = vadd.f32 %v1780_v43, %v1779_v1  ;;  %5215 = vmatpush1.bf16.msra.mxu0 %v8566_v52  ;;  %5247 = vmatpush1.bf16.msra.mxu1 %v8567_v21  ;;  %v8573_v1 = vld [vmem:[#allocation42_spill] sm:$0xff] }
 0x3d7   :  { %5217 = vmatprep.subr.bf16.mxu0 %v8568_v55  ;;  %5249 = vmatprep.subr.bf16.mxu1 %v8569_v20  ;;  %v6406_v7 = vpop.eup %6405 }
 0x3d8   :  { %6407 = vtanh.f32 %v7492_v25 }
 0x3da   :  { %5219 = vmatpush1.bf16.msra.mxu0 %v8570_v57  ;;  %5251 = vmatpush1.bf16.msra.mxu1 %v8571_v39 }
 0x3db   :  { %5221 = vmatprep.subr.bf16.mxu0 %v8572_v15  ;;  %5253 = vmatprep.subr.bf16.mxu1 %v8518_v0 }
 0x3de   :  { %5223 = vmatpush1.bf16.msra.mxu0 %v8519_v31  ;;  %5255 = vmatpush1.bf16.msra.mxu1 %v8520_v24 }
 0x3df   :  { %5225 = vmatprep.subr.bf16.mxu0 %v8521_v38  ;;  %5257 = vmatprep.subr.bf16.mxu1 %v8522_v41 }
 0x3e2   :  { %v6408_v43 = vpop.eup %6407  ;;  %5227 = vmatpush1.bf16.msra.mxu0 %v8523_v11  ;;  %5259 = vmatpush1.bf16.msra.mxu1 %v8524_v30 }
 0x3e3   :  { %5261 = vmatprep.subr.bf16.mxu0 %v8525_v12  ;;  %5293 = vmatprep.subr.bf16.mxu1 %v8526_v59  ;;  %v1783_v18 = vmul.f32 %v6408_v43, %v6406_v7  ;;  %v8575_v7 = vld [vmem:[#allocation44_spill] sm:$0xff]  ;;  %v8576_v43 = vld [vmem:[#allocation45_spill] sm:$0xff] }
 0x3e5   :  { %1991 = vmatmul.mubr.f32.vlgmr.msra.gmra.mrb[20].mxu0 %v1783_v18  ;;  %2062 = vmatmul.mubr.f32.vlgmr.msra.gmra.mrb[20].mxu1 %v1783_v18 }
 0x3e6   :  { %5263 = vmatpush1.bf16.msra.mxu0 %v6915_v47  ;;  %5295 = vmatpush1.bf16.msra.mxu1 %v6918_v50 }
 0x3e7   :  { %5265 = vmatprep.subr.bf16.mxu0 %v6921_v53  ;;  %5297 = vmatprep.subr.bf16.mxu1 %v6923_v56 }
 0x3e8   :  { %2162 = vmatprep.mubr.f32.mxu0 %v8431_v8  ;;  %2233 = vmatprep.mubr.f32.mxu1 %v8431_v8 }
 0x3ea   :  { %5267 = vmatpush1.bf16.msra.mxu0 %v6926_v60  ;;  %5299 = vmatpush1.bf16.msra.mxu1 %v6930_v63 }
 0x3eb   :  { %5269 = vmatprep.subr.bf16.mxu0 %v6934_v3  ;;  %5301 = vmatprep.subr.bf16.mxu1 %v6937_v6 }
 0x3ee   :  { %5271 = vmatpush1.bf16.msra.mxu0 %v6940_v10  ;;  %5303 = vmatpush1.bf16.msra.mxu1 %v6944_v13 }
 0x3ef   :  { %5273 = vmatprep.subr.bf16.mxu0 %v6948_v16  ;;  %5305 = vmatprep.subr.bf16.mxu1 %v6951_v19 }
 0x3f2   :  { %5275 = vmatpush1.bf16.msra.mxu0 %v6954_v23  ;;  %5307 = vmatpush1.bf16.msra.mxu1 %v6958_v26 }
 0x3f3   :  { %5277 = vmatprep.subr.bf16.mxu0 %v6962_v29  ;;  %5309 = vmatprep.subr.bf16.mxu1 %v6965_v32 }
 0x3f6   :  { %5279 = vmatpush1.bf16.msra.mxu0 %v6968_v36  ;;  %5311 = vmatpush1.bf16.msra.mxu1 %v6972_v40 }
 0x3f7   :  { %5281 = vmatprep.subr.bf16.mxu0 %v6976_v44  ;;  %5313 = vmatprep.subr.bf16.mxu1 %v6979_v48  ;;  %v8577_v48 = vld [vmem:[#allocation46_spill] sm:$0xff] }
 0x3fa   :  { %5283 = vmatpush1.bf16.msra.mxu0 %v6982_v54  ;;  %5315 = vmatpush1.bf16.msra.mxu1 %v6986_v58  ;;  %v8578_v54 = vld [vmem:[#allocation47_spill] sm:$0xff]  ;;  %v8611_v58 = vld [vmem:[#allocation113_spill] sm:$0xff] }
 0x3fb   :  { %5285 = vmatprep.subr.bf16.mxu0 %v6990_v62  ;;  %5317 = vmatprep.subr.bf16.mxu1 %v6993_v4  ;;  %v8579_v62 = vld [vmem:[#allocation48_spill] sm:$0xff]  ;;  %v8580_v4 = vld [vmem:[#allocation49_spill] sm:$0xff] }
 0x3fe   :  { %5287 = vmatpush1.bf16.msra.mxu0 %v6996_v9  ;;  %5319 = vmatpush1.bf16.msra.mxu1 %v7000_v14  ;;  %v8581_v9 = vld [vmem:[#allocation50_spill] sm:$0xff]  ;;  %v8582_v14 = vld [vmem:[#allocation51_spill] sm:$0xff] }
 0x3ff   :  { %5289 = vmatprep.subr.bf16.mxu0 %v8573_v1  ;;  %5321 = vmatprep.subr.bf16.mxu1 %v8574_v27  ;;  %v8592_v27 = vld [vmem:[#allocation61_spill] sm:$0xff]  ;;  %v8593_v1 = vld [vmem:[#allocation62_spill] sm:$0xff] }
 0x402   :  { %5291 = vmatpush1.bf16.msra.mxu0 %v8575_v7  ;;  %5323 = vmatpush1.bf16.msra.mxu1 %v8576_v43  ;;  %v8583_v7 = vld [vmem:[#allocation52_spill] sm:$0xff]  ;;  %v8584_v43 = vld [vmem:[#allocation53_spill] sm:$0xff] }
 0x403   :  { %5325 = vmatprep.subr.bf16.mxu0 %v8577_v48  ;;  %5357 = vmatprep.subr.bf16.mxu1 %v8578_v54  ;;  %v8585_v48 = vld [vmem:[#allocation54_spill] sm:$0xff]  ;;  %v8586_v54 = vld [vmem:[#allocation55_spill] sm:$0xff] }
 0x405   :  { %2163 = vmatmul.mubr.f32.vlgmr.msra.gmra.mrb[6].mxu0 %v1783_v18  ;;  %2234 = vmatmul.mubr.f32.vlgmr.msra.gmra.mrb[6].mxu1 %v1783_v18  ;;  %v8587_v18 = vld [vmem:[#allocation56_spill] sm:$0xff] }
 0x406   :  { %5327 = vmatpush1.bf16.msra.mxu0 %v8579_v62  ;;  %5359 = vmatpush1.bf16.msra.mxu1 %v8580_v4  ;;  %v8588_v62 = vld [vmem:[#allocation57_spill] sm:$0xff]  ;;  %v8589_v4 = vld [vmem:[#allocation58_spill] sm:$0xff] }
 0x407   :  { %5329 = vmatprep.subr.bf16.mxu0 %v8581_v9  ;;  %5361 = vmatprep.subr.bf16.mxu1 %v8582_v14  ;;  %v8590_v9 = vld [vmem:[#allocation59_spill] sm:$0xff]  ;;  %v8591_v14 = vld [vmem:[#allocation60_spill] sm:$0xff] }
 0x408   :  { %2332 = vmatprep.mubr.f32.mxu0 %v8431_v8  ;;  %2403 = vmatprep.mubr.f32.mxu1 %v8431_v8 }
 0x40a   :  { %5331 = vmatpush1.bf16.msra.mxu0 %v8583_v7  ;;  %5363 = vmatpush1.bf16.msra.mxu1 %v8584_v43  ;;  %v8594_v7 = vld [vmem:[#allocation63_spill] sm:$0xff]  ;;  %v8595_v43 = vld [vmem:[#allocation64_spill] sm:$0xff] }
 0x40b   :  { %5333 = vmatprep.subr.bf16.mxu0 %v8585_v48  ;;  %5365 = vmatprep.subr.bf16.mxu1 %v8586_v54  ;;  %v8596_v48 = vld [vmem:[#allocation65_spill] sm:$0xff]  ;;  %v8597_v54 = vld [vmem:[#allocation66_spill] sm:$0xff] }
 0x40e   :  { %5335 = vmatpush1.bf16.msra.mxu0 %v8587_v18  ;;  %5367 = vmatpush1.bf16.msra.mxu1 %v8588_v62  ;;  %v8598_v18 = vld [vmem:[#allocation67_spill] sm:$0xff]  ;;  %v8599_v62 = vld [vmem:[#allocation68_spill] sm:$0xff] }
 0x40f   :  { %5337 = vmatprep.subr.bf16.mxu0 %v8589_v4  ;;  %5369 = vmatprep.subr.bf16.mxu1 %v8590_v9  ;;  %v8600_v4 = vld [vmem:[#allocation69_spill] sm:$0xff]  ;;  %v8601_v9 = vld [vmem:[#allocation70_spill] sm:$0xff] }
 0x412   :  { %5339 = vmatpush1.bf16.msra.mxu0 %v8591_v14  ;;  %5371 = vmatpush1.bf16.msra.mxu1 %v8592_v27  ;;  %v8602_v14 = vld [vmem:[#allocation71_spill] sm:$0xff]  ;;  %v8603_v27 = vld [vmem:[#allocation72_spill] sm:$0xff] }
 0x413   :  { %5341 = vmatprep.subr.bf16.mxu0 %v8593_v1  ;;  %5373 = vmatprep.subr.bf16.mxu1 %v8594_v7  ;;  %v8604_v1 = vld [vmem:[#allocation73_spill] sm:$0xff]  ;;  %v8605_v7 = vld [vmem:[#allocation74_spill] sm:$0xff] }
 0x416   :  { %5343 = vmatpush1.bf16.msra.mxu0 %v8595_v43  ;;  %5375 = vmatpush1.bf16.msra.mxu1 %v8596_v48  ;;  %v8606_v43 = vld [vmem:[#allocation75_spill] sm:$0xff]  ;;  %v8607_v48 = vld [vmem:[#allocation76_spill] sm:$0xff] }
 0x417   :  { %5345 = vmatprep.subr.bf16.mxu0 %v8597_v54  ;;  %5377 = vmatprep.subr.bf16.mxu1 %v8598_v18  ;;  %v8608_v54 = vld [vmem:[#allocation77_spill] sm:$0xff]  ;;  %v8609_v18 = vld [vmem:[#allocation78_spill] sm:$0xff] }
 0x41a   :  { %5347 = vmatpush1.bf16.msra.mxu0 %v8599_v62  ;;  %5379 = vmatpush1.bf16.msra.mxu1 %v8600_v4  ;;  %v8610_v62 = vld [vmem:[#allocation79_spill] sm:$0xff] }
 0x41b   :  { %5349 = vmatprep.subr.bf16.mxu0 %v8601_v9  ;;  %5381 = vmatprep.subr.bf16.mxu1 %v8602_v14 }
 0x41e   :  { %5351 = vmatpush1.bf16.msra.mxu0 %v8603_v27  ;;  %5383 = vmatpush1.bf16.msra.mxu1 %v8604_v1 }
 0x41f   :  { %5353 = vmatprep.subr.bf16.mxu0 %v8605_v7  ;;  %5385 = vmatprep.subr.bf16.mxu1 %v8606_v43 }
 0x422   :  { %5355 = vmatpush1.bf16.msra.mxu0 %v8607_v48  ;;  %5387 = vmatpush1.bf16.msra.mxu1 %v8608_v54  ;;  %v8612_v54 = vld [vmem:[#allocation116_spill] sm:$0xff] }
 0x423   :  { %5389 = vmatprep.subr.bf16.mxu0 %v8609_v18  ;;  %5421 = vmatprep.subr.bf16.mxu1 %v8610_v62 }
 0x4b8   :  { %v1992_v4 = vpop.f32.mrb[20].mxu0  ;;  %v2063_v9 = vpop.f32.mrb[20].mxu1 }
 0x4b9   :  { %v2068_v14 = vadd.f32 %v1992_v4, %v8611_v58  ;;  %v1994_v44 = vpop.f32.mrb[21].mxu0  ;;  %v2065_v27 = vpop.f32.mrb[21].mxu1  ;;  %v2070_v36 = vadd.f32 %v2063_v9, %v8612_v54 }
 0x4ba   :  { %v2069_v1 = vadd.f32 %v1994_v44, %v8550_v46  ;;  %v2071_v48 = vadd.f32 %v2065_v27, %v8551_v17 }
 0x4bb   :  { %v4587_v40 = vmul.f32 -1.442695, %v2068_v14 }
 0x4bc   :  { %v4588_v7 = vmul.f32 -1.442695, %v2069_v1  ;;  %v4589_v43 = vmul.f32 -1.442695, %v2071_v48 }
 0x4bd   :  { %6409 = vpow2.f32 %v4587_v40 }
 0x4be   :  { %6411 = vpow2.f32 %v4588_v7 }
 0x4bf   :  { %6413 = vpow2.f32 %v4589_v43 }
 0x4c0   :  { %6415 = vtanh.f32 %v2070_v36 }
 0x4c7   :  { %v6410_v18 = vpop.eup %6409 }
 0x4c8   :  { %v6412_v32 = vpop.eup %6411  ;;  %v2075_v62 = vadd.f32 1.0, %v6410_v18 }
 0x4c9   :  { %v2081_v29 = vadd.f32 1.0, %v6412_v32  ;;  %v6414_v4 = vpop.eup %6413 }
 0x4ca   :  { %6417 = vrcp.f32 %v2075_v62  ;;  %v6416_v58 = vpop.eup %6415  ;;  %v2088_v40 = vadd.f32 1.0, %v6414_v4 }
 0x4cb   :  { %6419 = vrcp.f32 %v2081_v29 }
 0x4cc   :  { %6421 = vrcp.f32 %v2088_v40 }
 0x4d4   :  { %v6418_v44 = vpop.eup %6417 }
 0x4d5   :  { %v6420_v14 = vpop.eup %6419  ;;  %v2092_v1 = vmul.f32 %v6418_v44, %v6416_v58 }
 0x4d6   :  { %v2091_v7 = vmul.f32 %v6420_v14, %v7466_v2  ;;  %v6422_v2 = vpop.eup %6421 }
 0x4d8   :  { %v7584_v27 = vadd.f32 %v2092_v1, %v2091_v7  ;;  %v2164_v48 = vpop.f32.mrb[6].mxu0  ;;  %v2235_v9 = vpop.f32.mrb[6].mxu1 }
 0x4d9   :  { %v6226_v18 = vadd.f32 %v2164_v48, %v8492_v51  ;;  %v2166_v43 = vpop.f32.mrb[7].mxu0  ;;  %v2237_v36 = vpop.f32.mrb[7].mxu1  ;;  %v6242_v14 = vadd.f32 %v2235_v9, %v7251_v49  ;;  %v8613_v9 = vld [vmem:[#allocation85_spill] sm:$0xff] }
 0x4da   :  { %v6227_v32 = vadd.f32 %v2166_v43, %v8553_v22  ;;  %6423 = vtanh.f32 %v7584_v27  ;;  %v6243_v58 = vadd.f32 %v2237_v36, %v8494_v35  ;;  %v8614_v43 = vld [vmem:[#allocation86_spill] sm:$0xff]  ;;  %v8615_v36 = vld [vmem:[#allocation87_spill] sm:$0xff] }
 0x4db   :  { %v4590_v29 = vmul.f32 -1.442695, %v6226_v18 }
 0x4dc   :  { %v4591_v62 = vmul.f32 -1.442695, %v6227_v32  ;;  %v4592_v44 = vmul.f32 -1.442695, %v6243_v58  ;;  %v8616_v32 = vld [vmem:[#allocation88_spill] sm:$0xff]  ;;  %v8619_v58 = vld [vmem:[#allocation91_spill] sm:$0xff] }
 0x4dd   :  { %6425 = vpow2.f32 %v4590_v29  ;;  %v8617_v29 = vld [vmem:[#allocation89_spill] sm:$0xff] }
 0x4de   :  { %6427 = vpow2.f32 %v4591_v62  ;;  %v8618_v62 = vld [vmem:[#allocation90_spill] sm:$0xff] }
 0x4df   :  { %6429 = vpow2.f32 %v4592_v44 }
 0x4e0   :  { %6431 = vtanh.f32 %v6242_v14  ;;  %v8620_v14 = vld [vmem:[#allocation92_spill] sm:$0xff] }
 0x4e4   :  { %v6424_v4 = vpop.eup %6423 }
 0x4e5   :  { %v2095_v1 = vmul.f32 %v6424_v4, %v6422_v2 }
 0x4e7   :  { %v6426_v40 = vpop.eup %6425  ;;  %2097 = vst [vmem:[#allocation11 + $0x10] sm:$0xff] %v2095_v1  ;;  %2333 = vmatmul.mubr.f32.vlgmr.msra.gmra.mrb[22].mxu0 %v2095_v1  ;;  %2404 = vmatmul.mubr.f32.vlgmr.msra.gmra.mrb[22].mxu1 %v2095_v1 }
 0x4e8   :  { %v6428_v7 = vpop.eup %6427  ;;  %v2247_v48 = vadd.f32 1.0, %v6426_v40  ;;  %5391 = vmatpush1.bf16.msra.mxu0 %v8495_v5  ;;  %5423 = vmatpush1.bf16.msra.mxu1 %v8554_v42 }
 0x4e9   :  { %v2253_v18 = vadd.f32 1.0, %v6428_v7  ;;  %5393 = vmatprep.subr.bf16.mxu0 %v8555_v33  ;;  %5425 = vmatprep.subr.bf16.mxu1 %v8556_v28  ;;  %v6430_v2 = vpop.eup %6429 }
 0x4ea   :  { %6433 = vrcp.f32 %v2247_v48  ;;  %2474 = vmatprep.mubr.f32.mxu0 %v8431_v8  ;;  %2545 = vmatprep.mubr.f32.mxu1 %v8431_v8  ;;  %v6432_v4 = vpop.eup %6431  ;;  %v2260_v7 = vadd.f32 1.0, %v6430_v2 }
 0x4eb   :  { %6435 = vrcp.f32 %v2253_v18 }
 0x4ec   :  { %5395 = vmatpush1.bf16.msra.mxu0 %v8557_v45  ;;  %5427 = vmatpush1.bf16.msra.mxu1 %v8613_v9  ;;  %6437 = vrcp.f32 %v2260_v7  ;;  %v8624_v7 = vld [vmem:[#allocation33_spill] sm:$0xff] }
 0x4ed   :  { %5397 = vmatprep.subr.bf16.mxu0 %v8614_v43  ;;  %5429 = vmatprep.subr.bf16.mxu1 %v8615_v36 }
 0x4f0   :  { %5399 = vmatpush1.bf16.msra.mxu0 %v8616_v32  ;;  %5431 = vmatpush1.bf16.msra.mxu1 %v8617_v29 }
 0x4f1   :  { %5401 = vmatprep.subr.bf16.mxu0 %v8618_v62  ;;  %5433 = vmatprep.subr.bf16.mxu1 %v8619_v58 }
 0x4f4   :  { %v6434_v44 = vpop.eup %6433  ;;  %5403 = vmatpush1.bf16.msra.mxu0 %v8620_v14  ;;  %5435 = vmatpush1.bf16.msra.mxu1 %v8508_v37 }
 0x4f5   :  { %v6436_v1 = vpop.eup %6435  ;;  %v2264_v40 = vmul.f32 %v6434_v44, %v6432_v4  ;;  %5405 = vmatprep.subr.bf16.mxu0 %v8509_v61  ;;  %5437 = vmatprep.subr.bf16.mxu1 %v8510_v34  ;;  %v8621_v44 = vld [vmem:[#allocation30_spill] sm:$0xff] }
 0x4f6   :  { %v2263_v48 = vmul.f32 %v6436_v1, %v7492_v25  ;;  %v6438_v25 = vpop.eup %6437  ;;  %v8622_v1 = vld [vmem:[#allocation31_spill] sm:$0xff] }
 0x4f8   :  { %v7610_v18 = vadd.f32 %v2264_v40, %v2263_v48  ;;  %5407 = vmatpush1.bf16.msra.mxu0 %v8566_v52  ;;  %5439 = vmatpush1.bf16.msra.mxu1 %v8567_v21  ;;  %v8623_v40 = vld [vmem:[#allocation32_spill] sm:$0xff]  ;;  %v8625_v48 = vld [vmem:[#allocation34_spill] sm:$0xff] }
 0x4f9   :  { %5409 = vmatprep.subr.bf16.mxu0 %v8568_v55  ;;  %5441 = vmatprep.subr.bf16.mxu1 %v8569_v20 }
 0x4fa   :  { %6439 = vtanh.f32 %v7610_v18 }
 0x4fc   :  { %5411 = vmatpush1.bf16.msra.mxu0 %v8570_v57  ;;  %5443 = vmatpush1.bf16.msra.mxu1 %v8571_v39 }
 0x4fd   :  { %5413 = vmatprep.subr.bf16.mxu0 %v8572_v15  ;;  %5445 = vmatprep.subr.bf16.mxu1 %v8518_v0 }
 0x500   :  { %5415 = vmatpush1.bf16.msra.mxu0 %v8519_v31  ;;  %5447 = vmatpush1.bf16.msra.mxu1 %v8520_v24 }
 0x501   :  { %5417 = vmatprep.subr.bf16.mxu0 %v8521_v38  ;;  %5449 = vmatprep.subr.bf16.mxu1 %v8522_v41 }
 0x504   :  { %v6440_v2 = vpop.eup %6439  ;;  %5419 = vmatpush1.bf16.msra.mxu0 %v8523_v11  ;;  %5451 = vmatpush1.bf16.msra.mxu1 %v8524_v30 }
 0x505   :  { %v2267_v4 = vmul.f32 %v6440_v2, %v6438_v25  ;;  %5453 = vmatprep.subr.bf16.mxu0 %v8525_v12  ;;  %5485 = vmatprep.subr.bf16.mxu1 %v8526_v59  ;;  %v8626_v25 = vld [vmem:[#allocation35_spill] sm:$0xff]  ;;  %v8627_v2 = vld [vmem:[#allocation36_spill] sm:$0xff] }
 0x507   :  { %2475 = vmatmul.mubr.f32.vlgmr.msra.gmra.mrb[22].mxu0 %v2267_v4  ;;  %2546 = vmatmul.mubr.f32.vlgmr.msra.gmra.mrb[22].mxu1 %v2267_v4 }
 0x508   :  { %5455 = vmatpush1.bf16.msra.mxu0 %v6915_v47  ;;  %5487 = vmatpush1.bf16.msra.mxu1 %v6918_v50 }
 0x509   :  { %5457 = vmatprep.subr.bf16.mxu0 %v6921_v53  ;;  %5489 = vmatprep.subr.bf16.mxu1 %v6923_v56 }
 0x50a   :  { %2646 = vmatprep.mubr.f32.mxu0 %v8431_v8  ;;  %2717 = vmatprep.mubr.f32.mxu1 %v8431_v8 }
 0x50c   :  { %5459 = vmatpush1.bf16.msra.mxu0 %v6926_v60  ;;  %5491 = vmatpush1.bf16.msra.mxu1 %v6930_v63 }
 0x50d   :  { %5461 = vmatprep.subr.bf16.mxu0 %v6934_v3  ;;  %5493 = vmatprep.subr.bf16.mxu1 %v6937_v6 }
 0x510   :  { %5463 = vmatpush1.bf16.msra.mxu0 %v6940_v10  ;;  %5495 = vmatpush1.bf16.msra.mxu1 %v6944_v13 }
 0x511   :  { %5465 = vmatprep.subr.bf16.mxu0 %v6948_v16  ;;  %5497 = vmatprep.subr.bf16.mxu1 %v6951_v19  ;;  %v8628_v16 = vld [vmem:[#allocation37_spill] sm:$0xff]  ;;  %v8629_v19 = vld [vmem:[#allocation38_spill] sm:$0xff] }
 0x514   :  { %5467 = vmatpush1.bf16.msra.mxu0 %v6954_v23  ;;  %5499 = vmatpush1.bf16.msra.mxu1 %v6958_v26  ;;  %v8630_v23 = vld [vmem:[#allocation39_spill] sm:$0xff]  ;;  %v8631_v26 = vld [vmem:[#allocation40_spill] sm:$0xff] }
 0x515   :  { %5469 = vmatprep.subr.bf16.mxu0 %v8621_v44  ;;  %5501 = vmatprep.subr.bf16.mxu1 %v8622_v1  ;;  %v8632_v44 = vld [vmem:[#allocation41_spill] sm:$0xff]  ;;  %v8633_v1 = vld [vmem:[#allocation42_spill] sm:$0xff] }
 0x518   :  { %5471 = vmatpush1.bf16.msra.mxu0 %v8623_v40  ;;  %5503 = vmatpush1.bf16.msra.mxu1 %v8624_v7  ;;  %v8634_v40 = vld [vmem:[#allocation43_spill] sm:$0xff]  ;;  %v8635_v7 = vld [vmem:[#allocation44_spill] sm:$0xff] }
 0x519   :  { %5473 = vmatprep.subr.bf16.mxu0 %v8625_v48  ;;  %5505 = vmatprep.subr.bf16.mxu1 %v8626_v25  ;;  %v8636_v48 = vld [vmem:[#allocation45_spill] sm:$0xff]  ;;  %v8637_v25 = vld [vmem:[#allocation46_spill] sm:$0xff] }
 0x51c   :  { %5475 = vmatpush1.bf16.msra.mxu0 %v8627_v2  ;;  %5507 = vmatpush1.bf16.msra.mxu1 %v8628_v16  ;;  %v8638_v2 = vld [vmem:[#allocation47_spill] sm:$0xff]  ;;  %v8671_v16 = vld [vmem:[#allocation113_spill] sm:$0xff] }
 0x51d   :  { %5477 = vmatprep.subr.bf16.mxu0 %v8629_v19  ;;  %5509 = vmatprep.subr.bf16.mxu1 %v8630_v23  ;;  %v8639_v19 = vld [vmem:[#allocation48_spill] sm:$0xff]  ;;  %v8640_v23 = vld [vmem:[#allocation49_spill] sm:$0xff] }
 0x520   :  { %5479 = vmatpush1.bf16.msra.mxu0 %v8631_v26  ;;  %5511 = vmatpush1.bf16.msra.mxu1 %v8632_v44  ;;  %v8641_v26 = vld [vmem:[#allocation50_spill] sm:$0xff]  ;;  %v8642_v44 = vld [vmem:[#allocation51_spill] sm:$0xff] }
 0x521   :  { %5481 = vmatprep.subr.bf16.mxu0 %v8633_v1  ;;  %5513 = vmatprep.subr.bf16.mxu1 %v8634_v40  ;;  %v8652_v40 = vld [vmem:[#allocation61_spill] sm:$0xff]  ;;  %v8653_v1 = vld [vmem:[#allocation62_spill] sm:$0xff] }
 0x524   :  { %5483 = vmatpush1.bf16.msra.mxu0 %v8635_v7  ;;  %5515 = vmatpush1.bf16.msra.mxu1 %v8636_v48  ;;  %v8643_v7 = vld [vmem:[#allocation52_spill] sm:$0xff]  ;;  %v8644_v48 = vld [vmem:[#allocation53_spill] sm:$0xff] }
 0x525   :  { %5517 = vmatprep.subr.bf16.mxu0 %v8637_v25  ;;  %5549 = vmatprep.subr.bf16.mxu1 %v8638_v2  ;;  %v8645_v25 = vld [vmem:[#allocation54_spill] sm:$0xff]  ;;  %v8646_v2 = vld [vmem:[#allocation55_spill] sm:$0xff] }
 0x527   :  { %2647 = vmatmul.mubr.f32.vlgmr.msra.gmra.mrb[8].mxu0 %v2267_v4  ;;  %2718 = vmatmul.mubr.f32.vlgmr.msra.gmra.mrb[8].mxu1 %v2267_v4  ;;  %v8647_v4 = vld [vmem:[#allocation56_spill] sm:$0xff] }
 0x528   :  { %5519 = vmatpush1.bf16.msra.mxu0 %v8639_v19  ;;  %5551 = vmatpush1.bf16.msra.mxu1 %v8640_v23  ;;  %v8648_v19 = vld [vmem:[#allocation57_spill] sm:$0xff]  ;;  %v8649_v23 = vld [vmem:[#allocation58_spill] sm:$0xff] }
 0x529   :  { %5521 = vmatprep.subr.bf16.mxu0 %v8641_v26  ;;  %5553 = vmatprep.subr.bf16.mxu1 %v8642_v44  ;;  %v8650_v26 = vld [vmem:[#allocation59_spill] sm:$0xff]  ;;  %v8651_v44 = vld [vmem:[#allocation60_spill] sm:$0xff] }
 0x52a   :  { %2816 = vmatprep.mubr.f32.mxu0 %v8431_v8  ;;  %2887 = vmatprep.mubr.f32.mxu1 %v8431_v8 }
 0x52c   :  { %5523 = vmatpush1.bf16.msra.mxu0 %v8643_v7  ;;  %5555 = vmatpush1.bf16.msra.mxu1 %v8644_v48  ;;  %v8654_v7 = vld [vmem:[#allocation63_spill] sm:$0xff]  ;;  %v8655_v48 = vld [vmem:[#allocation64_spill] sm:$0xff] }
 0x52d   :  { %5525 = vmatprep.subr.bf16.mxu0 %v8645_v25  ;;  %5557 = vmatprep.subr.bf16.mxu1 %v8646_v2  ;;  %v8656_v25 = vld [vmem:[#allocation65_spill] sm:$0xff]  ;;  %v8657_v2 = vld [vmem:[#allocation66_spill] sm:$0xff] }
 0x530   :  { %5527 = vmatpush1.bf16.msra.mxu0 %v8647_v4  ;;  %5559 = vmatpush1.bf16.msra.mxu1 %v8648_v19  ;;  %v8658_v4 = vld [vmem:[#allocation67_spill] sm:$0xff]  ;;  %v8659_v19 = vld [vmem:[#allocation68_spill] sm:$0xff] }
 0x531   :  { %5529 = vmatprep.subr.bf16.mxu0 %v8649_v23  ;;  %5561 = vmatprep.subr.bf16.mxu1 %v8650_v26  ;;  %v8660_v23 = vld [vmem:[#allocation69_spill] sm:$0xff]  ;;  %v8661_v26 = vld [vmem:[#allocation70_spill] sm:$0xff] }
 0x534   :  { %5531 = vmatpush1.bf16.msra.mxu0 %v8651_v44  ;;  %5563 = vmatpush1.bf16.msra.mxu1 %v8652_v40  ;;  %v8662_v44 = vld [vmem:[#allocation71_spill] sm:$0xff]  ;;  %v8663_v40 = vld [vmem:[#allocation72_spill] sm:$0xff] }
 0x535   :  { %5533 = vmatprep.subr.bf16.mxu0 %v8653_v1  ;;  %5565 = vmatprep.subr.bf16.mxu1 %v8654_v7  ;;  %v8664_v1 = vld [vmem:[#allocation73_spill] sm:$0xff]  ;;  %v8665_v7 = vld [vmem:[#allocation74_spill] sm:$0xff] }
 0x538   :  { %5535 = vmatpush1.bf16.msra.mxu0 %v8655_v48  ;;  %5567 = vmatpush1.bf16.msra.mxu1 %v8656_v25  ;;  %v8666_v48 = vld [vmem:[#allocation75_spill] sm:$0xff]  ;;  %v8667_v25 = vld [vmem:[#allocation76_spill] sm:$0xff] }
 0x539   :  { %5537 = vmatprep.subr.bf16.mxu0 %v8657_v2  ;;  %5569 = vmatprep.subr.bf16.mxu1 %v8658_v4  ;;  %v8668_v2 = vld [vmem:[#allocation77_spill] sm:$0xff]  ;;  %v8669_v4 = vld [vmem:[#allocation78_spill] sm:$0xff] }
 0x53c   :  { %5539 = vmatpush1.bf16.msra.mxu0 %v8659_v19  ;;  %5571 = vmatpush1.bf16.msra.mxu1 %v8660_v23  ;;  %v8670_v19 = vld [vmem:[#allocation79_spill] sm:$0xff] }
 0x53d   :  { %5541 = vmatprep.subr.bf16.mxu0 %v8661_v26  ;;  %5573 = vmatprep.subr.bf16.mxu1 %v8662_v44 }
 0x540   :  { %5543 = vmatpush1.bf16.msra.mxu0 %v8663_v40  ;;  %5575 = vmatpush1.bf16.msra.mxu1 %v8664_v1 }
 0x541   :  { %5545 = vmatprep.subr.bf16.mxu0 %v8665_v7  ;;  %5577 = vmatprep.subr.bf16.mxu1 %v8666_v48 }
 0x544   :  { %5547 = vmatpush1.bf16.msra.mxu0 %v8667_v25  ;;  %5579 = vmatpush1.bf16.msra.mxu1 %v8668_v2 }
 0x545   :  { %5581 = vmatprep.subr.bf16.mxu0 %v8669_v4  ;;  %5613 = vmatprep.subr.bf16.mxu1 %v8670_v19 }
 0x5da   :  { %v2476_v23 = vpop.f32.mrb[22].mxu0  ;;  %v2547_v26 = vpop.f32.mrb[22].mxu1 }
 0x5db   :  { %v2552_v44 = vadd.f32 %v2476_v23, %v8671_v16  ;;  %v2478_v13 = vpop.f32.mrb[23].mxu0  ;;  %v2549_v40 = vpop.f32.mrb[23].mxu1  ;;  %v2554_v2 = vadd.f32 %v2547_v26, %v8612_v54 }
 0x5dc   :  { %v2553_v1 = vadd.f32 %v2478_v13, %v8550_v46  ;;  %v2555_v25 = vadd.f32 %v2549_v40, %v8551_v17 }
 0x5dd   :  { %v4593_v10 = vmul.f32 -1.442695, %v2552_v44 }
 0x5de   :  { %v4594_v7 = vmul.f32 -1.442695, %v2553_v1  ;;  %v4595_v48 = vmul.f32 -1.442695, %v2555_v25 }
 0x5df   :  { %6441 = vpow2.f32 %v4593_v10 }
 0x5e0   :  { %6443 = vpow2.f32 %v4594_v7 }
 0x5e1   :  { %6445 = vpow2.f32 %v4595_v48 }
 0x5e2   :  { %6447 = vtanh.f32 %v2554_v2 }
 0x5e9   :  { %v6442_v4 = vpop.eup %6441 }
 0x5ea   :  { %v6444_v6 = vpop.eup %6443  ;;  %v2559_v19 = vadd.f32 1.0, %v6442_v4 }
 0x5eb   :  { %v2565_v3 = vadd.f32 1.0, %v6444_v6  ;;  %v6446_v23 = vpop.eup %6445 }
 0x5ec   :  { %6449 = vrcp.f32 %v2559_v19  ;;  %v6448_v16 = vpop.eup %6447  ;;  %v2572_v10 = vadd.f32 1.0, %v6446_v23 }
 0x5ed   :  { %6451 = vrcp.f32 %v2565_v3 }
 0x5ee   :  { %6453 = vrcp.f32 %v2572_v10 }
 0x5f6   :  { %v6450_v13 = vpop.eup %6449 }
 0x5f7   :  { %v6452_v44 = vpop.eup %6451  ;;  %v2576_v1 = vmul.f32 %v6450_v13, %v6448_v16 }
 0x5f8   :  { %v2575_v7 = vmul.f32 %v6452_v44, %v7584_v27  ;;  %v6454_v27 = vpop.eup %6453 }
 0x5fa   :  { %v7702_v40 = vadd.f32 %v2576_v1, %v2575_v7  ;;  %v2648_v25 = vpop.f32.mrb[8].mxu0  ;;  %v2719_v26 = vpop.f32.mrb[8].mxu1 }
 0x5fb   :  { %v6228_v4 = vadd.f32 %v2648_v25, %v8492_v51  ;;  %v2650_v48 = vpop.f32.mrb[9].mxu0  ;;  %v2721_v2 = vpop.f32.mrb[9].mxu1  ;;  %v6244_v44 = vadd.f32 %v2719_v26, %v7251_v49 }
 0x5fc   :  { %v6229_v6 = vadd.f32 %v2650_v48, %v8553_v22  ;;  %6455 = vtanh.f32 %v7702_v40  ;;  %v6245_v16 = vadd.f32 %v2721_v2, %v8494_v35 }
 0x5fd   :  { %v4596_v3 = vmul.f32 -1.442695, %v6228_v4 }
 0x5fe   :  { %v4597_v19 = vmul.f32 -1.442695, %v6229_v6  ;;  %v4598_v13 = vmul.f32 -1.442695, %v6245_v16 }
 0x5ff   :  { %6457 = vpow2.f32 %v4596_v3 }
 0x600   :  { %6459 = vpow2.f32 %v4597_v19 }
 0x601   :  { %6461 = vpow2.f32 %v4598_v13 }
 0x602   :  { %6463 = vtanh.f32 %v6244_v44  ;;  %v8672_v44 = vld [vmem:[#allocation22_spill] sm:$0xff] }
 0x606   :  { %v6456_v23 = vpop.eup %6455 }
 0x607   :  { %v2579_v1 = vmul.f32 %v6456_v23, %v6454_v27 }
 0x609   :  { %v6458_v10 = vpop.eup %6457  ;;  %2581 = vst [vmem:[#allocation11 + $0x18] sm:$0xff] %v2579_v1  ;;  %2817 = vmatmul.mubr.f32.vlgmr.msra.gmra.mrb[24].mxu0 %v2579_v1  ;;  %2888 = vmatmul.mubr.f32.vlgmr.msra.gmra.mrb[24].mxu1 %v2579_v1  ;;  %v8673_v1 = vld [vmem:[#allocation23_spill] sm:$0xff] }
 0x60a   :  { %v6460_v7 = vpop.eup %6459  ;;  %v2731_v25 = vadd.f32 1.0, %v6458_v10  ;;  %5583 = vmatpush1.bf16.msra.mxu0 %v8495_v5  ;;  %5615 = vmatpush1.bf16.msra.mxu1 %v8554_v42  ;;  %v8674_v10 = vld [vmem:[#allocation24_spill] sm:$0xff] }
 0x60b   :  { %v2737_v4 = vadd.f32 1.0, %v6460_v7  ;;  %5585 = vmatprep.subr.bf16.mxu0 %v8555_v33  ;;  %5617 = vmatprep.subr.bf16.mxu1 %v8556_v28  ;;  %v6462_v26 = vpop.eup %6461  ;;  %v8675_v7 = vld [vmem:[#allocation25_spill] sm:$0xff] }
 0x60c   :  { %6465 = vrcp.f32 %v2731_v25  ;;  %2958 = vmatprep.mubr.f32.mxu0 %v8431_v8  ;;  %3029 = vmatprep.mubr.f32.mxu1 %v8431_v8  ;;  %v6464_v48 = vpop.eup %6463  ;;  %v2744_v19 = vadd.f32 1.0, %v6462_v26  ;;  %v8676_v25 = vld [vmem:[#allocation26_spill] sm:$0xff]  ;;  %v8678_v26 = vld [vmem:[#allocation28_spill] sm:$0xff] }
 0x60d   :  { %6467 = vrcp.f32 %v2737_v4  ;;  %v8677_v4 = vld [vmem:[#allocation27_spill] sm:$0xff] }
 0x60e   :  { %5587 = vmatpush1.bf16.msra.mxu0 %v8557_v45  ;;  %5619 = vmatpush1.bf16.msra.mxu1 %v8613_v9  ;;  %6469 = vrcp.f32 %v2744_v19  ;;  %v8683_v19 = vld [vmem:[#allocation33_spill] sm:$0xff] }
 0x60f   :  { %5589 = vmatprep.subr.bf16.mxu0 %v8614_v43  ;;  %5621 = vmatprep.subr.bf16.mxu1 %v8615_v36 }
 0x612   :  { %5591 = vmatpush1.bf16.msra.mxu0 %v8616_v32  ;;  %5623 = vmatpush1.bf16.msra.mxu1 %v8617_v29 }
 0x613   :  { %5593 = vmatprep.subr.bf16.mxu0 %v8618_v62  ;;  %5625 = vmatprep.subr.bf16.mxu1 %v8619_v58 }
 0x616   :  { %v6466_v2 = vpop.eup %6465  ;;  %5595 = vmatpush1.bf16.msra.mxu0 %v8620_v14  ;;  %5627 = vmatpush1.bf16.msra.mxu1 %v8508_v37 }
 0x617   :  { %v6468_v6 = vpop.eup %6467  ;;  %v2748_v3 = vmul.f32 %v6466_v2, %v6464_v48  ;;  %5597 = vmatprep.subr.bf16.mxu0 %v8509_v61  ;;  %5629 = vmatprep.subr.bf16.mxu1 %v8510_v34  ;;  %v8679_v48 = vld [vmem:[#allocation29_spill] sm:$0xff]  ;;  %v8680_v2 = vld [vmem:[#allocation30_spill] sm:$0xff] }
 0x618   :  { %v2747_v16 = vmul.f32 %v6468_v6, %v7610_v18  ;;  %v6470_v18 = vpop.eup %6469  ;;  %v8681_v6 = vld [vmem:[#allocation31_spill] sm:$0xff] }
 0x61a   :  { %v7728_v27 = vadd.f32 %v2748_v3, %v2747_v16  ;;  %5599 = vmatpush1.bf16.msra.mxu0 %v8566_v52  ;;  %5631 = vmatpush1.bf16.msra.mxu1 %v8567_v21  ;;  %v8682_v3 = vld [vmem:[#allocation32_spill] sm:$0xff]  ;;  %v8684_v16 = vld [vmem:[#allocation34_spill] sm:$0xff] }
 0x61b   :  { %5601 = vmatprep.subr.bf16.mxu0 %v8568_v55  ;;  %5633 = vmatprep.subr.bf16.mxu1 %v8569_v20 }
 0x61c   :  { %6471 = vtanh.f32 %v7728_v27 }
 0x61e   :  { %5603 = vmatpush1.bf16.msra.mxu0 %v8570_v57  ;;  %5635 = vmatpush1.bf16.msra.mxu1 %v8571_v39 }
 0x61f   :  { %5605 = vmatprep.subr.bf16.mxu0 %v8572_v15  ;;  %5637 = vmatprep.subr.bf16.mxu1 %v8518_v0 }
 0x622   :  { %5607 = vmatpush1.bf16.msra.mxu0 %v8519_v31  ;;  %5639 = vmatpush1.bf16.msra.mxu1 %v8520_v24 }
 0x623   :  { %5609 = vmatprep.subr.bf16.mxu0 %v8521_v38  ;;  %5641 = vmatprep.subr.bf16.mxu1 %v8522_v41 }
 0x626   :  { %v6472_v23 = vpop.eup %6471  ;;  %5611 = vmatpush1.bf16.msra.mxu0 %v8523_v11  ;;  %5643 = vmatpush1.bf16.msra.mxu1 %v8524_v30 }
 0x627   :  { %5645 = vmatprep.subr.bf16.mxu0 %v8525_v12  ;;  %5677 = vmatprep.subr.bf16.mxu1 %v8526_v59  ;;  %v2751_v13 = vmul.f32 %v6472_v23, %v6470_v18  ;;  %v8685_v18 = vld [vmem:[#allocation35_spill] sm:$0xff]  ;;  %v8686_v23 = vld [vmem:[#allocation36_spill] sm:$0xff] }
 0x629   :  { %2959 = vmatmul.mubr.f32.vlgmr.msra.gmra.mrb[24].mxu0 %v2751_v13  ;;  %3030 = vmatmul.mubr.f32.vlgmr.msra.gmra.mrb[24].mxu1 %v2751_v13 }
 0x62a   :  { %5647 = vmatpush1.bf16.msra.mxu0 %v6915_v47  ;;  %5679 = vmatpush1.bf16.msra.mxu1 %v6918_v50 }
 0x62b   :  { %5649 = vmatprep.subr.bf16.mxu0 %v6921_v53  ;;  %5681 = vmatprep.subr.bf16.mxu1 %v6923_v56 }
 0x62c   :  { %3130 = vmatprep.mubr.f32.mxu0 %v8431_v8  ;;  %3201 = vmatprep.mubr.f32.mxu1 %v8431_v8 }
 0x62e   :  { %5651 = vmatpush1.bf16.msra.mxu0 %v6926_v60  ;;  %5683 = vmatpush1.bf16.msra.mxu1 %v6930_v63 }
 0x62f   :  { %5653 = vmatprep.subr.bf16.mxu0 %v8672_v44  ;;  %5685 = vmatprep.subr.bf16.mxu1 %v8673_v1 }
 0x632   :  { %5655 = vmatpush1.bf16.msra.mxu0 %v8674_v10  ;;  %5687 = vmatpush1.bf16.msra.mxu1 %v8675_v7 }
 0x633   :  { %5657 = vmatprep.subr.bf16.mxu0 %v8676_v25  ;;  %5689 = vmatprep.subr.bf16.mxu1 %v8677_v4  ;;  %v8687_v25 = vld [vmem:[#allocation37_spill] sm:$0xff]  ;;  %v8688_v4 = vld [vmem:[#allocation38_spill] sm:$0xff] }
 0x636   :  { %5659 = vmatpush1.bf16.msra.mxu0 %v8678_v26  ;;  %5691 = vmatpush1.bf16.msra.mxu1 %v8679_v48  ;;  %v8689_v26 = vld [vmem:[#allocation39_spill] sm:$0xff]  ;;  %v8690_v48 = vld [vmem:[#allocation40_spill] sm:$0xff] }
 0x637   :  { %5661 = vmatprep.subr.bf16.mxu0 %v8680_v2  ;;  %5693 = vmatprep.subr.bf16.mxu1 %v8681_v6  ;;  %v8691_v2 = vld [vmem:[#allocation41_spill] sm:$0xff]  ;;  %v8692_v6 = vld [vmem:[#allocation42_spill] sm:$0xff] }
 0x63a   :  { %5663 = vmatpush1.bf16.msra.mxu0 %v8682_v3  ;;  %5695 = vmatpush1.bf16.msra.mxu1 %v8683_v19  ;;  %v8693_v3 = vld [vmem:[#allocation43_spill] sm:$0xff]  ;;  %v8694_v19 = vld [vmem:[#allocation44_spill] sm:$0xff] }
 0x63b   :  { %5665 = vmatprep.subr.bf16.mxu0 %v8684_v16  ;;  %5697 = vmatprep.subr.bf16.mxu1 %v8685_v18  ;;  %v8695_v16 = vld [vmem:[#allocation45_spill] sm:$0xff]  ;;  %v8696_v18 = vld [vmem:[#allocation46_spill] sm:$0xff] }
 0x63e   :  { %5667 = vmatpush1.bf16.msra.mxu0 %v8686_v23  ;;  %5699 = vmatpush1.bf16.msra.mxu1 %v8687_v25  ;;  %v8697_v23 = vld [vmem:[#allocation47_spill] sm:$0xff]  ;;  %v8730_v25 = vld [vmem:[#allocation113_spill] sm:$0xff] }
 0x63f   :  { %5669 = vmatprep.subr.bf16.mxu0 %v8688_v4  ;;  %5701 = vmatprep.subr.bf16.mxu1 %v8689_v26  ;;  %v8698_v4 = vld [vmem:[#allocation48_spill] sm:$0xff]  ;;  %v8699_v26 = vld [vmem:[#allocation49_spill] sm:$0xff] }
 0x642   :  { %5671 = vmatpush1.bf16.msra.mxu0 %v8690_v48  ;;  %5703 = vmatpush1.bf16.msra.mxu1 %v8691_v2  ;;  %v8700_v48 = vld [vmem:[#allocation50_spill] sm:$0xff]  ;;  %v8701_v2 = vld [vmem:[#allocation51_spill] sm:$0xff] }
 0x643   :  { %5673 = vmatprep.subr.bf16.mxu0 %v8692_v6  ;;  %5705 = vmatprep.subr.bf16.mxu1 %v8693_v3  ;;  %v8711_v3 = vld [vmem:[#allocation61_spill] sm:$0xff]  ;;  %v8712_v6 = vld [vmem:[#allocation62_spill] sm:$0xff] }
 0x646   :  { %5675 = vmatpush1.bf16.msra.mxu0 %v8694_v19  ;;  %5707 = vmatpush1.bf16.msra.mxu1 %v8695_v16  ;;  %v8702_v19 = vld [vmem:[#allocation52_spill] sm:$0xff]  ;;  %v8703_v16 = vld [vmem:[#allocation53_spill] sm:$0xff] }
 0x647   :  { %5709 = vmatprep.subr.bf16.mxu0 %v8696_v18  ;;  %5741 = vmatprep.subr.bf16.mxu1 %v8697_v23  ;;  %v8704_v18 = vld [vmem:[#allocation54_spill] sm:$0xff]  ;;  %v8705_v23 = vld [vmem:[#allocation55_spill] sm:$0xff] }
 0x649   :  { %3131 = vmatmul.mubr.f32.vlgmr.msra.gmra.mrb[10].mxu0 %v2751_v13  ;;  %3202 = vmatmul.mubr.f32.vlgmr.msra.gmra.mrb[10].mxu1 %v2751_v13  ;;  %v8706_v13 = vld [vmem:[#allocation56_spill] sm:$0xff] }
 0x64a   :  { %5711 = vmatpush1.bf16.msra.mxu0 %v8698_v4  ;;  %5743 = vmatpush1.bf16.msra.mxu1 %v8699_v26  ;;  %v8707_v4 = vld [vmem:[#allocation57_spill] sm:$0xff]  ;;  %v8708_v26 = vld [vmem:[#allocation58_spill] sm:$0xff] }
 0x64b   :  { %5713 = vmatprep.subr.bf16.mxu0 %v8700_v48  ;;  %5745 = vmatprep.subr.bf16.mxu1 %v8701_v2  ;;  %v8709_v48 = vld [vmem:[#allocation59_spill] sm:$0xff]  ;;  %v8710_v2 = vld [vmem:[#allocation60_spill] sm:$0xff] }
 0x64c   :  { %3300 = vmatprep.mubr.f32.mxu0 %v8431_v8  ;;  %3371 = vmatprep.mubr.f32.mxu1 %v8431_v8 }
 0x64e   :  { %5715 = vmatpush1.bf16.msra.mxu0 %v8702_v19  ;;  %5747 = vmatpush1.bf16.msra.mxu1 %v8703_v16  ;;  %v8713_v19 = vld [vmem:[#allocation63_spill] sm:$0xff]  ;;  %v8714_v16 = vld [vmem:[#allocation64_spill] sm:$0xff] }
 0x64f   :  { %5717 = vmatprep.subr.bf16.mxu0 %v8704_v18  ;;  %5749 = vmatprep.subr.bf16.mxu1 %v8705_v23  ;;  %v8715_v18 = vld [vmem:[#allocation65_spill] sm:$0xff]  ;;  %v8716_v23 = vld [vmem:[#allocation66_spill] sm:$0xff] }
 0x652   :  { %5719 = vmatpush1.bf16.msra.mxu0 %v8706_v13  ;;  %5751 = vmatpush1.bf16.msra.mxu1 %v8707_v4  ;;  %v8717_v13 = vld [vmem:[#allocation67_spill] sm:$0xff]  ;;  %v8718_v4 = vld [vmem:[#allocation68_spill] sm:$0xff] }
 0x653   :  { %5721 = vmatprep.subr.bf16.mxu0 %v8708_v26  ;;  %5753 = vmatprep.subr.bf16.mxu1 %v8709_v48  ;;  %v8719_v26 = vld [vmem:[#allocation69_spill] sm:$0xff]  ;;  %v8720_v48 = vld [vmem:[#allocation70_spill] sm:$0xff] }
 0x656   :  { %5723 = vmatpush1.bf16.msra.mxu0 %v8710_v2  ;;  %5755 = vmatpush1.bf16.msra.mxu1 %v8711_v3  ;;  %v8721_v2 = vld [vmem:[#allocation71_spill] sm:$0xff]  ;;  %v8722_v3 = vld [vmem:[#allocation72_spill] sm:$0xff] }
 0x657   :  { %5725 = vmatprep.subr.bf16.mxu0 %v8712_v6  ;;  %5757 = vmatprep.subr.bf16.mxu1 %v8713_v19  ;;  %v8723_v6 = vld [vmem:[#allocation73_spill] sm:$0xff]  ;;  %v8724_v19 = vld [vmem:[#allocation74_spill] sm:$0xff] }
 0x65a   :  { %5727 = vmatpush1.bf16.msra.mxu0 %v8714_v16  ;;  %5759 = vmatpush1.bf16.msra.mxu1 %v8715_v18  ;;  %v8725_v16 = vld [vmem:[#allocation75_spill] sm:$0xff]  ;;  %v8726_v18 = vld [vmem:[#allocation76_spill] sm:$0xff] }
 0x65b   :  { %5729 = vmatprep.subr.bf16.mxu0 %v8716_v23  ;;  %5761 = vmatprep.subr.bf16.mxu1 %v8717_v13  ;;  %v8727_v23 = vld [vmem:[#allocation77_spill] sm:$0xff]  ;;  %v8728_v13 = vld [vmem:[#allocation78_spill] sm:$0xff] }
 0x65e   :  { %5731 = vmatpush1.bf16.msra.mxu0 %v8718_v4  ;;  %5763 = vmatpush1.bf16.msra.mxu1 %v8719_v26  ;;  %v8729_v4 = vld [vmem:[#allocation79_spill] sm:$0xff] }
 0x65f   :  { %5733 = vmatprep.subr.bf16.mxu0 %v8720_v48  ;;  %5765 = vmatprep.subr.bf16.mxu1 %v8721_v2 }
 0x662   :  { %5735 = vmatpush1.bf16.msra.mxu0 %v8722_v3  ;;  %5767 = vmatpush1.bf16.msra.mxu1 %v8723_v6 }
 0x663   :  { %5737 = vmatprep.subr.bf16.mxu0 %v8724_v19  ;;  %5769 = vmatprep.subr.bf16.mxu1 %v8725_v16 }
 0x666   :  { %5739 = vmatpush1.bf16.msra.mxu0 %v8726_v18  ;;  %5771 = vmatpush1.bf16.msra.mxu1 %v8727_v23 }
 0x667   :  { %5773 = vmatprep.subr.bf16.mxu0 %v8728_v13  ;;  %5805 = vmatprep.subr.bf16.mxu1 %v8729_v4 }
 0x6fc   :  { %v2960_v26 = vpop.f32.mrb[24].mxu0  ;;  %v3031_v48 = vpop.f32.mrb[24].mxu1 }
 0x6fd   :  { %v3036_v2 = vadd.f32 %v2960_v26, %v8730_v25  ;;  %v2962_v7 = vpop.f32.mrb[25].mxu0  ;;  %v3033_v3 = vpop.f32.mrb[25].mxu1  ;;  %v3038_v23 = vadd.f32 %v3031_v48, %v8612_v54 }
 0x6fe   :  { %v3037_v6 = vadd.f32 %v2962_v7, %v8550_v46  ;;  %v3039_v18 = vadd.f32 %v3033_v3, %v8551_v17 }
 0x6ff   :  { %v4599_v10 = vmul.f32 -1.442695, %v3036_v2 }
 0x700   :  { %v4600_v19 = vmul.f32 -1.442695, %v3037_v6  ;;  %v4601_v16 = vmul.f32 -1.442695, %v3039_v18 }
 0x701   :  { %6473 = vpow2.f32 %v4599_v10 }
 0x702   :  { %6475 = vpow2.f32 %v4600_v19 }
 0x703   :  { %6477 = vpow2.f32 %v4601_v16 }
 0x704   :  { %6479 = vtanh.f32 %v3038_v23 }
 0x70b   :  { %v6474_v13 = vpop.eup %6473 }
 0x70c   :  { %v6476_v1 = vpop.eup %6475  ;;  %v3043_v4 = vadd.f32 1.0, %v6474_v13 }
 0x70d   :  { %v3049_v44 = vadd.f32 1.0, %v6476_v1  ;;  %v6478_v26 = vpop.eup %6477 }
 0x70e   :  { %6481 = vrcp.f32 %v3043_v4  ;;  %v6480_v25 = vpop.eup %6479  ;;  %v3056_v10 = vadd.f32 1.0, %v6478_v26 }
 0x70f   :  { %6483 = vrcp.f32 %v3049_v44 }
 0x710   :  { %6485 = vrcp.f32 %v3056_v10 }
 0x718   :  { %v6482_v7 = vpop.eup %6481 }
 0x719   :  { %v6484_v2 = vpop.eup %6483  ;;  %v3060_v6 = vmul.f32 %v6482_v7, %v6480_v25 }
 0x71a   :  { %v3059_v19 = vmul.f32 %v6484_v2, %v7702_v40  ;;  %v6486_v40 = vpop.eup %6485 }
 0x71c   :  { %v7820_v3 = vadd.f32 %v3060_v6, %v3059_v19  ;;  %v3132_v18 = vpop.f32.mrb[10].mxu0  ;;  %v3203_v48 = vpop.f32.mrb[10].mxu1 }
 0x71d   :  { %v6230_v13 = vadd.f32 %v3132_v18, %v8492_v51  ;;  %v3134_v16 = vpop.f32.mrb[11].mxu0  ;;  %v3205_v23 = vpop.f32.mrb[11].mxu1  ;;  %v6246_v2 = vadd.f32 %v3203_v48, %v7251_v49 }
 0x71e   :  { %v6231_v1 = vadd.f32 %v3134_v16, %v8553_v22  ;;  %6487 = vtanh.f32 %v7820_v3  ;;  %v6247_v25 = vadd.f32 %v3205_v23, %v8494_v35 }
 0x71f   :  { %v4602_v44 = vmul.f32 -1.442695, %v6230_v13 }
 0x720   :  { %v4603_v4 = vmul.f32 -1.442695, %v6231_v1  ;;  %v4604_v7 = vmul.f32 -1.442695, %v6247_v25 }
 0x721   :  { %6489 = vpow2.f32 %v4602_v44 }
 0x722   :  { %6491 = vpow2.f32 %v4603_v4 }
 0x723   :  { %6493 = vpow2.f32 %v4604_v7 }
 0x724   :  { %6495 = vtanh.f32 %v6246_v2  ;;  %v8731_v2 = vld [vmem:[#allocation22_spill] sm:$0xff] }
 0x728   :  { %v6488_v26 = vpop.eup %6487 }
 0x729   :  { %v3063_v6 = vmul.f32 %v6488_v26, %v6486_v40 }
 0x72b   :  { %v6490_v10 = vpop.eup %6489  ;;  %3065 = vst [vmem:[#allocation11 + $0x20] sm:$0xff] %v3063_v6  ;;  %3301 = vmatmul.mubr.f32.vlgmr.msra.gmra.mrb[26].mxu0 %v3063_v6  ;;  %3372 = vmatmul.mubr.f32.vlgmr.msra.gmra.mrb[26].mxu1 %v3063_v6  ;;  %v8732_v6 = vld [vmem:[#allocation23_spill] sm:$0xff] }
 0x72c   :  { %v6492_v19 = vpop.eup %6491  ;;  %v3215_v18 = vadd.f32 1.0, %v6490_v10  ;;  %5775 = vmatpush1.bf16.msra.mxu0 %v8495_v5  ;;  %5807 = vmatpush1.bf16.msra.mxu1 %v8554_v42  ;;  %v8733_v10 = vld [vmem:[#allocation24_spill] sm:$0xff] }
 0x72d   :  { %v3221_v13 = vadd.f32 1.0, %v6492_v19  ;;  %5777 = vmatprep.subr.bf16.mxu0 %v8555_v33  ;;  %5809 = vmatprep.subr.bf16.mxu1 %v8556_v28  ;;  %v6494_v48 = vpop.eup %6493  ;;  %v8734_v19 = vld [vmem:[#allocation25_spill] sm:$0xff] }
 0x72e   :  { %6497 = vrcp.f32 %v3215_v18  ;;  %3442 = vmatprep.mubr.f32.mxu0 %v8431_v8  ;;  %3513 = vmatprep.mubr.f32.mxu1 %v8431_v8  ;;  %v6496_v16 = vpop.eup %6495  ;;  %v3228_v4 = vadd.f32 1.0, %v6494_v48  ;;  %v8735_v18 = vld [vmem:[#allocation26_spill] sm:$0xff]  ;;  %v8737_v48 = vld [vmem:[#allocation28_spill] sm:$0xff] }
 0x72f   :  { %6499 = vrcp.f32 %v3221_v13  ;;  %v8736_v13 = vld [vmem:[#allocation27_spill] sm:$0xff] }
 0x730   :  { %5779 = vmatpush1.bf16.msra.mxu0 %v8557_v45  ;;  %5811 = vmatpush1.bf16.msra.mxu1 %v8613_v9  ;;  %6501 = vrcp.f32 %v3228_v4  ;;  %v8742_v4 = vld [vmem:[#allocation33_spill] sm:$0xff] }
 0x731   :  { %5781 = vmatprep.subr.bf16.mxu0 %v8614_v43  ;;  %5813 = vmatprep.subr.bf16.mxu1 %v8615_v36 }
 0x734   :  { %5783 = vmatpush1.bf16.msra.mxu0 %v8616_v32  ;;  %5815 = vmatpush1.bf16.msra.mxu1 %v8617_v29 }
 0x735   :  { %5785 = vmatprep.subr.bf16.mxu0 %v8618_v62  ;;  %5817 = vmatprep.subr.bf16.mxu1 %v8619_v58 }
 0x738   :  { %v6498_v23 = vpop.eup %6497  ;;  %5787 = vmatpush1.bf16.msra.mxu0 %v8620_v14  ;;  %5819 = vmatpush1.bf16.msra.mxu1 %v8508_v37 }
 0x739   :  { %v6500_v1 = vpop.eup %6499  ;;  %v3232_v44 = vmul.f32 %v6498_v23, %v6496_v16  ;;  %5789 = vmatprep.subr.bf16.mxu0 %v8509_v61  ;;  %5821 = vmatprep.subr.bf16.mxu1 %v8510_v34  ;;  %v8738_v16 = vld [vmem:[#allocation29_spill] sm:$0xff]  ;;  %v8739_v23 = vld [vmem:[#allocation30_spill] sm:$0xff] }
 0x73a   :  { %v3231_v25 = vmul.f32 %v6500_v1, %v7728_v27  ;;  %v6502_v27 = vpop.eup %6501  ;;  %v8740_v1 = vld [vmem:[#allocation31_spill] sm:$0xff] }
 0x73c   :  { %v7846_v40 = vadd.f32 %v3232_v44, %v3231_v25  ;;  %5791 = vmatpush1.bf16.msra.mxu0 %v8566_v52  ;;  %5823 = vmatpush1.bf16.msra.mxu1 %v8567_v21  ;;  %v8741_v44 = vld [vmem:[#allocation32_spill] sm:$0xff]  ;;  %v8743_v25 = vld [vmem:[#allocation34_spill] sm:$0xff] }
 0x73d   :  { %5793 = vmatprep.subr.bf16.mxu0 %v8568_v55  ;;  %5825 = vmatprep.subr.bf16.mxu1 %v8569_v20 }
 0x73e   :  { %6503 = vtanh.f32 %v7846_v40 }
 0x740   :  { %5795 = vmatpush1.bf16.msra.mxu0 %v8570_v57  ;;  %5827 = vmatpush1.bf16.msra.mxu1 %v8571_v39 }
 0x741   :  { %5797 = vmatprep.subr.bf16.mxu0 %v8572_v15  ;;  %5829 = vmatprep.subr.bf16.mxu1 %v8518_v0 }
 0x744   :  { %5799 = vmatpush1.bf16.msra.mxu0 %v8519_v31  ;;  %5831 = vmatpush1.bf16.msra.mxu1 %v8520_v24 }
 0x745   :  { %5801 = vmatprep.subr.bf16.mxu0 %v8521_v38  ;;  %5833 = vmatprep.subr.bf16.mxu1 %v8522_v41 }
 0x748   :  { %v6504_v26 = vpop.eup %6503  ;;  %5803 = vmatpush1.bf16.msra.mxu0 %v8523_v11  ;;  %5835 = vmatpush1.bf16.msra.mxu1 %v8524_v30 }
 0x749   :  { %v3235_v7 = vmul.f32 %v6504_v26, %v6502_v27  ;;  %5837 = vmatprep.subr.bf16.mxu0 %v8525_v12  ;;  %5869 = vmatprep.subr.bf16.mxu1 %v8526_v59  ;;  %v8744_v27 = vld [vmem:[#allocation35_spill] sm:$0xff]  ;;  %v8745_v26 = vld [vmem:[#allocation36_spill] sm:$0xff] }
 0x74b   :  { %3443 = vmatmul.mubr.f32.vlgmr.msra.gmra.mrb[26].mxu0 %v3235_v7  ;;  %3514 = vmatmul.mubr.f32.vlgmr.msra.gmra.mrb[26].mxu1 %v3235_v7 }
 0x74c   :  { %5839 = vmatpush1.bf16.msra.mxu0 %v6915_v47  ;;  %5871 = vmatpush1.bf16.msra.mxu1 %v6918_v50 }
 0x74d   :  { %5841 = vmatprep.subr.bf16.mxu0 %v6921_v53  ;;  %5873 = vmatprep.subr.bf16.mxu1 %v6923_v56 }
 0x74e   :  { %3614 = vmatprep.mubr.f32.mxu0 %v8431_v8  ;;  %3685 = vmatprep.mubr.f32.mxu1 %v8431_v8 }
 0x750   :  { %5843 = vmatpush1.bf16.msra.mxu0 %v6926_v60  ;;  %5875 = vmatpush1.bf16.msra.mxu1 %v6930_v63 }
 0x751   :  { %5845 = vmatprep.subr.bf16.mxu0 %v8731_v2  ;;  %5877 = vmatprep.subr.bf16.mxu1 %v8732_v6 }
 0x754   :  { %5847 = vmatpush1.bf16.msra.mxu0 %v8733_v10  ;;  %5879 = vmatpush1.bf16.msra.mxu1 %v8734_v19 }
 0x755   :  { %5849 = vmatprep.subr.bf16.mxu0 %v8735_v18  ;;  %5881 = vmatprep.subr.bf16.mxu1 %v8736_v13  ;;  %v8746_v18 = vld [vmem:[#allocation37_spill] sm:$0xff]  ;;  %v8747_v13 = vld [vmem:[#allocation38_spill] sm:$0xff] }
 0x758   :  { %5851 = vmatpush1.bf16.msra.mxu0 %v8737_v48  ;;  %5883 = vmatpush1.bf16.msra.mxu1 %v8738_v16  ;;  %v8748_v48 = vld [vmem:[#allocation39_spill] sm:$0xff]  ;;  %v8749_v16 = vld [vmem:[#allocation40_spill] sm:$0xff] }
 0x759   :  { %5853 = vmatprep.subr.bf16.mxu0 %v8739_v23  ;;  %5885 = vmatprep.subr.bf16.mxu1 %v8740_v1  ;;  %v8750_v23 = vld [vmem:[#allocation41_spill] sm:$0xff]  ;;  %v8751_v1 = vld [vmem:[#allocation42_spill] sm:$0xff] }
 0x75c   :  { %5855 = vmatpush1.bf16.msra.mxu0 %v8741_v44  ;;  %5887 = vmatpush1.bf16.msra.mxu1 %v8742_v4  ;;  %v8752_v44 = vld [vmem:[#allocation43_spill] sm:$0xff]  ;;  %v8753_v4 = vld [vmem:[#allocation44_spill] sm:$0xff] }
 0x75d   :  { %5857 = vmatprep.subr.bf16.mxu0 %v8743_v25  ;;  %5889 = vmatprep.subr.bf16.mxu1 %v8744_v27  ;;  %v8754_v25 = vld [vmem:[#allocation45_spill] sm:$0xff]  ;;  %v8755_v27 = vld [vmem:[#allocation46_spill] sm:$0xff] }
 0x760   :  { %5859 = vmatpush1.bf16.msra.mxu0 %v8745_v26  ;;  %5891 = vmatpush1.bf16.msra.mxu1 %v8746_v18  ;;  %v8756_v26 = vld [vmem:[#allocation47_spill] sm:$0xff]  ;;  %v8789_v18 = vld [vmem:[#allocation113_spill] sm:$0xff] }
 0x761   :  { %5861 = vmatprep.subr.bf16.mxu0 %v8747_v13  ;;  %5893 = vmatprep.subr.bf16.mxu1 %v8748_v48  ;;  %v8757_v13 = vld [vmem:[#allocation48_spill] sm:$0xff]  ;;  %v8758_v48 = vld [vmem:[#allocation49_spill] sm:$0xff] }
 0x764   :  { %5863 = vmatpush1.bf16.msra.mxu0 %v8749_v16  ;;  %5895 = vmatpush1.bf16.msra.mxu1 %v8750_v23  ;;  %v8759_v16 = vld [vmem:[#allocation50_spill] sm:$0xff]  ;;  %v8760_v23 = vld [vmem:[#allocation51_spill] sm:$0xff] }
 0x765   :  { %5865 = vmatprep.subr.bf16.mxu0 %v8751_v1  ;;  %5897 = vmatprep.subr.bf16.mxu1 %v8752_v44  ;;  %v8770_v44 = vld [vmem:[#allocation61_spill] sm:$0xff]  ;;  %v8771_v1 = vld [vmem:[#allocation62_spill] sm:$0xff] }
 0x768   :  { %5867 = vmatpush1.bf16.msra.mxu0 %v8753_v4  ;;  %5899 = vmatpush1.bf16.msra.mxu1 %v8754_v25  ;;  %v8761_v4 = vld [vmem:[#allocation52_spill] sm:$0xff]  ;;  %v8762_v25 = vld [vmem:[#allocation53_spill] sm:$0xff] }
 0x769   :  { %5901 = vmatprep.subr.bf16.mxu0 %v8755_v27  ;;  %5933 = vmatprep.subr.bf16.mxu1 %v8756_v26  ;;  %v8763_v27 = vld [vmem:[#allocation54_spill] sm:$0xff]  ;;  %v8764_v26 = vld [vmem:[#allocation55_spill] sm:$0xff] }
 0x76b   :  { %3615 = vmatmul.mubr.f32.vlgmr.msra.gmra.mrb[12].mxu0 %v3235_v7  ;;  %3686 = vmatmul.mubr.f32.vlgmr.msra.gmra.mrb[12].mxu1 %v3235_v7  ;;  %v8765_v7 = vld [vmem:[#allocation56_spill] sm:$0xff] }
 0x76c   :  { %5903 = vmatpush1.bf16.msra.mxu0 %v8757_v13  ;;  %5935 = vmatpush1.bf16.msra.mxu1 %v8758_v48  ;;  %v8766_v13 = vld [vmem:[#allocation57_spill] sm:$0xff]  ;;  %v8767_v48 = vld [vmem:[#allocation58_spill] sm:$0xff] }
 0x76d   :  { %5905 = vmatprep.subr.bf16.mxu0 %v8759_v16  ;;  %5937 = vmatprep.subr.bf16.mxu1 %v8760_v23  ;;  %v8768_v16 = vld [vmem:[#allocation59_spill] sm:$0xff]  ;;  %v8769_v23 = vld [vmem:[#allocation60_spill] sm:$0xff] }
 0x76e   :  { %3784 = vmatprep.mubr.f32.mxu0 %v8431_v8  ;;  %3855 = vmatprep.mubr.f32.mxu1 %v8431_v8 }
 0x770   :  { %5907 = vmatpush1.bf16.msra.mxu0 %v8761_v4  ;;  %5939 = vmatpush1.bf16.msra.mxu1 %v8762_v25  ;;  %v8772_v4 = vld [vmem:[#allocation63_spill] sm:$0xff]  ;;  %v8773_v25 = vld [vmem:[#allocation64_spill] sm:$0xff] }
 0x771   :  { %5909 = vmatprep.subr.bf16.mxu0 %v8763_v27  ;;  %5941 = vmatprep.subr.bf16.mxu1 %v8764_v26  ;;  %v8774_v27 = vld [vmem:[#allocation65_spill] sm:$0xff]  ;;  %v8775_v26 = vld [vmem:[#allocation66_spill] sm:$0xff] }
 0x774   :  { %5911 = vmatpush1.bf16.msra.mxu0 %v8765_v7  ;;  %5943 = vmatpush1.bf16.msra.mxu1 %v8766_v13  ;;  %v8776_v7 = vld [vmem:[#allocation67_spill] sm:$0xff]  ;;  %v8777_v13 = vld [vmem:[#allocation68_spill] sm:$0xff] }
 0x775   :  { %5913 = vmatprep.subr.bf16.mxu0 %v8767_v48  ;;  %5945 = vmatprep.subr.bf16.mxu1 %v8768_v16  ;;  %v8778_v48 = vld [vmem:[#allocation69_spill] sm:$0xff]  ;;  %v8779_v16 = vld [vmem:[#allocation70_spill] sm:$0xff] }
 0x778   :  { %5915 = vmatpush1.bf16.msra.mxu0 %v8769_v23  ;;  %5947 = vmatpush1.bf16.msra.mxu1 %v8770_v44  ;;  %v8780_v23 = vld [vmem:[#allocation71_spill] sm:$0xff]  ;;  %v8781_v44 = vld [vmem:[#allocation72_spill] sm:$0xff] }
 0x779   :  { %5917 = vmatprep.subr.bf16.mxu0 %v8771_v1  ;;  %5949 = vmatprep.subr.bf16.mxu1 %v8772_v4  ;;  %v8782_v1 = vld [vmem:[#allocation73_spill] sm:$0xff]  ;;  %v8783_v4 = vld [vmem:[#allocation74_spill] sm:$0xff] }
 0x77c   :  { %5919 = vmatpush1.bf16.msra.mxu0 %v8773_v25  ;;  %5951 = vmatpush1.bf16.msra.mxu1 %v8774_v27  ;;  %v8784_v25 = vld [vmem:[#allocation75_spill] sm:$0xff]  ;;  %v8785_v27 = vld [vmem:[#allocation76_spill] sm:$0xff] }
 0x77d   :  { %5921 = vmatprep.subr.bf16.mxu0 %v8775_v26  ;;  %5953 = vmatprep.subr.bf16.mxu1 %v8776_v7  ;;  %v8786_v26 = vld [vmem:[#allocation77_spill] sm:$0xff]  ;;  %v8787_v7 = vld [vmem:[#allocation78_spill] sm:$0xff] }
 0x780   :  { %5923 = vmatpush1.bf16.msra.mxu0 %v8777_v13  ;;  %5955 = vmatpush1.bf16.msra.mxu1 %v8778_v48  ;;  %v8788_v13 = vld [vmem:[#allocation79_spill] sm:$0xff] }
 0x781   :  { %5925 = vmatprep.subr.bf16.mxu0 %v8779_v16  ;;  %5957 = vmatprep.subr.bf16.mxu1 %v8780_v23 }
 0x784   :  { %5927 = vmatpush1.bf16.msra.mxu0 %v8781_v44  ;;  %5959 = vmatpush1.bf16.msra.mxu1 %v8782_v1 }
 0x785   :  { %5929 = vmatprep.subr.bf16.mxu0 %v8783_v4  ;;  %5961 = vmatprep.subr.bf16.mxu1 %v8784_v25 }
 0x788   :  { %5931 = vmatpush1.bf16.msra.mxu0 %v8785_v27  ;;  %5963 = vmatpush1.bf16.msra.mxu1 %v8786_v26 }
 0x789   :  { %5965 = vmatprep.subr.bf16.mxu0 %v8787_v7  ;;  %5997 = vmatprep.subr.bf16.mxu1 %v8788_v13 }
 0x81e   :  { %v3444_v48 = vpop.f32.mrb[26].mxu0  ;;  %v3515_v16 = vpop.f32.mrb[26].mxu1 }
 0x81f   :  { %v3520_v23 = vadd.f32 %v3444_v48, %v8789_v18  ;;  %v3446_v19 = vpop.f32.mrb[27].mxu0  ;;  %v3517_v44 = vpop.f32.mrb[27].mxu1  ;;  %v3522_v26 = vadd.f32 %v3515_v16, %v8612_v54 }
 0x820   :  { %v3521_v1 = vadd.f32 %v3446_v19, %v8550_v46  ;;  %v3523_v27 = vadd.f32 %v3517_v44, %v8551_v17 }
 0x821   :  { %v4605_v10 = vmul.f32 -1.442695, %v3520_v23 }
 0x822   :  { %v4606_v4 = vmul.f32 -1.442695, %v3521_v1  ;;  %v4607_v25 = vmul.f32 -1.442695, %v3523_v27 }
 0x823   :  { %6505 = vpow2.f32 %v4605_v10 }
 0x824   :  { %6507 = vpow2.f32 %v4606_v4 }
 0x825   :  { %6509 = vpow2.f32 %v4607_v25 }
 0x826   :  { %6511 = vtanh.f32 %v3522_v26 }
 0x82d   :  { %v6506_v7 = vpop.eup %6505 }
 0x82e   :  { %v6508_v6 = vpop.eup %6507  ;;  %v3527_v13 = vadd.f32 1.0, %v6506_v7 }
 0x82f   :  { %v3533_v2 = vadd.f32 1.0, %v6508_v6  ;;  %v6510_v48 = vpop.eup %6509 }
 0x830   :  { %6513 = vrcp.f32 %v3527_v13  ;;  %v6512_v18 = vpop.eup %6511  ;;  %v3540_v10 = vadd.f32 1.0, %v6510_v48 }
 0x831   :  { %6515 = vrcp.f32 %v3533_v2 }
 0x832   :  { %6517 = vrcp.f32 %v3540_v10 }
 0x83a   :  { %v6514_v19 = vpop.eup %6513 }
 0x83b   :  { %v6516_v23 = vpop.eup %6515  ;;  %v3544_v1 = vmul.f32 %v6514_v19, %v6512_v18 }
 0x83c   :  { %v3543_v4 = vmul.f32 %v6516_v23, %v7820_v3  ;;  %v6518_v3 = vpop.eup %6517 }
 0x83e   :  { %v7938_v44 = vadd.f32 %v3544_v1, %v3543_v4  ;;  %v3616_v27 = vpop.f32.mrb[12].mxu0  ;;  %v3687_v16 = vpop.f32.mrb[12].mxu1 }
 0x83f   :  { %v6232_v7 = vadd.f32 %v3616_v27, %v8492_v51  ;;  %v3618_v25 = vpop.f32.mrb[13].mxu0  ;;  %v3689_v26 = vpop.f32.mrb[13].mxu1  ;;  %v6248_v23 = vadd.f32 %v3687_v16, %v7251_v49 }
 0x840   :  { %v6233_v6 = vadd.f32 %v3618_v25, %v8553_v22  ;;  %6519 = vtanh.f32 %v7938_v44  ;;  %v6249_v18 = vadd.f32 %v3689_v26, %v8494_v35 }
 0x841   :  { %v4608_v2 = vmul.f32 -1.442695, %v6232_v7 }
 0x842   :  { %v4609_v13 = vmul.f32 -1.442695, %v6233_v6  ;;  %v4610_v19 = vmul.f32 -1.442695, %v6249_v18 }
 0x843   :  { %6521 = vpow2.f32 %v4608_v2 }
 0x844   :  { %6523 = vpow2.f32 %v4609_v13 }
 0x845   :  { %6525 = vpow2.f32 %v4610_v19 }
 0x846   :  { %6527 = vtanh.f32 %v6248_v23  ;;  %v8792_v23 = vld [vmem:[#allocation24_spill] sm:$0xff] }
 0x84a   :  { %v6520_v48 = vpop.eup %6519 }
 0x84b   :  { %v3547_v1 = vmul.f32 %v6520_v48, %v6518_v3 }
 0x84d   :  { %v6522_v10 = vpop.eup %6521  ;;  %3549 = vst [vmem:[#allocation11 + $0x28] sm:$0xff] %v3547_v1  ;;  %3785 = vmatmul.mubr.f32.vlgmr.msra.gmra.mrb[28].mxu0 %v3547_v1  ;;  %3856 = vmatmul.mubr.f32.vlgmr.msra.gmra.mrb[28].mxu1 %v3547_v1  ;;  %v8797_v1 = vld [vmem:[#allocation29_spill] sm:$0xff] }
 0x84e   :  { %v6524_v4 = vpop.eup %6523  ;;  %v3699_v27 = vadd.f32 1.0, %v6522_v10  ;;  %5967 = vmatpush1.bf16.msra.mxu0 %v8495_v5  ;;  %5999 = vmatpush1.bf16.msra.mxu1 %v8554_v42  ;;  %v8798_v10 = vld [vmem:[#allocation30_spill] sm:$0xff] }
 0x84f   :  { %v3705_v7 = vadd.f32 1.0, %v6524_v4  ;;  %5969 = vmatprep.subr.bf16.mxu0 %v8555_v33  ;;  %6001 = vmatprep.subr.bf16.mxu1 %v8556_v28  ;;  %v6526_v16 = vpop.eup %6525  ;;  %v8801_v4 = vld [vmem:[#allocation33_spill] sm:$0xff] }
 0x850   :  { %6529 = vrcp.f32 %v3699_v27  ;;  %3926 = vmatprep.mubr.f32.mxu0 %v8431_v8  ;;  %3997 = vmatprep.mubr.f32.mxu1 %v8431_v8  ;;  %v6528_v25 = vpop.eup %6527  ;;  %v3712_v13 = vadd.f32 1.0, %v6526_v16  ;;  %v8802_v27 = vld [vmem:[#allocation34_spill] sm:$0xff]  ;;  %v8804_v16 = vld [vmem:[#allocation36_spill] sm:$0xff] }
 0x851   :  { %6531 = vrcp.f32 %v3705_v7  ;;  %v8803_v7 = vld [vmem:[#allocation35_spill] sm:$0xff] }
 0x852   :  { %5971 = vmatpush1.bf16.msra.mxu0 %v8557_v45  ;;  %6003 = vmatpush1.bf16.msra.mxu1 %v8613_v9  ;;  %6533 = vrcp.f32 %v3712_v13  ;;  %v8809_v13 = vld [vmem:[#allocation41_spill] sm:$0xff] }
 0x853   :  { %5973 = vmatprep.subr.bf16.mxu0 %v8614_v43  ;;  %6005 = vmatprep.subr.bf16.mxu1 %v8615_v36 }
 0x856   :  { %5975 = vmatpush1.bf16.msra.mxu0 %v8616_v32  ;;  %6007 = vmatpush1.bf16.msra.mxu1 %v8617_v29 }
 0x857   :  { %5977 = vmatprep.subr.bf16.mxu0 %v8618_v62  ;;  %6009 = vmatprep.subr.bf16.mxu1 %v8619_v58 }
 0x85a   :  { %v6530_v26 = vpop.eup %6529  ;;  %5979 = vmatpush1.bf16.msra.mxu0 %v8620_v14  ;;  %6011 = vmatpush1.bf16.msra.mxu1 %v8508_v37 }
 0x85b   :  { %v6532_v6 = vpop.eup %6531  ;;  %v3716_v2 = vmul.f32 %v6530_v26, %v6528_v25  ;;  %5981 = vmatprep.subr.bf16.mxu0 %v8509_v61  ;;  %6013 = vmatprep.subr.bf16.mxu1 %v8510_v34  ;;  %v8805_v25 = vld [vmem:[#allocation37_spill] sm:$0xff]  ;;  %v8806_v26 = vld [vmem:[#allocation38_spill] sm:$0xff] }
 0x85c   :  { %v3715_v18 = vmul.f32 %v6532_v6, %v7846_v40  ;;  %v6534_v40 = vpop.eup %6533  ;;  %v8807_v6 = vld [vmem:[#allocation39_spill] sm:$0xff] }
 0x85e   :  { %v7964_v3 = vadd.f32 %v3716_v2, %v3715_v18  ;;  %5983 = vmatpush1.bf16.msra.mxu0 %v8566_v52  ;;  %6015 = vmatpush1.bf16.msra.mxu1 %v8567_v21  ;;  %v8808_v2 = vld [vmem:[#allocation40_spill] sm:$0xff]  ;;  %v8810_v18 = vld [vmem:[#allocation42_spill] sm:$0xff] }
 0x85f   :  { %5985 = vmatprep.subr.bf16.mxu0 %v8568_v55  ;;  %6017 = vmatprep.subr.bf16.mxu1 %v8569_v20 }
 0x860   :  { %6535 = vtanh.f32 %v7964_v3 }
 0x862   :  { %5987 = vmatpush1.bf16.msra.mxu0 %v8570_v57  ;;  %6019 = vmatpush1.bf16.msra.mxu1 %v8571_v39 }
 0x863   :  { %5989 = vmatprep.subr.bf16.mxu0 %v8572_v15  ;;  %6021 = vmatprep.subr.bf16.mxu1 %v8518_v0 }
 0x866   :  { %5991 = vmatpush1.bf16.msra.mxu0 %v8519_v31  ;;  %6023 = vmatpush1.bf16.msra.mxu1 %v8520_v24 }
 0x867   :  { %5993 = vmatprep.subr.bf16.mxu0 %v8521_v38  ;;  %6025 = vmatprep.subr.bf16.mxu1 %v8522_v41 }
 0x86a   :  { %v6536_v48 = vpop.eup %6535  ;;  %5995 = vmatpush1.bf16.msra.mxu0 %v8523_v11  ;;  %6027 = vmatpush1.bf16.msra.mxu1 %v8524_v30 }
 0x86b   :  { %6029 = vmatprep.subr.bf16.mxu0 %v8525_v12  ;;  %6061 = vmatprep.subr.bf16.mxu1 %v8526_v59  ;;  %v3719_v19 = vmul.f32 %v6536_v48, %v6534_v40  ;;  %v8790_v12 = vld [vmem:[#allocation22_spill] sm:$0xff]  ;;  %v8791_v59 = vld [vmem:[#allocation23_spill] sm:$0xff]  ;;  %v8812_v48 = vld [vmem:[#allocation44_spill] sm:$0xff] }
 0x86c   :  { %v8811_v40 = vld [vmem:[#allocation43_spill] sm:$0xff] }
 0x86d   :  { %3927 = vmatmul.mubr.f32.vlgmr.msra.gmra.mrb[28].mxu0 %v3719_v19  ;;  %3998 = vmatmul.mubr.f32.vlgmr.msra.gmra.mrb[28].mxu1 %v3719_v19 }
 0x86e   :  { %6031 = vmatpush1.bf16.msra.mxu0 %v6915_v47  ;;  %6063 = vmatpush1.bf16.msra.mxu1 %v6918_v50  ;;  %v8793_v47 = vld [vmem:[#allocation25_spill] sm:$0xff]  ;;  %v8794_v50 = vld [vmem:[#allocation26_spill] sm:$0xff] }
 0x86f   :  { %6033 = vmatprep.subr.bf16.mxu0 %v6921_v53  ;;  %6065 = vmatprep.subr.bf16.mxu1 %v6923_v56  ;;  %v8795_v53 = vld [vmem:[#allocation27_spill] sm:$0xff]  ;;  %v8796_v56 = vld [vmem:[#allocation28_spill] sm:$0xff] }
 0x870   :  { %4098 = vmatprep.mubr.f32.mxu0 %v8431_v8  ;;  %4169 = vmatprep.mubr.f32.mxu1 %v8431_v8 }
 0x872   :  { %6035 = vmatpush1.bf16.msra.mxu0 %v6926_v60  ;;  %6067 = vmatpush1.bf16.msra.mxu1 %v6930_v63  ;;  %v8799_v60 = vld [vmem:[#allocation31_spill] sm:$0xff]  ;;  %v8800_v63 = vld [vmem:[#allocation32_spill] sm:$0xff] }
 0x873   :  { %6037 = vmatprep.subr.bf16.mxu0 %v8790_v12  ;;  %6069 = vmatprep.subr.bf16.mxu1 %v8791_v59  ;;  %v8813_v12 = vld [vmem:[#allocation45_spill] sm:$0xff]  ;;  %v8814_v59 = vld [vmem:[#allocation46_spill] sm:$0xff] }
 0x876   :  { %6039 = vmatpush1.bf16.msra.mxu0 %v8792_v23  ;;  %6071 = vmatpush1.bf16.msra.mxu1 %v8793_v47  ;;  %v8815_v23 = vld [vmem:[#allocation47_spill] sm:$0xff]  ;;  %v8816_v47 = vld [vmem:[#allocation48_spill] sm:$0xff] }
 0x877   :  { %6041 = vmatprep.subr.bf16.mxu0 %v8794_v50  ;;  %6073 = vmatprep.subr.bf16.mxu1 %v8795_v53  ;;  %v8817_v50 = vld [vmem:[#allocation49_spill] sm:$0xff]  ;;  %v8818_v53 = vld [vmem:[#allocation50_spill] sm:$0xff] }
 0x87a   :  { %6043 = vmatpush1.bf16.msra.mxu0 %v8796_v56  ;;  %6075 = vmatpush1.bf16.msra.mxu1 %v8797_v1  ;;  %v8819_v56 = vld [vmem:[#allocation51_spill] sm:$0xff]  ;;  %v8820_v1 = vld [vmem:[#allocation52_spill] sm:$0xff] }
 0x87b   :  { %6045 = vmatprep.subr.bf16.mxu0 %v8798_v10  ;;  %6077 = vmatprep.subr.bf16.mxu1 %v8799_v60  ;;  %v8821_v10 = vld [vmem:[#allocation53_spill] sm:$0xff]  ;;  %v8822_v60 = vld [vmem:[#allocation54_spill] sm:$0xff] }
 0x87e   :  { %6047 = vmatpush1.bf16.msra.mxu0 %v8800_v63  ;;  %6079 = vmatpush1.bf16.msra.mxu1 %v8801_v4  ;;  %v8823_v63 = vld [vmem:[#allocation55_spill] sm:$0xff]  ;;  %v8825_v4 = vld [vmem:[#allocation57_spill] sm:$0xff] }
 0x87f   :  { %6049 = vmatprep.subr.bf16.mxu0 %v8802_v27  ;;  %6081 = vmatprep.subr.bf16.mxu1 %v8803_v7  ;;  %v8826_v27 = vld [vmem:[#allocation58_spill] sm:$0xff]  ;;  %v8827_v7 = vld [vmem:[#allocation59_spill] sm:$0xff] }
 0x882   :  { %6051 = vmatpush1.bf16.msra.mxu0 %v8804_v16  ;;  %6083 = vmatpush1.bf16.msra.mxu1 %v8805_v25  ;;  %v8828_v16 = vld [vmem:[#allocation60_spill] sm:$0xff]  ;;  %v8829_v25 = vld [vmem:[#allocation61_spill] sm:$0xff] }
 0x883   :  { %6053 = vmatprep.subr.bf16.mxu0 %v8806_v26  ;;  %6085 = vmatprep.subr.bf16.mxu1 %v8807_v6  ;;  %v8830_v26 = vld [vmem:[#allocation62_spill] sm:$0xff]  ;;  %v8831_v6 = vld [vmem:[#allocation63_spill] sm:$0xff] }
 0x886   :  { %6055 = vmatpush1.bf16.msra.mxu0 %v8808_v2  ;;  %6087 = vmatpush1.bf16.msra.mxu1 %v8809_v13  ;;  %v8832_v2 = vld [vmem:[#allocation64_spill] sm:$0xff]  ;;  %v8833_v13 = vld [vmem:[#allocation65_spill] sm:$0xff] }
 0x887   :  { %6057 = vmatprep.subr.bf16.mxu0 %v8810_v18  ;;  %6089 = vmatprep.subr.bf16.mxu1 %v8811_v40  ;;  %v8834_v18 = vld [vmem:[#allocation66_spill] sm:$0xff]  ;;  %v8835_v40 = vld [vmem:[#allocation67_spill] sm:$0xff] }
 0x88a   :  { %6059 = vmatpush1.bf16.msra.mxu0 %v8812_v48  ;;  %6091 = vmatpush1.bf16.msra.mxu1 %v8813_v12  ;;  %v8836_v48 = vld [vmem:[#allocation68_spill] sm:$0xff]  ;;  %v8837_v12 = vld [vmem:[#allocation69_spill] sm:$0xff] }
 0x88b   :  { %6093 = vmatprep.subr.bf16.mxu0 %v8814_v59  ;;  %6125 = vmatprep.subr.bf16.mxu1 %v8815_v23  ;;  %v8838_v59 = vld [vmem:[#allocation70_spill] sm:$0xff]  ;;  %v8839_v23 = vld [vmem:[#allocation71_spill] sm:$0xff] }
 0x88d   :  { %4099 = vmatmul.mubr.f32.vlgmr.msra.gmra.mrb[14].mxu0 %v3719_v19  ;;  %4170 = vmatmul.mubr.f32.vlgmr.msra.gmra.mrb[14].mxu1 %v3719_v19  ;;  %v8824_v19 = vld [vmem:[#allocation56_spill] sm:$0xff] }
 0x88e   :  { %6095 = vmatpush1.bf16.msra.mxu0 %v8816_v47  ;;  %6127 = vmatpush1.bf16.msra.mxu1 %v8817_v50  ;;  %v8840_v47 = vld [vmem:[#allocation72_spill] sm:$0xff]  ;;  %v8841_v50 = vld [vmem:[#allocation73_spill] sm:$0xff] }
 0x88f   :  { %6097 = vmatprep.subr.bf16.mxu0 %v8818_v53  ;;  %6129 = vmatprep.subr.bf16.mxu1 %v8819_v56  ;;  %v8842_v53 = vld [vmem:[#allocation74_spill] sm:$0xff]  ;;  %v8843_v56 = vld [vmem:[#allocation75_spill] sm:$0xff] }
 0x890   :  { %4268 = vmatprep.mubr.f32.mxu0 %v8431_v8  ;;  %4339 = vmatprep.mubr.f32.mxu1 %v8431_v8 }
 0x892   :  { %6099 = vmatpush1.bf16.msra.mxu0 %v8820_v1  ;;  %6131 = vmatpush1.bf16.msra.mxu1 %v8821_v10  ;;  %v8844_v1 = vld [vmem:[#allocation76_spill] sm:$0xff]  ;;  %v8845_v10 = vld [vmem:[#allocation77_spill] sm:$0xff] }
 0x893   :  { %6101 = vmatprep.subr.bf16.mxu0 %v8822_v60  ;;  %6133 = vmatprep.subr.bf16.mxu1 %v8823_v63  ;;  %v8846_v60 = vld [vmem:[#allocation78_spill] sm:$0xff]  ;;  %v8847_v63 = vld [vmem:[#allocation79_spill] sm:$0xff] }
 0x896   :  { %6103 = vmatpush1.bf16.msra.mxu0 %v8824_v19  ;;  %6135 = vmatpush1.bf16.msra.mxu1 %v8825_v4 }
 0x897   :  { %6105 = vmatprep.subr.bf16.mxu0 %v8826_v27  ;;  %6137 = vmatprep.subr.bf16.mxu1 %v8827_v7  ;;  %v8848_v27 = vld [vmem:[#allocation113_spill] sm:$0xff] }
 0x89a   :  { %6107 = vmatpush1.bf16.msra.mxu0 %v8828_v16  ;;  %6139 = vmatpush1.bf16.msra.mxu1 %v8829_v25 }
 0x89b   :  { %6109 = vmatprep.subr.bf16.mxu0 %v8830_v26  ;;  %6141 = vmatprep.subr.bf16.mxu1 %v8831_v6 }
 0x89e   :  { %6111 = vmatpush1.bf16.msra.mxu0 %v8832_v2  ;;  %6143 = vmatpush1.bf16.msra.mxu1 %v8833_v13 }
 0x89f   :  { %6113 = vmatprep.subr.bf16.mxu0 %v8834_v18  ;;  %6145 = vmatprep.subr.bf16.mxu1 %v8835_v40 }
 0x8a2   :  { %6115 = vmatpush1.bf16.msra.mxu0 %v8836_v48  ;;  %6147 = vmatpush1.bf16.msra.mxu1 %v8837_v12 }
 0x8a3   :  { %6117 = vmatprep.subr.bf16.mxu0 %v8838_v59  ;;  %6149 = vmatprep.subr.bf16.mxu1 %v8839_v23 }
 0x8a6   :  { %6119 = vmatpush1.bf16.msra.mxu0 %v8840_v47  ;;  %6151 = vmatpush1.bf16.msra.mxu1 %v8841_v50 }
 0x8a7   :  { %6121 = vmatprep.subr.bf16.mxu0 %v8842_v53  ;;  %6153 = vmatprep.subr.bf16.mxu1 %v8843_v56 }
 0x8aa   :  { %6123 = vmatpush1.bf16.msra.mxu0 %v8844_v1  ;;  %6155 = vmatpush1.bf16.msra.mxu1 %v8845_v10 }
 0x8ab   :  { %6157 = vmatprep.subr.bf16.mxu0 %v8846_v60  ;;  %6189 = vmatprep.subr.bf16.mxu1 %v8847_v63 }
 0x940   :  { %v3928_v19 = vpop.f32.mrb[28].mxu0  ;;  %v3999_v4 = vpop.f32.mrb[28].mxu1 }
 0x941   :  { %v4004_v7 = vadd.f32 %v3928_v19, %v8848_v27  ;;  %v3930_v16 = vpop.f32.mrb[29].mxu0  ;;  %v4001_v25 = vpop.f32.mrb[29].mxu1  ;;  %v4006_v40 = vadd.f32 %v3999_v4, %v8612_v54 }
 0x942   :  { %v4005_v26 = vadd.f32 %v3930_v16, %v8550_v46  ;;  %v4007_v13 = vadd.f32 %v4001_v25, %v8551_v17 }
 0x943   :  { %v4611_v6 = vmul.f32 -1.442695, %v4004_v7 }
 0x944   :  { %v4612_v2 = vmul.f32 -1.442695, %v4005_v26  ;;  %v4613_v18 = vmul.f32 -1.442695, %v4007_v13 }
 0x945   :  { %6537 = vpow2.f32 %v4611_v6 }
 0x946   :  { %6539 = vpow2.f32 %v4612_v2 }
 0x947   :  { %6541 = vpow2.f32 %v4613_v18 }
 0x948   :  { %6543 = vtanh.f32 %v4006_v40 }
 0x94f   :  { %v6538_v48 = vpop.eup %6537 }
 0x950   :  { %v6540_v12 = vpop.eup %6539  ;;  %v4011_v59 = vadd.f32 1.0, %v6538_v48 }
 0x951   :  { %v4017_v23 = vadd.f32 1.0, %v6540_v12  ;;  %v6542_v47 = vpop.eup %6541 }
 0x952   :  { %6545 = vrcp.f32 %v4011_v59  ;;  %v6544_v50 = vpop.eup %6543  ;;  %v4024_v10 = vadd.f32 1.0, %v6542_v47 }
 0x953   :  { %6547 = vrcp.f32 %v4017_v23 }
 0x954   :  { %6549 = vrcp.f32 %v4024_v10 }
 0x95c   :  { %v6546_v53 = vpop.eup %6545 }
 0x95d   :  { %v6548_v56 = vpop.eup %6547  ;;  %v4028_v1 = vmul.f32 %v6546_v53, %v6544_v50 }
 0x95e   :  { %v4027_v60 = vmul.f32 %v6548_v56, %v7938_v44  ;;  %v6550_v44 = vpop.eup %6549 }
 0x960   :  { %v8056_v63 = vadd.f32 %v4028_v1, %v4027_v60  ;;  %v4100_v19 = vpop.f32.mrb[14].mxu0  ;;  %v4171_v4 = vpop.f32.mrb[14].mxu1 }
 0x961   :  { %v6234_v7 = vadd.f32 %v4100_v19, %v8492_v51  ;;  %v4102_v16 = vpop.f32.mrb[15].mxu0  ;;  %v4173_v25 = vpop.f32.mrb[15].mxu1  ;;  %v6250_v48 = vadd.f32 %v4171_v4, %v7251_v49 }
 0x962   :  { %v6235_v26 = vadd.f32 %v4102_v16, %v8553_v22  ;;  %6551 = vtanh.f32 %v8056_v63  ;;  %v6251_v13 = vadd.f32 %v4173_v25, %v8494_v35 }
 0x963   :  { %v4614_v6 = vmul.f32 -1.442695, %v6234_v7 }
 0x964   :  { %v4615_v2 = vmul.f32 -1.442695, %v6235_v26  ;;  %v4616_v40 = vmul.f32 -1.442695, %v6251_v13 }
 0x965   :  { %6553 = vpow2.f32 %v4614_v6 }
 0x966   :  { %6555 = vpow2.f32 %v4615_v2 }
 0x967   :  { %6557 = vpow2.f32 %v4616_v40 }
 0x968   :  { %6559 = vtanh.f32 %v6250_v48 }
 0x96c   :  { %v6552_v18 = vpop.eup %6551 }
 0x96d   :  { %v4031_v12 = vmul.f32 %v6552_v18, %v6550_v44 }
 0x96f   :  { %v6554_v59 = vpop.eup %6553  ;;  %4033 = vst [vmem:[#allocation11 + $0x30] sm:$0xff] %v4031_v12  ;;  %4269 = vmatmul.mubr.f32.vlgmr.msra.gmra.mrb[30].mxu0 %v4031_v12  ;;  %4340 = vmatmul.mubr.f32.vlgmr.msra.gmra.mrb[30].mxu1 %v4031_v12 }
 0x970   :  { %v6556_v51 = vpop.eup %6555  ;;  %v4183_v22 = vadd.f32 1.0, %v6554_v59  ;;  %6159 = vmatpush1.bf16.msra.mxu0 %v8495_v5  ;;  %6191 = vmatpush1.bf16.msra.mxu1 %v8554_v42 }
 0x971   :  { %v4189_v23 = vadd.f32 1.0, %v6556_v51  ;;  %6161 = vmatprep.subr.bf16.mxu0 %v8555_v33  ;;  %6193 = vmatprep.subr.bf16.mxu1 %v8556_v28  ;;  %v6558_v49 = vpop.eup %6557 }
 0x972   :  { %6561 = vrcp.f32 %v4183_v22  ;;  %4410 = vmatprep.mubr.f32.mxu0 %v8431_v8  ;;  %4481 = vmatprep.mubr.f32.mxu1 %v8431_v8  ;;  %v6560_v5 = vpop.eup %6559  ;;  %v4196_v33 = vadd.f32 1.0, %v6558_v49 }
 0x973   :  { %6563 = vrcp.f32 %v4189_v23 }
 0x974   :  { %6163 = vmatpush1.bf16.msra.mxu0 %v8557_v45  ;;  %6195 = vmatpush1.bf16.msra.mxu1 %v8613_v9  ;;  %6565 = vrcp.f32 %v4196_v33 }
 0x975   :  { %6165 = vmatprep.subr.bf16.mxu0 %v8614_v43  ;;  %6197 = vmatprep.subr.bf16.mxu1 %v8615_v36 }
 0x978   :  { %6167 = vmatpush1.bf16.msra.mxu0 %v8616_v32  ;;  %6199 = vmatpush1.bf16.msra.mxu1 %v8617_v29 }
 0x979   :  { %6169 = vmatprep.subr.bf16.mxu0 %v8618_v62  ;;  %6201 = vmatprep.subr.bf16.mxu1 %v8619_v58 }
 0x97c   :  { %v6562_v8 = vpop.eup %6561  ;;  %6171 = vmatpush1.bf16.msra.mxu0 %v8620_v14  ;;  %6203 = vmatpush1.bf16.msra.mxu1 %v8508_v37 }
 0x97d   :  { %v6564_v35 = vpop.eup %6563  ;;  %v4200_v42 = vmul.f32 %v6562_v8, %v6560_v5  ;;  %6173 = vmatprep.subr.bf16.mxu0 %v8509_v61  ;;  %6205 = vmatprep.subr.bf16.mxu1 %v8510_v34 }
 0x97e   :  { %v4199_v28 = vmul.f32 %v6564_v35, %v7964_v3  ;;  %v6566_v61 = vpop.eup %6565 }
 0x980   :  { %v4201_v45 = vadd.f32 %v4200_v42, %v4199_v28  ;;  %6175 = vmatpush1.bf16.msra.mxu0 %v8566_v52  ;;  %6207 = vmatpush1.bf16.msra.mxu1 %v8567_v21 }
 0x981   :  { %6177 = vmatprep.subr.bf16.mxu0 %v8568_v55  ;;  %6209 = vmatprep.subr.bf16.mxu1 %v8569_v20 }
 0x982   :  { %4519 = vst [vmem:[#allocation14] sm:$0xff] %v4201_v45  ;;  %6567 = vtanh.f32 %v4201_v45 }
 0x984   :  { %6179 = vmatpush1.bf16.msra.mxu0 %v8570_v57  ;;  %6211 = vmatpush1.bf16.msra.mxu1 %v8571_v39 }
 0x985   :  { %6181 = vmatprep.subr.bf16.mxu0 %v8572_v15  ;;  %6213 = vmatprep.subr.bf16.mxu1 %v8518_v0 }
 0x988   :  { %6183 = vmatpush1.bf16.msra.mxu0 %v8519_v31  ;;  %6215 = vmatpush1.bf16.msra.mxu1 %v8520_v24 }
 0x989   :  { %6185 = vmatprep.subr.bf16.mxu0 %v8521_v38  ;;  %6217 = vmatprep.subr.bf16.mxu1 %v8522_v41 }
 0x98c   :  { %v6568_v37 = vpop.eup %6567  ;;  %6187 = vmatpush1.bf16.msra.mxu0 %v8523_v11  ;;  %6219 = vmatpush1.bf16.msra.mxu1 %v8524_v30 }
 0x98d   :  { %v4203_v34 = vmul.f32 %v6568_v37, %v6566_v61 }
 0x98f   :  { %4411 = vmatmul.mubr.f32.vlgmr.msra.gmra.mrb[30].mxu0 %v4203_v34  ;;  %4518 = vst [vmem:[#allocation12] sm:$0xff] %v4203_v34  ;;  %4482 = vmatmul.mubr.f32.vlgmr.msra.gmra.mrb[30].mxu1 %v4203_v34 }
 0xa62   :  { %v4412_v55 = vpop.f32.mrb[30].mxu0  ;;  %v4483_v0 = vpop.f32.mrb[30].mxu1 }
 0xa63   :  { %v4488_v31 = vadd.f32 %v4412_v55, %v8848_v27  ;;  %v4414_v52 = vpop.f32.mrb[31].mxu0  ;;  %v4485_v24 = vpop.f32.mrb[31].mxu1  ;;  %v4490_v30 = vadd.f32 %v4483_v0, %v8612_v54 }
 0xa64   :  { %v4489_v38 = vadd.f32 %v4414_v52, %v8550_v46  ;;  %v4491_v11 = vadd.f32 %v4485_v24, %v8551_v17 }
 0xa65   :  { %v4617_v21 = vmul.f32 -1.442695, %v4488_v31 }
 0xa66   :  { %v4618_v41 = vmul.f32 -1.442695, %v4489_v38  ;;  %v4619_v20 = vmul.f32 -1.442695, %v4491_v11 }
 0xa67   :  { %6569 = vpow2.f32 %v4617_v21 }
 0xa68   :  { %6571 = vpow2.f32 %v4618_v41 }
 0xa69   :  { %6573 = vpow2.f32 %v4619_v20 }
 0xa6a   :  { %6575 = vtanh.f32 %v4490_v30 }
 0xa71   :  { %v6570_v57 = vpop.eup %6569 }
 0xa72   :  { %v6572_v39 = vpop.eup %6571  ;;  %v4495_v15 = vadd.f32 1.0, %v6570_v57 }
 0xa73   :  { %v4501_v9 = vadd.f32 1.0, %v6572_v39  ;;  %v6574_v43 = vpop.eup %6573 }
 0xa74   :  { %6577 = vrcp.f32 %v4495_v15  ;;  %v6576_v36 = vpop.eup %6575  ;;  %v4508_v62 = vadd.f32 1.0, %v6574_v43 }
 0xa75   :  { %6579 = vrcp.f32 %v4501_v9 }
 0xa76   :  { %6581 = vrcp.f32 %v4508_v62 }
 0xa7e   :  { %v6578_v46 = vpop.eup %6577 }
 0xa7f   :  { %v6580_v32 = vpop.eup %6579  ;;  %v4512_v29 = vmul.f32 %v6578_v46, %v6576_v36 }
 0xa80   :  { %v4511_v58 = vmul.f32 %v6580_v32, %v8056_v63  ;;  %v6582_v54 = vpop.eup %6581 }
 0xa82   :  { %v4513_v17 = vadd.f32 %v4512_v29, %v4511_v58 }
 0xa84   :  { %6583 = vtanh.f32 %v4513_v17  ;;  %4521 = vst [vmem:[#allocation14 + $0x8] sm:$0xff] %v4513_v17 }
 0xa8e   :  { %v6584_v14 = vpop.eup %6583 }
 0xa8f   :  { %v4515_v3 = vmul.f32 %v6584_v14, %v6582_v54 }
 0xa91   :  { %4517 = vst [vmem:[#allocation11 + $0x38] sm:$0xff] %v4515_v3  ;;  %4520 = vst [vmem:[#allocation12 + $0x8] sm:$0xff] %v4515_v3 }
 0xa92   :  { %6706 = shalt.err (!%p6703_p2)
}
 0xa93   :  { %s6707_s0 = scalar_lea.hbm %s8168_s8, 256 }
 0xa94   :  { %p6708_p3 = scmp.ne.s32.totalorder %s8168_s8, %s6707_s0  ;;  %p6711_p4 = scmp.lt.u32.totalorder %s6707_s0, %s8168_s8 }
 0xa96   :  { %p6713_p5 = pnand %p6711_p4, %p6708_p3 }
 0xa98   :  { %6716 = shalt.err (!%p6713_p5)
}
 0xa99   :  { %4545 = dma.vmem_to_hbm [thread:$0]  %s4540_s12, 256, %s8168_s8, [#allocation13], %s6776_s4, %s6776_s4, %s6777_s24  }
 0xa9a   :  { %s6717_s27 = scalar_lea.vmem %s8101_s1, 1024  ;;  %p6722_p7 = scmp.lt.s32.totalorder %s8101_s1, %s8101_s1 }
 0xa9b   :  { %p6718_p6 = scmp.ne.s32.totalorder %s8101_s1, %s6717_s27  ;;  %p6723_p8 = scmp.lt.s32.totalorder %s6717_s27, %s6717_s27 }
 0xa9d   :  { %p6724_p9 = por %p6723_p8, %p6722_p7 }
 0xa9f   :  { %p6725_p10 = pnand %p6724_p9, %p6718_p6 }
 0xaa1   :  { %6728 = shalt.err (!%p6725_p10)
}
 0xaa2   :  { %s6729_s11 = scalar_lea.hbm %s8167_s7, 1024 }
 0xaa3   :  { %p6730_p11 = scmp.ne.s32.totalorder %s8167_s7, %s6729_s11  ;;  %p6733_p12 = scmp.lt.u32.totalorder %s6729_s11, %s8167_s7 }
 0xaa5   :  { %p6735_p13 = pnand %p6733_p12, %p6730_p11 }
 0xaa7   :  { %6738 = shalt.err (!%p6735_p13)
}
 0xaa8   :  { %4533 = dma.vmem_to_hbm [thread:$0]  %s8101_s1, 1024, %s8167_s7, [#allocation4], %s6776_s4, %s6776_s4, %s6777_s24  }
 0xaa9   :  { %s6739_s20 = scalar_lea.vmem %s8103_s14, 256  ;;  %p6744_p1 = scmp.lt.s32.totalorder %s8103_s14, %s8103_s14 }
 0xaaa   :  { %p6740_p0 = scmp.ne.s32.totalorder %s8103_s14, %s6739_s20  ;;  %p6745_p2 = scmp.lt.s32.totalorder %s6739_s20, %s6739_s20 }
 0xaac   :  { %p6746_p3 = por %p6745_p2, %p6744_p1 }
 0xaae   :  { %p6747_p4 = pnand %p6746_p3, %p6740_p0 }
 0xab0   :  { %6750 = shalt.err (!%p6747_p4)
}
 0xab1   :  { %s6751_s13 = scalar_lea.hbm %s8169_s9, 256 }
 0xab2   :  { %p6752_p5 = scmp.ne.s32.totalorder %s8169_s9, %s6751_s13  ;;  %p6755_p6 = scmp.lt.u32.totalorder %s6751_s13, %s8169_s9 }
 0xab4   :  { %p6757_p7 = pnand %p6755_p6, %p6752_p5 }
 0xab6   :  { %6760 = shalt.err (!%p6757_p7)
}
 0xab7   :  { %4557 = dma.vmem_to_hbm [thread:$0]  %s8103_s14, 256, %s8169_s9, [#allocation13], %s6776_s4, %s6776_s4, %s6777_s24  }
 0xab8   :  { %6767 = dma.done.wait [#allocation4], 1024  }
 0xab9   :  { %6768 = vsyncadd [#allocation4], 4294966272 }
 0xaba   :  { %6769 = dma.done.wait [#allocation13], 512  }
 0xabb   :  { %6770 = vsyncadd [#allocation13], 4294966784 }
 0xabc   :  { %4567 = vsyncpa [#allocation3], 1 }
 0xabd   :  { %4568 = vsyncpa [#allocation6], 1 }
 0xabe   :  { %4569 = vsyncpa [#allocation9], 1 }
 0xabf   :  { %4570 = vsyncpa [#allocation4], 1 }
 0xac0   :  { %4571 = vsyncpa [#allocation13], 1 }

</bundles_post_ra>
